<compile_context>
chip_gen: v7x
topology: tpu7x:2x2x1
jax: 0.10.0
libtpu: 0.0.40
codegen_flags: <defaults>
</compile_context>

<pallas_src>
import math

import jax
import jax.numpy as jnp
from jax.experimental import pallas as pl
from jax.experimental.pallas import tpu as pltpu

EMBED_LEN = 128
HIDDEN_DIM = 128
N_LAYERS = 3
VOCAB_SIZE = 100  # stand-in for len(vocab)
DIN = 2 * HIDDEN_DIM  # shared input-GEMM K for all layers (layer 0 zero-padded)
assert EMBED_LEN <= DIN
# TODO(synk): vocab building from the text dataset has no kernel analogue;
# a fixed-size synthetic embedding table is used instead.


def _bilstm_stack_kernel(x_ref, wih_ref, whh_ref, b_ref, h0_ref, c0_ref,
                         lw_ref, lb_ref, out_ref, gates_scr, seq_scr):
    """One grid step == one bidirectional LSTM layer (+ fused head at the end).

    x_ref:     [T*Bp, DIN]  bf16   time-major embeddings, feature-padded
    wih_ref:   [DIN, 8H]    bf16   columns: [fwd i,f,g,o | rev i,f,g,o]
    whh_ref:   [H, 8H]      bf16   same column layout
    b_ref:     [1, 8H]      f32    b_ih + b_hh, both directions
    h0_ref:    [2*Bp, H]    f32    rows :Bp fwd init, Bp: rev init
    c0_ref:    [2*Bp, H]    f32
    lw_ref:    [1, 2H] f32, lb_ref: [1, 1] f32
    out_ref:   [Bp, 1]      f32
    gates_scr: [T*Bp, 8H]   f32 VMEM   hoisted input-GEMM result
    seq_scr:   [T*Bp, 2H]   f32 VMEM   current layer's output sequence
    """
    layer = pl.program_id(0)
    n_layers = pl.num_programs(0)

    two_bp, H = h0_ref.shape
    Bp = two_bp // 2
    G = 4 * H                       # per-direction gate width
    H2 = 2 * H
    TB = gates_scr.shape[0]
    T = TB // Bp

    # ---- hoisted input GEMM: all T timesteps x both directions at once ----
    @pl.when(layer == 0)
    def _():
        gates_scr[...] = jnp.dot(
            x_ref[...], wih_ref[...],
            preferred_element_type=jnp.float32) + b_ref[...]

    @pl.when(layer != 0)
    def _():
        # Previous layer's sequence (fully consumed here, so the time loop
        # below may overwrite seq_scr in place).
        gates_scr[...] = jnp.dot(
            seq_scr[...].astype(jnp.bfloat16), wih_ref[...],
            preferred_element_type=jnp.float32) + b_ref[...]

    # ---- recurrence: fused fwd+rev, fully unrolled time loop ----
    h = h0_ref[...]                 # [2Bp, H] f32, rows :Bp fwd / Bp: rev
    c = c0_ref[...]

    for s in range(T):
        sr = T - 1 - s
        # Single fused recurrent matmul; stream W_hh straight from the ref
        # (no layer-long 128-vreg live value).
        gg = jnp.dot(h.astype(jnp.bfloat16), whh_ref[...],
                     preferred_element_type=jnp.float32)        # [2Bp, 8H]
        g = jnp.concatenate(
            [gates_scr[s * Bp:(s + 1) * Bp, :G] + gg[:Bp, :G],     # fwd @ t=s
             gates_scr[sr * Bp:(sr + 1) * Bp, G:] + gg[Bp:, G:]],  # rev @ t=sr
            axis=0)                                              # [2Bp, 4H]

        # sigmoid(x) = 0.5*tanh(0.5*x) + 0.5 : one EUP op per block; the
        # contiguous i|f block is activated in one call, o separately.
        if_g = 0.5 * jnp.tanh(0.5 * g[:, :H2]) + 0.5             # [2Bp, 2H]
        o_g = 0.5 * jnp.tanh(0.5 * g[:, 3 * H:]) + 0.5           # [2Bp, H]
        g_g = jnp.tanh(g[:, H2:3 * H])                           # [2Bp, H]
        c = if_g[:, H:] * c + if_g[:, :H] * g_g
        h = o_g * jnp.tanh(c)

        # fwd hidden belongs to output time s; rev hidden (just consumed
        # x_{T-1-s}) belongs to output time T-1-s.
        seq_scr[s * Bp:(s + 1) * Bp, :H] = h[:Bp]
        seq_scr[sr * Bp:(sr + 1) * Bp, H:] = h[Bp:]

    # ---- fused head: Linear(2H, 1) on the last timestep (== output[:, -1]) ----
    @pl.when(layer == n_layers - 1)
    def _():
        last = seq_scr[(T - 1) * Bp:T * Bp, :]                   # [Bp, 2H]
        out_ref[...] = (jnp.sum(last * lw_ref[...], axis=-1, keepdims=True)
                        + lb_ref[...])


def lstm_forward(params, tokens, hx, cx):
    """tokens: [B, T] int32; hx, cx: [2*N_LAYERS, B, H] (PyTorch order 2*l+d).
    Returns [B, 1] float32."""
    B, T = tokens.shape
    H = HIDDEN_DIM
    Bp = ((B + 7) // 8) * 8        # pad batch to full sublane width

    # TODO(synk): embedding lookup stays in plain JAX (gather glue).
    emb = jnp.take(params["embedding"], tokens, axis=0)        # [B, T, E]
    x = jnp.transpose(emb, (1, 0, 2))                          # [T, B, E]
    x = jnp.pad(x, ((0, 0), (0, Bp - B), (0, 0)))              # [T, Bp, E]
    x2d = x.reshape(T * Bp, EMBED_LEN)                         # time-major rows
    x2d = jnp.pad(x2d, ((0, 0), (0, DIN - EMBED_LEN)))         # K pad 128->256
    x2d = x2d.astype(jnp.bfloat16)

    def pack_state(s):
        # [2L, B, H] (PyTorch 2*l+d order) -> [L, 2*Bp, H]: fwd rows first.
        s = s.reshape(N_LAYERS, 2, B, H)
        s = jnp.pad(s, ((0, 0), (0, 0), (0, Bp - B), (0, 0)))
        return s.reshape(N_LAYERS, 2 * Bp, H)

    h0 = pack_state(hx)
    c0 = pack_state(cx)

    grid_spec = pltpu.PrefetchScalarGridSpec(
        num_scalar_prefetch=0,
        grid=(N_LAYERS,),
        in_specs=[
            pl.BlockSpec((T * Bp, DIN), lambda l: (0, 0)),         # x2d (const)
            pl.BlockSpec((None, DIN, 8 * H), lambda l: (l, 0, 0)),  # W_ih[l]
            pl.BlockSpec((None, H, 8 * H), lambda l: (l, 0, 0)),    # W_hh[l]
            pl.BlockSpec((None, 1, 8 * H), lambda l: (l, 0, 0)),    # b[l]
            pl.BlockSpec((None, 2 * Bp, H), lambda l: (l, 0, 0)),   # h0[l]
            pl.BlockSpec((None, 2 * Bp, H), lambda l: (l, 0, 0)),   # c0[l]
            pl.BlockSpec((1, 2 * H), lambda l: (0, 0)),             # lin_w
            pl.BlockSpec((1, 1), lambda l: (0, 0)),                 # lin_b
        ],
        out_specs=pl.BlockSpec((Bp, 1), lambda l: (0, 0)),
        scratch_shapes=[
            pltpu.VMEM((T * Bp, 8 * H), jnp.float32),   # hoisted input gates
            pltpu.VMEM((T * Bp, 2 * H), jnp.float32),   # layer output sequence
        ],
    )

    out_pad = pl.pallas_call(
        _bilstm_stack_kernel,
        out_shape=jax.ShapeDtypeStruct((Bp, 1), jnp.float32),
        grid_spec=grid_spec,
        compiler_params=pltpu.CompilerParams(
            dimension_semantics=("arbitrary",),       # layers are serialized
            vmem_limit_bytes=32 * 1024 * 1024,        # explicit headroom
        ),
    )(x2d,
      params["w_ih"], params["w_hh"], params["b"],
      h0, c0, params["lin_w"], params["lin_b"])

    return out_pad[:B]


def init_params(key):
    """Deterministic synthetic params with the same shapes/init scheme as
    nn.Embedding / nn.LSTM(bidirectional, 3 layers) / nn.Linear(256, 1),
    pre-packed into stacked [L, DIN, 8H] / [L, H, 8H] bf16 weights the kernel
    uses (fwd columns first, then rev; gate order i, f, g, o within each;
    layer-0 K zero-padded 128 -> DIN)."""
    params = {}
    key, sub = jax.random.split(key)
    params["embedding"] = jax.random.normal(
        sub, (VOCAB_SIZE, EMBED_LEN), jnp.float32)

    k = 1.0 / math.sqrt(HIDDEN_DIM)
    wih_layers, whh_layers, b_layers = [], [], []
    for l in range(N_LAYERS):
        in_dim = EMBED_LEN if l == 0 else 2 * HIDDEN_DIM
        wih_cols, whh_cols, b_cols = [], [], []
        for d in range(2):  # 0 = forward, 1 = reverse
            key, k1, k2, k3, k4 = jax.random.split(key, 5)
            w_ih = jax.random.uniform(
                k1, (4 * HIDDEN_DIM, in_dim), jnp.float32, -k, k)
            w_hh = jax.random.uniform(
                k2, (4 * HIDDEN_DIM, HIDDEN_DIM), jnp.float32, -k, k)
            b_ih = jax.random.uniform(k3, (4 * HIDDEN_DIM,), jnp.float32, -k, k)
            b_hh = jax.random.uniform(k4, (4 * HIDDEN_DIM,), jnp.float32, -k, k)
            wih_cols.append(w_ih.T)                 # [in_dim, 4H]
            whh_cols.append(w_hh.T)                 # [H, 4H]
            b_cols.append(b_ih + b_hh)              # [4H]
        wih = jnp.concatenate(wih_cols, axis=1)                   # [in_dim, 8H]
        wih = jnp.pad(wih, ((0, DIN - in_dim), (0, 0)))           # [DIN, 8H]
        wih_layers.append(wih)
        whh_layers.append(jnp.concatenate(whh_cols, axis=1))      # [H, 8H]
        b_layers.append(jnp.concatenate(b_cols)[None, :])         # [1, 8H]

    params["w_ih"] = jnp.stack(wih_layers).astype(jnp.bfloat16)   # [L, DIN, 8H]
    params["w_hh"] = jnp.stack(whh_layers).astype(jnp.bfloat16)   # [L, H, 8H]
    params["b"] = jnp.stack(b_layers)                             # [L, 1, 8H] f32

    kl = 1.0 / math.sqrt(2 * HIDDEN_DIM)
    key, k1, k2 = jax.random.split(key, 3)
    params["lin_w"] = jax.random.uniform(
        k1, (1, 2 * HIDDEN_DIM), jnp.float32, -kl, kl)
    params["lin_b"] = jax.random.uniform(k2, (1, 1), jnp.float32, -kl, kl)
    return params


if __name__ == "__main__":
    key = jax.random.PRNGKey(0)
    kp, kt, kh, kc = jax.random.split(key, 4)

    params = init_params(kp)

    B, T = 2, 8
    tokens = jax.random.randint(kt, (B, T), 0, VOCAB_SIZE, dtype=jnp.int32)
    # The PyTorch forward draws random initial states every call; reproduce
    # deterministically with a fixed PRNG key.
    hx = jax.random.normal(kh, (2 * N_LAYERS, B, HIDDEN_DIM), jnp.float32)
    cx = jax.random.normal(kc, (2 * N_LAYERS, B, HIDDEN_DIM), jnp.float32)

    out = jax.jit(lstm_forward)(params, tokens, hx, cx)
    jax.block_until_ready(out)
    assert out.shape == (B, 1) and out.dtype == jnp.float32
    assert bool(jnp.all(jnp.isfinite(out)))
    print("KERNEL_OK")
</pallas_src>

<mosaic_0001>
module attributes {stable_mosaic.version = 11 : i64} {
  func.func @_bilstm_stack_kernel(%arg0: i32, %arg1: memref<64x256xbf16, #tpu.memory_space<vmem>>, %arg2: memref<1x256x1024xbf16, #tpu.memory_space<vmem>>, %arg3: memref<1x128x1024xbf16, #tpu.memory_space<vmem>>, %arg4: memref<1x1x1024xf32, #tpu.memory_space<vmem>>, %arg5: memref<1x16x128xf32, #tpu.memory_space<vmem>>, %arg6: memref<1x16x128xf32, #tpu.memory_space<vmem>>, %arg7: memref<1x256xf32, #tpu.memory_space<vmem>>, %arg8: memref<1x1xf32, #tpu.memory_space<vmem>>, %arg9: memref<8x1xf32, #tpu.memory_space<vmem>>, %arg10: memref<64x1024xf32, #tpu.memory_space<vmem>>, %arg11: memref<64x256xf32, #tpu.memory_space<vmem>>) attributes {dimension_semantics = [#tpu.dimension_semantics<arbitrary>], iteration_bounds = array<i64: 3>, scalar_prefetch = 0 : i64, scratch_operands = 2 : i64, tpu.core_type = #tpu.core_type<tc>, window_params = [{pipeline_mode = #tpu.pipeline_mode<synchronous>, transform_indices = @transform_0, window_bounds = array<i64: 64, 256>}, {transform_indices = @transform_1, window_bounds = array<i64: 1, 256, 1024>}, {transform_indices = @transform_2, window_bounds = array<i64: 1, 128, 1024>}, {transform_indices = @transform_3, window_bounds = array<i64: 1, 1, 1024>}, {transform_indices = @transform_4, window_bounds = array<i64: 1, 16, 128>}, {transform_indices = @transform_5, window_bounds = array<i64: 1, 16, 128>}, {pipeline_mode = #tpu.pipeline_mode<synchronous>, transform_indices = @transform_6, window_bounds = array<i64: 1, 256>}, {pipeline_mode = #tpu.pipeline_mode<synchronous>, transform_indices = @transform_7, window_bounds = array<i64: 1, 1>}, {pipeline_mode = #tpu.pipeline_mode<synchronous>, transform_indices = @transform_8, window_bounds = array<i64: 8, 1>}]} {
    %c0_i32 = arith.constant 0 : i32
    %0 = arith.cmpi eq, %arg0, %c0_i32 : i32
    %1 = arith.extui %0 : i1 to i32
    %c0_i32_0 = arith.constant 0 : i32
    %2 = arith.cmpi ne, %1, %c0_i32_0 : i32
    scf.if %2 {
      %c0_143 = arith.constant 0 : index
      %c0_144 = arith.constant 0 : index
      %333 = vector.load %arg1[%c0_143, %c0_144] : memref<64x256xbf16, #tpu.memory_space<vmem>>, vector<64x256xbf16>
      %c0_145 = arith.constant 0 : index
      %c0_146 = arith.constant 0 : index
      %c0_147 = arith.constant 0 : index
      %334 = vector.load %arg2[%c0_145, %c0_146, %c0_147] : memref<1x256x1024xbf16, #tpu.memory_space<vmem>>, vector<1x256x1024xbf16>
      %335 = vector.shape_cast %334 : vector<1x256x1024xbf16> to vector<256x1024xbf16>
      %cst_148 = arith.constant dense<0.000000e+00> : vector<64x1024xf32>
      %336 = tpu.matmul %333, %335, %cst_148 {dimension_numbers = #tpu.dot_dimension_numbers<[1], [0], [0], [1], [0, 0, 1, 1], [], []>} : vector<64x256xbf16>, vector<256x1024xbf16>, vector<64x1024xf32> -> vector<64x1024xf32>
      %c0_149 = arith.constant 0 : index
      %c0_150 = arith.constant 0 : index
      %c0_151 = arith.constant 0 : index
      %337 = vector.load %arg4[%c0_149, %c0_150, %c0_151] : memref<1x1x1024xf32, #tpu.memory_space<vmem>>, vector<1x1x1024xf32>
      %338 = vector.shape_cast %337 : vector<1x1x1024xf32> to vector<1x1024xf32>
      %339 = vector.broadcast %338 : vector<1x1024xf32> to vector<64x1024xf32>
      %340 = arith.addf %336, %339 : vector<64x1024xf32>
      %c0_152 = arith.constant 0 : index
      %c0_153 = arith.constant 0 : index
      %341 = vector.load %arg10[%c0_152, %c0_153] : memref<64x1024xf32, #tpu.memory_space<vmem>>, vector<64x1024xf32>
      tpu.vector_store %arg10[%c0_152, %c0_153], %340 {strides = array<i32>} : memref<64x1024xf32, #tpu.memory_space<vmem>>, vector<64x1024xf32>,
    } else {
    }
    %c0_i32_1 = arith.constant 0 : i32
    %3 = arith.cmpi ne, %arg0, %c0_i32_1 : i32
    %4 = arith.extui %3 : i1 to i32
    %c0_i32_2 = arith.constant 0 : i32
    %5 = arith.cmpi ne, %4, %c0_i32_2 : i32
    scf.if %5 {
      %c0_143 = arith.constant 0 : index
      %c0_144 = arith.constant 0 : index
      %333 = vector.load %arg11[%c0_143, %c0_144] : memref<64x256xf32, #tpu.memory_space<vmem>>, vector<64x256xf32>
      %334 = arith.truncf %333 : vector<64x256xf32> to vector<64x256xbf16>
      %c0_145 = arith.constant 0 : index
      %c0_146 = arith.constant 0 : index
      %c0_147 = arith.constant 0 : index
      %335 = vector.load %arg2[%c0_145, %c0_146, %c0_147] : memref<1x256x1024xbf16, #tpu.memory_space<vmem>>, vector<1x256x1024xbf16>
      %336 = vector.shape_cast %335 : vector<1x256x1024xbf16> to vector<256x1024xbf16>
      %cst_148 = arith.constant dense<0.000000e+00> : vector<64x1024xf32>
      %337 = tpu.matmul %334, %336, %cst_148 {dimension_numbers = #tpu.dot_dimension_numbers<[1], [0], [0], [1], [0, 0, 1, 1], [], []>} : vector<64x256xbf16>, vector<256x1024xbf16>, vector<64x1024xf32> -> vector<64x1024xf32>
      %c0_149 = arith.constant 0 : index
      %c0_150 = arith.constant 0 : index
      %c0_151 = arith.constant 0 : index
      %338 = vector.load %arg4[%c0_149, %c0_150, %c0_151] : memref<1x1x1024xf32, #tpu.memory_space<vmem>>, vector<1x1x1024xf32>
      %339 = vector.shape_cast %338 : vector<1x1x1024xf32> to vector<1x1024xf32>
      %340 = vector.broadcast %339 : vector<1x1024xf32> to vector<64x1024xf32>
      %341 = arith.addf %337, %340 : vector<64x1024xf32>
      %c0_152 = arith.constant 0 : index
      %c0_153 = arith.constant 0 : index
      %342 = vector.load %arg10[%c0_152, %c0_153] : memref<64x1024xf32, #tpu.memory_space<vmem>>, vector<64x1024xf32>
      tpu.vector_store %arg10[%c0_152, %c0_153], %341 {strides = array<i32>} : memref<64x1024xf32, #tpu.memory_space<vmem>>, vector<64x1024xf32>,
    } else {
    }
    %c0 = arith.constant 0 : index
    %c0_3 = arith.constant 0 : index
    %c0_4 = arith.constant 0 : index
    %6 = vector.load %arg5[%c0, %c0_3, %c0_4] : memref<1x16x128xf32, #tpu.memory_space<vmem>>, vector<1x16x128xf32>
    %7 = vector.shape_cast %6 : vector<1x16x128xf32> to vector<16x128xf32>
    %c0_5 = arith.constant 0 : index
    %c0_6 = arith.constant 0 : index
    %c0_7 = arith.constant 0 : index
    %8 = vector.load %arg6[%c0_5, %c0_6, %c0_7] : memref<1x16x128xf32, #tpu.memory_space<vmem>>, vector<1x16x128xf32>
    %9 = vector.shape_cast %8 : vector<1x16x128xf32> to vector<16x128xf32>
    %10 = arith.truncf %7 : vector<16x128xf32> to vector<16x128xbf16>
    %c0_8 = arith.constant 0 : index
    %c0_9 = arith.constant 0 : index
    %c0_10 = arith.constant 0 : index
    %11 = vector.load %arg3[%c0_8, %c0_9, %c0_10] : memref<1x128x1024xbf16, #tpu.memory_space<vmem>>, vector<1x128x1024xbf16>
    %12 = vector.shape_cast %11 : vector<1x128x1024xbf16> to vector<128x1024xbf16>
    %cst = arith.constant dense<0.000000e+00> : vector<16x1024xf32>
    %13 = tpu.matmul %10, %12, %cst {dimension_numbers = #tpu.dot_dimension_numbers<[1], [0], [0], [1], [0, 0, 1, 1], [], []>} : vector<16x128xbf16>, vector<128x1024xbf16>, vector<16x1024xf32> -> vector<16x1024xf32>
    %c0_11 = arith.constant 0 : index
    %c0_12 = arith.constant 0 : index
    %14 = vector.load %arg10[%c0_11, %c0_12] : memref<64x1024xf32, #tpu.memory_space<vmem>>, vector<8x512xf32>
    %15 = vector.extract_strided_slice %13 {offsets = [0, 0], sizes = [8, 512], strides = [1, 1]} : vector<16x1024xf32> to vector<8x512xf32>
    %16 = arith.addf %14, %15 : vector<8x512xf32>
    %c56 = arith.constant 56 : index
    %c512 = arith.constant 512 : index
    %17 = vector.load %arg10[%c56, %c512] : memref<64x1024xf32, #tpu.memory_space<vmem>>, vector<8x512xf32>
    %18 = vector.extract_strided_slice %13 {offsets = [8, 512], sizes = [8, 512], strides = [1, 1]} : vector<16x1024xf32> to vector<8x512xf32>
    %19 = arith.addf %17, %18 : vector<8x512xf32>
    %20 = tpu.concatenate %16, %19 in 0 : vector<8x512xf32>, vector<8x512xf32> -> vector<16x512xf32>
    %21 = vector.extract_strided_slice %20 {offsets = [0, 0], sizes = [16, 256], strides = [1, 1]} : vector<16x512xf32> to vector<16x256xf32>
    %cst_13 = arith.constant 5.000000e-01 : f32
    %22 = vector.broadcast %cst_13 : f32 to vector<16x256xf32>
    %23 = arith.mulf %22, %21 : vector<16x256xf32>
    %24 = math.tanh %23 : vector<16x256xf32>
    %cst_14 = arith.constant 5.000000e-01 : f32
    %25 = vector.broadcast %cst_14 : f32 to vector<16x256xf32>
    %26 = arith.mulf %25, %24 : vector<16x256xf32>
    %cst_15 = arith.constant 5.000000e-01 : f32
    %27 = vector.broadcast %cst_15 : f32 to vector<16x256xf32>
    %28 = arith.addf %26, %27 : vector<16x256xf32>
    %29 = vector.extract_strided_slice %20 {offsets = [0, 384], sizes = [16, 128], strides = [1, 1]} : vector<16x512xf32> to vector<16x128xf32>
    %cst_16 = arith.constant 5.000000e-01 : f32
    %30 = vector.broadcast %cst_16 : f32 to vector<16x128xf32>
    %31 = arith.mulf %30, %29 : vector<16x128xf32>
    %32 = math.tanh %31 : vector<16x128xf32>
    %cst_17 = arith.constant 5.000000e-01 : f32
    %33 = vector.broadcast %cst_17 : f32 to vector<16x128xf32>
    %34 = arith.mulf %33, %32 : vector<16x128xf32>
    %cst_18 = arith.constant 5.000000e-01 : f32
    %35 = vector.broadcast %cst_18 : f32 to vector<16x128xf32>
    %36 = arith.addf %34, %35 : vector<16x128xf32>
    %37 = vector.extract_strided_slice %20 {offsets = [0, 256], sizes = [16, 128], strides = [1, 1]} : vector<16x512xf32> to vector<16x128xf32>
    %38 = math.tanh %37 : vector<16x128xf32>
    %39 = vector.extract_strided_slice %28 {offsets = [0, 128], sizes = [16, 128], strides = [1, 1]} : vector<16x256xf32> to vector<16x128xf32>
    %40 = arith.mulf %39, %9 : vector<16x128xf32>
    %41 = vector.extract_strided_slice %28 {offsets = [0, 0], sizes = [16, 128], strides = [1, 1]} : vector<16x256xf32> to vector<16x128xf32>
    %42 = arith.mulf %41, %38 : vector<16x128xf32>
    %43 = arith.addf %40, %42 : vector<16x128xf32>
    %44 = math.tanh %43 : vector<16x128xf32>
    %45 = arith.mulf %36, %44 : vector<16x128xf32>
    %46 = vector.extract_strided_slice %45 {offsets = [0, 0], sizes = [8, 128], strides = [1, 1]} : vector<16x128xf32> to vector<8x128xf32>
    %c0_19 = arith.constant 0 : index
    %c0_20 = arith.constant 0 : index
    %47 = vector.load %arg11[%c0_19, %c0_20] : memref<64x256xf32, #tpu.memory_space<vmem>>, vector<8x128xf32>
    tpu.vector_store %arg11[%c0_19, %c0_20], %46 {strides = array<i32>} : memref<64x256xf32, #tpu.memory_space<vmem>>, vector<8x128xf32>,
    %48 = vector.extract_strided_slice %45 {offsets = [8, 0], sizes = [8, 128], strides = [1, 1]} : vector<16x128xf32> to vector<8x128xf32>
    %c56_21 = arith.constant 56 : index
    %c128 = arith.constant 128 : index
    %49 = vector.load %arg11[%c56_21, %c128] : memref<64x256xf32, #tpu.memory_space<vmem>>, vector<8x128xf32>
    tpu.vector_store %arg11[%c56_21, %c128], %48 {strides = array<i32>} : memref<64x256xf32, #tpu.memory_space<vmem>>, vector<8x128xf32>,
    %50 = arith.truncf %45 : vector<16x128xf32> to vector<16x128xbf16>
    %c0_22 = arith.constant 0 : index
    %c0_23 = arith.constant 0 : index
    %c0_24 = arith.constant 0 : index
    %51 = vector.load %arg3[%c0_22, %c0_23, %c0_24] : memref<1x128x1024xbf16, #tpu.memory_space<vmem>>, vector<1x128x1024xbf16>
    %52 = vector.shape_cast %51 : vector<1x128x1024xbf16> to vector<128x1024xbf16>
    %cst_25 = arith.constant dense<0.000000e+00> : vector<16x1024xf32>
    %53 = tpu.matmul %50, %52, %cst_25 {dimension_numbers = #tpu.dot_dimension_numbers<[1], [0], [0], [1], [0, 0, 1, 1], [], []>} : vector<16x128xbf16>, vector<128x1024xbf16>, vector<16x1024xf32> -> vector<16x1024xf32>
    %c8 = arith.constant 8 : index
    %c0_26 = arith.constant 0 : index
    %54 = vector.load %arg10[%c8, %c0_26] : memref<64x1024xf32, #tpu.memory_space<vmem>>, vector<8x512xf32>
    %55 = vector.extract_strided_slice %53 {offsets = [0, 0], sizes = [8, 512], strides = [1, 1]} : vector<16x1024xf32> to vector<8x512xf32>
    %56 = arith.addf %54, %55 : vector<8x512xf32>
    %c48 = arith.constant 48 : index
    %c512_27 = arith.constant 512 : index
    %57 = vector.load %arg10[%c48, %c512_27] : memref<64x1024xf32, #tpu.memory_space<vmem>>, vector<8x512xf32>
    %58 = vector.extract_strided_slice %53 {offsets = [8, 512], sizes = [8, 512], strides = [1, 1]} : vector<16x1024xf32> to vector<8x512xf32>
    %59 = arith.addf %57, %58 : vector<8x512xf32>
    %60 = tpu.concatenate %56, %59 in 0 : vector<8x512xf32>, vector<8x512xf32> -> vector<16x512xf32>
    %61 = vector.extract_strided_slice %60 {offsets = [0, 0], sizes = [16, 256], strides = [1, 1]} : vector<16x512xf32> to vector<16x256xf32>
    %cst_28 = arith.constant 5.000000e-01 : f32
    %62 = vector.broadcast %cst_28 : f32 to vector<16x256xf32>
    %63 = arith.mulf %62, %61 : vector<16x256xf32>
    %64 = math.tanh %63 : vector<16x256xf32>
    %cst_29 = arith.constant 5.000000e-01 : f32
    %65 = vector.broadcast %cst_29 : f32 to vector<16x256xf32>
    %66 = arith.mulf %65, %64 : vector<16x256xf32>
    %cst_30 = arith.constant 5.000000e-01 : f32
    %67 = vector.broadcast %cst_30 : f32 to vector<16x256xf32>
    %68 = arith.addf %66, %67 : vector<16x256xf32>
    %69 = vector.extract_strided_slice %60 {offsets = [0, 384], sizes = [16, 128], strides = [1, 1]} : vector<16x512xf32> to vector<16x128xf32>
    %cst_31 = arith.constant 5.000000e-01 : f32
    %70 = vector.broadcast %cst_31 : f32 to vector<16x128xf32>
    %71 = arith.mulf %70, %69 : vector<16x128xf32>
    %72 = math.tanh %71 : vector<16x128xf32>
    %cst_32 = arith.constant 5.000000e-01 : f32
    %73 = vector.broadcast %cst_32 : f32 to vector<16x128xf32>
    %74 = arith.mulf %73, %72 : vector<16x128xf32>
    %cst_33 = arith.constant 5.000000e-01 : f32
    %75 = vector.broadcast %cst_33 : f32 to vector<16x128xf32>
    %76 = arith.addf %74, %75 : vector<16x128xf32>
    %77 = vector.extract_strided_slice %60 {offsets = [0, 256], sizes = [16, 128], strides = [1, 1]} : vector<16x512xf32> to vector<16x128xf32>
    %78 = math.tanh %77 : vector<16x128xf32>
    %79 = vector.extract_strided_slice %68 {offsets = [0, 128], sizes = [16, 128], strides = [1, 1]} : vector<16x256xf32> to vector<16x128xf32>
    %80 = arith.mulf %79, %43 : vector<16x128xf32>
    %81 = vector.extract_strided_slice %68 {offsets = [0, 0], sizes = [16, 128], strides = [1, 1]} : vector<16x256xf32> to vector<16x128xf32>
    %82 = arith.mulf %81, %78 : vector<16x128xf32>
    %83 = arith.addf %80, %82 : vector<16x128xf32>
    %84 = math.tanh %83 : vector<16x128xf32>
    %85 = arith.mulf %76, %84 : vector<16x128xf32>
    %86 = vector.extract_strided_slice %85 {offsets = [0, 0], sizes = [8, 128], strides = [1, 1]} : vector<16x128xf32> to vector<8x128xf32>
    %c8_34 = arith.constant 8 : index
    %c0_35 = arith.constant 0 : index
    %87 = vector.load %arg11[%c8_34, %c0_35] : memref<64x256xf32, #tpu.memory_space<vmem>>, vector<8x128xf32>
    tpu.vector_store %arg11[%c8_34, %c0_35], %86 {strides = array<i32>} : memref<64x256xf32, #tpu.memory_space<vmem>>, vector<8x128xf32>,
    %88 = vector.extract_strided_slice %85 {offsets = [8, 0], sizes = [8, 128], strides = [1, 1]} : vector<16x128xf32> to vector<8x128xf32>
    %c48_36 = arith.constant 48 : index
    %c128_37 = arith.constant 128 : index
    %89 = vector.load %arg11[%c48_36, %c128_37] : memref<64x256xf32, #tpu.memory_space<vmem>>, vector<8x128xf32>
    tpu.vector_store %arg11[%c48_36, %c128_37], %88 {strides = array<i32>} : memref<64x256xf32, #tpu.memory_space<vmem>>, vector<8x128xf32>,
    %90 = arith.truncf %85 : vector<16x128xf32> to vector<16x128xbf16>
    %c0_38 = arith.constant 0 : index
    %c0_39 = arith.constant 0 : index
    %c0_40 = arith.constant 0 : index
    %91 = vector.load %arg3[%c0_38, %c0_39, %c0_40] : memref<1x128x1024xbf16, #tpu.memory_space<vmem>>, vector<1x128x1024xbf16>
    %92 = vector.shape_cast %91 : vector<1x128x1024xbf16> to vector<128x1024xbf16>
    %cst_41 = arith.constant dense<0.000000e+00> : vector<16x1024xf32>
    %93 = tpu.matmul %90, %92, %cst_41 {dimension_numbers = #tpu.dot_dimension_numbers<[1], [0], [0], [1], [0, 0, 1, 1], [], []>} : vector<16x128xbf16>, vector<128x1024xbf16>, vector<16x1024xf32> -> vector<16x1024xf32>
    %c16 = arith.constant 16 : index
    %c0_42 = arith.constant 0 : index
    %94 = vector.load %arg10[%c16, %c0_42] : memref<64x1024xf32, #tpu.memory_space<vmem>>, vector<8x512xf32>
    %95 = vector.extract_strided_slice %93 {offsets = [0, 0], sizes = [8, 512], strides = [1, 1]} : vector<16x1024xf32> to vector<8x512xf32>
    %96 = arith.addf %94, %95 : vector<8x512xf32>
    %c40 = arith.constant 40 : index
    %c512_43 = arith.constant 512 : index
    %97 = vector.load %arg10[%c40, %c512_43] : memref<64x1024xf32, #tpu.memory_space<vmem>>, vector<8x512xf32>
    %98 = vector.extract_strided_slice %93 {offsets = [8, 512], sizes = [8, 512], strides = [1, 1]} : vector<16x1024xf32> to vector<8x512xf32>
    %99 = arith.addf %97, %98 : vector<8x512xf32>
    %100 = tpu.concatenate %96, %99 in 0 : vector<8x512xf32>, vector<8x512xf32> -> vector<16x512xf32>
    %101 = vector.extract_strided_slice %100 {offsets = [0, 0], sizes = [16, 256], strides = [1, 1]} : vector<16x512xf32> to vector<16x256xf32>
    %cst_44 = arith.constant 5.000000e-01 : f32
    %102 = vector.broadcast %cst_44 : f32 to vector<16x256xf32>
    %103 = arith.mulf %102, %101 : vector<16x256xf32>
    %104 = math.tanh %103 : vector<16x256xf32>
    %cst_45 = arith.constant 5.000000e-01 : f32
    %105 = vector.broadcast %cst_45 : f32 to vector<16x256xf32>
    %106 = arith.mulf %105, %104 : vector<16x256xf32>
    %cst_46 = arith.constant 5.000000e-01 : f32
    %107 = vector.broadcast %cst_46 : f32 to vector<16x256xf32>
    %108 = arith.addf %106, %107 : vector<16x256xf32>
    %109 = vector.extract_strided_slice %100 {offsets = [0, 384], sizes = [16, 128], strides = [1, 1]} : vector<16x512xf32> to vector<16x128xf32>
    %cst_47 = arith.constant 5.000000e-01 : f32
    %110 = vector.broadcast %cst_47 : f32 to vector<16x128xf32>
    %111 = arith.mulf %110, %109 : vector<16x128xf32>
    %112 = math.tanh %111 : vector<16x128xf32>
    %cst_48 = arith.constant 5.000000e-01 : f32
    %113 = vector.broadcast %cst_48 : f32 to vector<16x128xf32>
    %114 = arith.mulf %113, %112 : vector<16x128xf32>
    %cst_49 = arith.constant 5.000000e-01 : f32
    %115 = vector.broadcast %cst_49 : f32 to vector<16x128xf32>
    %116 = arith.addf %114, %115 : vector<16x128xf32>
    %117 = vector.extract_strided_slice %100 {offsets = [0, 256], sizes = [16, 128], strides = [1, 1]} : vector<16x512xf32> to vector<16x128xf32>
    %118 = math.tanh %117 : vector<16x128xf32>
    %119 = vector.extract_strided_slice %108 {offsets = [0, 128], sizes = [16, 128], strides = [1, 1]} : vector<16x256xf32> to vector<16x128xf32>
    %120 = arith.mulf %119, %83 : vector<16x128xf32>
    %121 = vector.extract_strided_slice %108 {offsets = [0, 0], sizes = [16, 128], strides = [1, 1]} : vector<16x256xf32> to vector<16x128xf32>
    %122 = arith.mulf %121, %118 : vector<16x128xf32>
    %123 = arith.addf %120, %122 : vector<16x128xf32>
    %124 = math.tanh %123 : vector<16x128xf32>
    %125 = arith.mulf %116, %124 : vector<16x128xf32>
    %126 = vector.extract_strided_slice %125 {offsets = [0, 0], sizes = [8, 128], strides = [1, 1]} : vector<16x128xf32> to vector<8x128xf32>
    %c16_50 = arith.constant 16 : index
    %c0_51 = arith.constant 0 : index
    %127 = vector.load %arg11[%c16_50, %c0_51] : memref<64x256xf32, #tpu.memory_space<vmem>>, vector<8x128xf32>
    tpu.vector_store %arg11[%c16_50, %c0_51], %126 {strides = array<i32>} : memref<64x256xf32, #tpu.memory_space<vmem>>, vector<8x128xf32>,
    %128 = vector.extract_strided_slice %125 {offsets = [8, 0], sizes = [8, 128], strides = [1, 1]} : vector<16x128xf32> to vector<8x128xf32>
    %c40_52 = arith.constant 40 : index
    %c128_53 = arith.constant 128 : index
    %129 = vector.load %arg11[%c40_52, %c128_53] : memref<64x256xf32, #tpu.memory_space<vmem>>, vector<8x128xf32>
    tpu.vector_store %arg11[%c40_52, %c128_53], %128 {strides = array<i32>} : memref<64x256xf32, #tpu.memory_space<vmem>>, vector<8x128xf32>,
    %130 = arith.truncf %125 : vector<16x128xf32> to vector<16x128xbf16>
    %c0_54 = arith.constant 0 : index
    %c0_55 = arith.constant 0 : index
    %c0_56 = arith.constant 0 : index
    %131 = vector.load %arg3[%c0_54, %c0_55, %c0_56] : memref<1x128x1024xbf16, #tpu.memory_space<vmem>>, vector<1x128x1024xbf16>
    %132 = vector.shape_cast %131 : vector<1x128x1024xbf16> to vector<128x1024xbf16>
    %cst_57 = arith.constant dense<0.000000e+00> : vector<16x1024xf32>
    %133 = tpu.matmul %130, %132, %cst_57 {dimension_numbers = #tpu.dot_dimension_numbers<[1], [0], [0], [1], [0, 0, 1, 1], [], []>} : vector<16x128xbf16>, vector<128x1024xbf16>, vector<16x1024xf32> -> vector<16x1024xf32>
    %c24 = arith.constant 24 : index
    %c0_58 = arith.constant 0 : index
    %134 = vector.load %arg10[%c24, %c0_58] : memref<64x1024xf32, #tpu.memory_space<vmem>>, vector<8x512xf32>
    %135 = vector.extract_strided_slice %133 {offsets = [0, 0], sizes = [8, 512], strides = [1, 1]} : vector<16x1024xf32> to vector<8x512xf32>
    %136 = arith.addf %134, %135 : vector<8x512xf32>
    %c32 = arith.constant 32 : index
    %c512_59 = arith.constant 512 : index
    %137 = vector.load %arg10[%c32, %c512_59] : memref<64x1024xf32, #tpu.memory_space<vmem>>, vector<8x512xf32>
    %138 = vector.extract_strided_slice %133 {offsets = [8, 512], sizes = [8, 512], strides = [1, 1]} : vector<16x1024xf32> to vector<8x512xf32>
    %139 = arith.addf %137, %138 : vector<8x512xf32>
    %140 = tpu.concatenate %136, %139 in 0 : vector<8x512xf32>, vector<8x512xf32> -> vector<16x512xf32>
    %141 = vector.extract_strided_slice %140 {offsets = [0, 0], sizes = [16, 256], strides = [1, 1]} : vector<16x512xf32> to vector<16x256xf32>
    %cst_60 = arith.constant 5.000000e-01 : f32
    %142 = vector.broadcast %cst_60 : f32 to vector<16x256xf32>
    %143 = arith.mulf %142, %141 : vector<16x256xf32>
    %144 = math.tanh %143 : vector<16x256xf32>
    %cst_61 = arith.constant 5.000000e-01 : f32
    %145 = vector.broadcast %cst_61 : f32 to vector<16x256xf32>
    %146 = arith.mulf %145, %144 : vector<16x256xf32>
    %cst_62 = arith.constant 5.000000e-01 : f32
    %147 = vector.broadcast %cst_62 : f32 to vector<16x256xf32>
    %148 = arith.addf %146, %147 : vector<16x256xf32>
    %149 = vector.extract_strided_slice %140 {offsets = [0, 384], sizes = [16, 128], strides = [1, 1]} : vector<16x512xf32> to vector<16x128xf32>
    %cst_63 = arith.constant 5.000000e-01 : f32
    %150 = vector.broadcast %cst_63 : f32 to vector<16x128xf32>
    %151 = arith.mulf %150, %149 : vector<16x128xf32>
    %152 = math.tanh %151 : vector<16x128xf32>
    %cst_64 = arith.constant 5.000000e-01 : f32
    %153 = vector.broadcast %cst_64 : f32 to vector<16x128xf32>
    %154 = arith.mulf %153, %152 : vector<16x128xf32>
    %cst_65 = arith.constant 5.000000e-01 : f32
    %155 = vector.broadcast %cst_65 : f32 to vector<16x128xf32>
    %156 = arith.addf %154, %155 : vector<16x128xf32>
    %157 = vector.extract_strided_slice %140 {offsets = [0, 256], sizes = [16, 128], strides = [1, 1]} : vector<16x512xf32> to vector<16x128xf32>
    %158 = math.tanh %157 : vector<16x128xf32>
    %159 = vector.extract_strided_slice %148 {offsets = [0, 128], sizes = [16, 128], strides = [1, 1]} : vector<16x256xf32> to vector<16x128xf32>
    %160 = arith.mulf %159, %123 : vector<16x128xf32>
    %161 = vector.extract_strided_slice %148 {offsets = [0, 0], sizes = [16, 128], strides = [1, 1]} : vector<16x256xf32> to vector<16x128xf32>
    %162 = arith.mulf %161, %158 : vector<16x128xf32>
    %163 = arith.addf %160, %162 : vector<16x128xf32>
    %164 = math.tanh %163 : vector<16x128xf32>
    %165 = arith.mulf %156, %164 : vector<16x128xf32>
    %166 = vector.extract_strided_slice %165 {offsets = [0, 0], sizes = [8, 128], strides = [1, 1]} : vector<16x128xf32> to vector<8x128xf32>
    %c24_66 = arith.constant 24 : index
    %c0_67 = arith.constant 0 : index
    %167 = vector.load %arg11[%c24_66, %c0_67] : memref<64x256xf32, #tpu.memory_space<vmem>>, vector<8x128xf32>
    tpu.vector_store %arg11[%c24_66, %c0_67], %166 {strides = array<i32>} : memref<64x256xf32, #tpu.memory_space<vmem>>, vector<8x128xf32>,
    %168 = vector.extract_strided_slice %165 {offsets = [8, 0], sizes = [8, 128], strides = [1, 1]} : vector<16x128xf32> to vector<8x128xf32>
    %c32_68 = arith.constant 32 : index
    %c128_69 = arith.constant 128 : index
    %169 = vector.load %arg11[%c32_68, %c128_69] : memref<64x256xf32, #tpu.memory_space<vmem>>, vector<8x128xf32>
    tpu.vector_store %arg11[%c32_68, %c128_69], %168 {strides = array<i32>} : memref<64x256xf32, #tpu.memory_space<vmem>>, vector<8x128xf32>,
    %170 = arith.truncf %165 : vector<16x128xf32> to vector<16x128xbf16>
    %c0_70 = arith.constant 0 : index
    %c0_71 = arith.constant 0 : index
    %c0_72 = arith.constant 0 : index
    %171 = vector.load %arg3[%c0_70, %c0_71, %c0_72] : memref<1x128x1024xbf16, #tpu.memory_space<vmem>>, vector<1x128x1024xbf16>
    %172 = vector.shape_cast %171 : vector<1x128x1024xbf16> to vector<128x1024xbf16>
    %cst_73 = arith.constant dense<0.000000e+00> : vector<16x1024xf32>
    %173 = tpu.matmul %170, %172, %cst_73 {dimension_numbers = #tpu.dot_dimension_numbers<[1], [0], [0], [1], [0, 0, 1, 1], [], []>} : vector<16x128xbf16>, vector<128x1024xbf16>, vector<16x1024xf32> -> vector<16x1024xf32>
    %c32_74 = arith.constant 32 : index
    %c0_75 = arith.constant 0 : index
    %174 = vector.load %arg10[%c32_74, %c0_75] : memref<64x1024xf32, #tpu.memory_space<vmem>>, vector<8x512xf32>
    %175 = vector.extract_strided_slice %173 {offsets = [0, 0], sizes = [8, 512], strides = [1, 1]} : vector<16x1024xf32> to vector<8x512xf32>
    %176 = arith.addf %174, %175 : vector<8x512xf32>
    %c24_76 = arith.constant 24 : index
    %c512_77 = arith.constant 512 : index
    %177 = vector.load %arg10[%c24_76, %c512_77] : memref<64x1024xf32, #tpu.memory_space<vmem>>, vector<8x512xf32>
    %178 = vector.extract_strided_slice %173 {offsets = [8, 512], sizes = [8, 512], strides = [1, 1]} : vector<16x1024xf32> to vector<8x512xf32>
    %179 = arith.addf %177, %178 : vector<8x512xf32>
    %180 = tpu.concatenate %176, %179 in 0 : vector<8x512xf32>, vector<8x512xf32> -> vector<16x512xf32>
    %181 = vector.extract_strided_slice %180 {offsets = [0, 0], sizes = [16, 256], strides = [1, 1]} : vector<16x512xf32> to vector<16x256xf32>
    %cst_78 = arith.constant 5.000000e-01 : f32
    %182 = vector.broadcast %cst_78 : f32 to vector<16x256xf32>
    %183 = arith.mulf %182, %181 : vector<16x256xf32>
    %184 = math.tanh %183 : vector<16x256xf32>
    %cst_79 = arith.constant 5.000000e-01 : f32
    %185 = vector.broadcast %cst_79 : f32 to vector<16x256xf32>
    %186 = arith.mulf %185, %184 : vector<16x256xf32>
    %cst_80 = arith.constant 5.000000e-01 : f32
    %187 = vector.broadcast %cst_80 : f32 to vector<16x256xf32>
    %188 = arith.addf %186, %187 : vector<16x256xf32>
    %189 = vector.extract_strided_slice %180 {offsets = [0, 384], sizes = [16, 128], strides = [1, 1]} : vector<16x512xf32> to vector<16x128xf32>
    %cst_81 = arith.constant 5.000000e-01 : f32
    %190 = vector.broadcast %cst_81 : f32 to vector<16x128xf32>
    %191 = arith.mulf %190, %189 : vector<16x128xf32>
    %192 = math.tanh %191 : vector<16x128xf32>
    %cst_82 = arith.constant 5.000000e-01 : f32
    %193 = vector.broadcast %cst_82 : f32 to vector<16x128xf32>
    %194 = arith.mulf %193, %192 : vector<16x128xf32>
    %cst_83 = arith.constant 5.000000e-01 : f32
    %195 = vector.broadcast %cst_83 : f32 to vector<16x128xf32>
    %196 = arith.addf %194, %195 : vector<16x128xf32>
    %197 = vector.extract_strided_slice %180 {offsets = [0, 256], sizes = [16, 128], strides = [1, 1]} : vector<16x512xf32> to vector<16x128xf32>
    %198 = math.tanh %197 : vector<16x128xf32>
    %199 = vector.extract_strided_slice %188 {offsets = [0, 128], sizes = [16, 128], strides = [1, 1]} : vector<16x256xf32> to vector<16x128xf32>
    %200 = arith.mulf %199, %163 : vector<16x128xf32>
    %201 = vector.extract_strided_slice %188 {offsets = [0, 0], sizes = [16, 128], strides = [1, 1]} : vector<16x256xf32> to vector<16x128xf32>
    %202 = arith.mulf %201, %198 : vector<16x128xf32>
    %203 = arith.addf %200, %202 : vector<16x128xf32>
    %204 = math.tanh %203 : vector<16x128xf32>
    %205 = arith.mulf %196, %204 : vector<16x128xf32>
    %206 = vector.extract_strided_slice %205 {offsets = [0, 0], sizes = [8, 128], strides = [1, 1]} : vector<16x128xf32> to vector<8x128xf32>
    %c32_84 = arith.constant 32 : index
    %c0_85 = arith.constant 0 : index
    %207 = vector.load %arg11[%c32_84, %c0_85] : memref<64x256xf32, #tpu.memory_space<vmem>>, vector<8x128xf32>
    tpu.vector_store %arg11[%c32_84, %c0_85], %206 {strides = array<i32>} : memref<64x256xf32, #tpu.memory_space<vmem>>, vector<8x128xf32>,
    %208 = vector.extract_strided_slice %205 {offsets = [8, 0], sizes = [8, 128], strides = [1, 1]} : vector<16x128xf32> to vector<8x128xf32>
    %c24_86 = arith.constant 24 : index
    %c128_87 = arith.constant 128 : index
    %209 = vector.load %arg11[%c24_86, %c128_87] : memref<64x256xf32, #tpu.memory_space<vmem>>, vector<8x128xf32>
    tpu.vector_store %arg11[%c24_86, %c128_87], %208 {strides = array<i32>} : memref<64x256xf32, #tpu.memory_space<vmem>>, vector<8x128xf32>,
    %210 = arith.truncf %205 : vector<16x128xf32> to vector<16x128xbf16>
    %c0_88 = arith.constant 0 : index
    %c0_89 = arith.constant 0 : index
    %c0_90 = arith.constant 0 : index
    %211 = vector.load %arg3[%c0_88, %c0_89, %c0_90] : memref<1x128x1024xbf16, #tpu.memory_space<vmem>>, vector<1x128x1024xbf16>
    %212 = vector.shape_cast %211 : vector<1x128x1024xbf16> to vector<128x1024xbf16>
    %cst_91 = arith.constant dense<0.000000e+00> : vector<16x1024xf32>
    %213 = tpu.matmul %210, %212, %cst_91 {dimension_numbers = #tpu.dot_dimension_numbers<[1], [0], [0], [1], [0, 0, 1, 1], [], []>} : vector<16x128xbf16>, vector<128x1024xbf16>, vector<16x1024xf32> -> vector<16x1024xf32>
    %c40_92 = arith.constant 40 : index
    %c0_93 = arith.constant 0 : index
    %214 = vector.load %arg10[%c40_92, %c0_93] : memref<64x1024xf32, #tpu.memory_space<vmem>>, vector<8x512xf32>
    %215 = vector.extract_strided_slice %213 {offsets = [0, 0], sizes = [8, 512], strides = [1, 1]} : vector<16x1024xf32> to vector<8x512xf32>
    %216 = arith.addf %214, %215 : vector<8x512xf32>
    %c16_94 = arith.constant 16 : index
    %c512_95 = arith.constant 512 : index
    %217 = vector.load %arg10[%c16_94, %c512_95] : memref<64x1024xf32, #tpu.memory_space<vmem>>, vector<8x512xf32>
    %218 = vector.extract_strided_slice %213 {offsets = [8, 512], sizes = [8, 512], strides = [1, 1]} : vector<16x1024xf32> to vector<8x512xf32>
    %219 = arith.addf %217, %218 : vector<8x512xf32>
    %220 = tpu.concatenate %216, %219 in 0 : vector<8x512xf32>, vector<8x512xf32> -> vector<16x512xf32>
    %221 = vector.extract_strided_slice %220 {offsets = [0, 0], sizes = [16, 256], strides = [1, 1]} : vector<16x512xf32> to vector<16x256xf32>
    %cst_96 = arith.constant 5.000000e-01 : f32
    %222 = vector.broadcast %cst_96 : f32 to vector<16x256xf32>
    %223 = arith.mulf %222, %221 : vector<16x256xf32>
    %224 = math.tanh %223 : vector<16x256xf32>
    %cst_97 = arith.constant 5.000000e-01 : f32
    %225 = vector.broadcast %cst_97 : f32 to vector<16x256xf32>
    %226 = arith.mulf %225, %224 : vector<16x256xf32>
    %cst_98 = arith.constant 5.000000e-01 : f32
    %227 = vector.broadcast %cst_98 : f32 to vector<16x256xf32>
    %228 = arith.addf %226, %227 : vector<16x256xf32>
    %229 = vector.extract_strided_slice %220 {offsets = [0, 384], sizes = [16, 128], strides = [1, 1]} : vector<16x512xf32> to vector<16x128xf32>
    %cst_99 = arith.constant 5.000000e-01 : f32
    %230 = vector.broadcast %cst_99 : f32 to vector<16x128xf32>
    %231 = arith.mulf %230, %229 : vector<16x128xf32>
    %232 = math.tanh %231 : vector<16x128xf32>
    %cst_100 = arith.constant 5.000000e-01 : f32
    %233 = vector.broadcast %cst_100 : f32 to vector<16x128xf32>
    %234 = arith.mulf %233, %232 : vector<16x128xf32>
    %cst_101 = arith.constant 5.000000e-01 : f32
    %235 = vector.broadcast %cst_101 : f32 to vector<16x128xf32>
    %236 = arith.addf %234, %235 : vector<16x128xf32>
    %237 = vector.extract_strided_slice %220 {offsets = [0, 256], sizes = [16, 128], strides = [1, 1]} : vector<16x512xf32> to vector<16x128xf32>
    %238 = math.tanh %237 : vector<16x128xf32>
    %239 = vector.extract_strided_slice %228 {offsets = [0, 128], sizes = [16, 128], strides = [1, 1]} : vector<16x256xf32> to vector<16x128xf32>
    %240 = arith.mulf %239, %203 : vector<16x128xf32>
    %241 = vector.extract_strided_slice %228 {offsets = [0, 0], sizes = [16, 128], strides = [1, 1]} : vector<16x256xf32> to vector<16x128xf32>
    %242 = arith.mulf %241, %238 : vector<16x128xf32>
    %243 = arith.addf %240, %242 : vector<16x128xf32>
    %244 = math.tanh %243 : vector<16x128xf32>
    %245 = arith.mulf %236, %244 : vector<16x128xf32>
    %246 = vector.extract_strided_slice %245 {offsets = [0, 0], sizes = [8, 128], strides = [1, 1]} : vector<16x128xf32> to vector<8x128xf32>
    %c40_102 = arith.constant 40 : index
    %c0_103 = arith.constant 0 : index
    %247 = vector.load %arg11[%c40_102, %c0_103] : memref<64x256xf32, #tpu.memory_space<vmem>>, vector<8x128xf32>
    tpu.vector_store %arg11[%c40_102, %c0_103], %246 {strides = array<i32>} : memref<64x256xf32, #tpu.memory_space<vmem>>, vector<8x128xf32>,
    %248 = vector.extract_strided_slice %245 {offsets = [8, 0], sizes = [8, 128], strides = [1, 1]} : vector<16x128xf32> to vector<8x128xf32>
    %c16_104 = arith.constant 16 : index
    %c128_105 = arith.constant 128 : index
    %249 = vector.load %arg11[%c16_104, %c128_105] : memref<64x256xf32, #tpu.memory_space<vmem>>, vector<8x128xf32>
    tpu.vector_store %arg11[%c16_104, %c128_105], %248 {strides = array<i32>} : memref<64x256xf32, #tpu.memory_space<vmem>>, vector<8x128xf32>,
    %250 = arith.truncf %245 : vector<16x128xf32> to vector<16x128xbf16>
    %c0_106 = arith.constant 0 : index
    %c0_107 = arith.constant 0 : index
    %c0_108 = arith.constant 0 : index
    %251 = vector.load %arg3[%c0_106, %c0_107, %c0_108] : memref<1x128x1024xbf16, #tpu.memory_space<vmem>>, vector<1x128x1024xbf16>
    %252 = vector.shape_cast %251 : vector<1x128x1024xbf16> to vector<128x1024xbf16>
    %cst_109 = arith.constant dense<0.000000e+00> : vector<16x1024xf32>
    %253 = tpu.matmul %250, %252, %cst_109 {dimension_numbers = #tpu.dot_dimension_numbers<[1], [0], [0], [1], [0, 0, 1, 1], [], []>} : vector<16x128xbf16>, vector<128x1024xbf16>, vector<16x1024xf32> -> vector<16x1024xf32>
    %c48_110 = arith.constant 48 : index
    %c0_111 = arith.constant 0 : index
    %254 = vector.load %arg10[%c48_110, %c0_111] : memref<64x1024xf32, #tpu.memory_space<vmem>>, vector<8x512xf32>
    %255 = vector.extract_strided_slice %253 {offsets = [0, 0], sizes = [8, 512], strides = [1, 1]} : vector<16x1024xf32> to vector<8x512xf32>
    %256 = arith.addf %254, %255 : vector<8x512xf32>
    %c8_112 = arith.constant 8 : index
    %c512_113 = arith.constant 512 : index
    %257 = vector.load %arg10[%c8_112, %c512_113] : memref<64x1024xf32, #tpu.memory_space<vmem>>, vector<8x512xf32>
    %258 = vector.extract_strided_slice %253 {offsets = [8, 512], sizes = [8, 512], strides = [1, 1]} : vector<16x1024xf32> to vector<8x512xf32>
    %259 = arith.addf %257, %258 : vector<8x512xf32>
    %260 = tpu.concatenate %256, %259 in 0 : vector<8x512xf32>, vector<8x512xf32> -> vector<16x512xf32>
    %261 = vector.extract_strided_slice %260 {offsets = [0, 0], sizes = [16, 256], strides = [1, 1]} : vector<16x512xf32> to vector<16x256xf32>
    %cst_114 = arith.constant 5.000000e-01 : f32
    %262 = vector.broadcast %cst_114 : f32 to vector<16x256xf32>
    %263 = arith.mulf %262, %261 : vector<16x256xf32>
    %264 = math.tanh %263 : vector<16x256xf32>
    %cst_115 = arith.constant 5.000000e-01 : f32
    %265 = vector.broadcast %cst_115 : f32 to vector<16x256xf32>
    %266 = arith.mulf %265, %264 : vector<16x256xf32>
    %cst_116 = arith.constant 5.000000e-01 : f32
    %267 = vector.broadcast %cst_116 : f32 to vector<16x256xf32>
    %268 = arith.addf %266, %267 : vector<16x256xf32>
    %269 = vector.extract_strided_slice %260 {offsets = [0, 384], sizes = [16, 128], strides = [1, 1]} : vector<16x512xf32> to vector<16x128xf32>
    %cst_117 = arith.constant 5.000000e-01 : f32
    %270 = vector.broadcast %cst_117 : f32 to vector<16x128xf32>
    %271 = arith.mulf %270, %269 : vector<16x128xf32>
    %272 = math.tanh %271 : vector<16x128xf32>
    %cst_118 = arith.constant 5.000000e-01 : f32
    %273 = vector.broadcast %cst_118 : f32 to vector<16x128xf32>
    %274 = arith.mulf %273, %272 : vector<16x128xf32>
    %cst_119 = arith.constant 5.000000e-01 : f32
    %275 = vector.broadcast %cst_119 : f32 to vector<16x128xf32>
    %276 = arith.addf %274, %275 : vector<16x128xf32>
    %277 = vector.extract_strided_slice %260 {offsets = [0, 256], sizes = [16, 128], strides = [1, 1]} : vector<16x512xf32> to vector<16x128xf32>
    %278 = math.tanh %277 : vector<16x128xf32>
    %279 = vector.extract_strided_slice %268 {offsets = [0, 128], sizes = [16, 128], strides = [1, 1]} : vector<16x256xf32> to vector<16x128xf32>
    %280 = arith.mulf %279, %243 : vector<16x128xf32>
    %281 = vector.extract_strided_slice %268 {offsets = [0, 0], sizes = [16, 128], strides = [1, 1]} : vector<16x256xf32> to vector<16x128xf32>
    %282 = arith.mulf %281, %278 : vector<16x128xf32>
    %283 = arith.addf %280, %282 : vector<16x128xf32>
    %284 = math.tanh %283 : vector<16x128xf32>
    %285 = arith.mulf %276, %284 : vector<16x128xf32>
    %286 = vector.extract_strided_slice %285 {offsets = [0, 0], sizes = [8, 128], strides = [1, 1]} : vector<16x128xf32> to vector<8x128xf32>
    %c48_120 = arith.constant 48 : index
    %c0_121 = arith.constant 0 : index
    %287 = vector.load %arg11[%c48_120, %c0_121] : memref<64x256xf32, #tpu.memory_space<vmem>>, vector<8x128xf32>
    tpu.vector_store %arg11[%c48_120, %c0_121], %286 {strides = array<i32>} : memref<64x256xf32, #tpu.memory_space<vmem>>, vector<8x128xf32>,
    %288 = vector.extract_strided_slice %285 {offsets = [8, 0], sizes = [8, 128], strides = [1, 1]} : vector<16x128xf32> to vector<8x128xf32>
    %c8_122 = arith.constant 8 : index
    %c128_123 = arith.constant 128 : index
    %289 = vector.load %arg11[%c8_122, %c128_123] : memref<64x256xf32, #tpu.memory_space<vmem>>, vector<8x128xf32>
    tpu.vector_store %arg11[%c8_122, %c128_123], %288 {strides = array<i32>} : memref<64x256xf32, #tpu.memory_space<vmem>>, vector<8x128xf32>,
    %290 = arith.truncf %285 : vector<16x128xf32> to vector<16x128xbf16>
    %c0_124 = arith.constant 0 : index
    %c0_125 = arith.constant 0 : index
    %c0_126 = arith.constant 0 : index
    %291 = vector.load %arg3[%c0_124, %c0_125, %c0_126] : memref<1x128x1024xbf16, #tpu.memory_space<vmem>>, vector<1x128x1024xbf16>
    %292 = vector.shape_cast %291 : vector<1x128x1024xbf16> to vector<128x1024xbf16>
    %cst_127 = arith.constant dense<0.000000e+00> : vector<16x1024xf32>
    %293 = tpu.matmul %290, %292, %cst_127 {dimension_numbers = #tpu.dot_dimension_numbers<[1], [0], [0], [1], [0, 0, 1, 1], [], []>} : vector<16x128xbf16>, vector<128x1024xbf16>, vector<16x1024xf32> -> vector<16x1024xf32>
    %c56_128 = arith.constant 56 : index
    %c0_129 = arith.constant 0 : index
    %294 = vector.load %arg10[%c56_128, %c0_129] : memref<64x1024xf32, #tpu.memory_space<vmem>>, vector<8x512xf32>
    %295 = vector.extract_strided_slice %293 {offsets = [0, 0], sizes = [8, 512], strides = [1, 1]} : vector<16x1024xf32> to vector<8x512xf32>
    %296 = arith.addf %294, %295 : vector<8x512xf32>
    %c0_130 = arith.constant 0 : index
    %c512_131 = arith.constant 512 : index
    %297 = vector.load %arg10[%c0_130, %c512_131] : memref<64x1024xf32, #tpu.memory_space<vmem>>, vector<8x512xf32>
    %298 = vector.extract_strided_slice %293 {offsets = [8, 512], sizes = [8, 512], strides = [1, 1]} : vector<16x1024xf32> to vector<8x512xf32>
    %299 = arith.addf %297, %298 : vector<8x512xf32>
    %300 = tpu.concatenate %296, %299 in 0 : vector<8x512xf32>, vector<8x512xf32> -> vector<16x512xf32>
    %301 = vector.extract_strided_slice %300 {offsets = [0, 0], sizes = [16, 256], strides = [1, 1]} : vector<16x512xf32> to vector<16x256xf32>
    %cst_132 = arith.constant 5.000000e-01 : f32
    %302 = vector.broadcast %cst_132 : f32 to vector<16x256xf32>
    %303 = arith.mulf %302, %301 : vector<16x256xf32>
    %304 = math.tanh %303 : vector<16x256xf32>
    %cst_133 = arith.constant 5.000000e-01 : f32
    %305 = vector.broadcast %cst_133 : f32 to vector<16x256xf32>
    %306 = arith.mulf %305, %304 : vector<16x256xf32>
    %cst_134 = arith.constant 5.000000e-01 : f32
    %307 = vector.broadcast %cst_134 : f32 to vector<16x256xf32>
    %308 = arith.addf %306, %307 : vector<16x256xf32>
    %309 = vector.extract_strided_slice %300 {offsets = [0, 384], sizes = [16, 128], strides = [1, 1]} : vector<16x512xf32> to vector<16x128xf32>
    %cst_135 = arith.constant 5.000000e-01 : f32
    %310 = vector.broadcast %cst_135 : f32 to vector<16x128xf32>
    %311 = arith.mulf %310, %309 : vector<16x128xf32>
    %312 = math.tanh %311 : vector<16x128xf32>
    %cst_136 = arith.constant 5.000000e-01 : f32
    %313 = vector.broadcast %cst_136 : f32 to vector<16x128xf32>
    %314 = arith.mulf %313, %312 : vector<16x128xf32>
    %cst_137 = arith.constant 5.000000e-01 : f32
    %315 = vector.broadcast %cst_137 : f32 to vector<16x128xf32>
    %316 = arith.addf %314, %315 : vector<16x128xf32>
    %317 = vector.extract_strided_slice %300 {offsets = [0, 256], sizes = [16, 128], strides = [1, 1]} : vector<16x512xf32> to vector<16x128xf32>
    %318 = math.tanh %317 : vector<16x128xf32>
    %319 = vector.extract_strided_slice %308 {offsets = [0, 128], sizes = [16, 128], strides = [1, 1]} : vector<16x256xf32> to vector<16x128xf32>
    %320 = arith.mulf %319, %283 : vector<16x128xf32>
    %321 = vector.extract_strided_slice %308 {offsets = [0, 0], sizes = [16, 128], strides = [1, 1]} : vector<16x256xf32> to vector<16x128xf32>
    %322 = arith.mulf %321, %318 : vector<16x128xf32>
    %323 = arith.addf %320, %322 : vector<16x128xf32>
    %324 = math.tanh %323 : vector<16x128xf32>
    %325 = arith.mulf %316, %324 : vector<16x128xf32>
    %326 = vector.extract_strided_slice %325 {offsets = [0, 0], sizes = [8, 128], strides = [1, 1]} : vector<16x128xf32> to vector<8x128xf32>
    %c56_138 = arith.constant 56 : index
    %c0_139 = arith.constant 0 : index
    %327 = vector.load %arg11[%c56_138, %c0_139] : memref<64x256xf32, #tpu.memory_space<vmem>>, vector<8x128xf32>
    tpu.vector_store %arg11[%c56_138, %c0_139], %326 {strides = array<i32>} : memref<64x256xf32, #tpu.memory_space<vmem>>, vector<8x128xf32>,
    %328 = vector.extract_strided_slice %325 {offsets = [8, 0], sizes = [8, 128], strides = [1, 1]} : vector<16x128xf32> to vector<8x128xf32>
    %c0_140 = arith.constant 0 : index
    %c128_141 = arith.constant 128 : index
    %329 = vector.load %arg11[%c0_140, %c128_141] : memref<64x256xf32, #tpu.memory_space<vmem>>, vector<8x128xf32>
    tpu.vector_store %arg11[%c0_140, %c128_141], %328 {strides = array<i32>} : memref<64x256xf32, #tpu.memory_space<vmem>>, vector<8x128xf32>,
    %c2_i32 = arith.constant 2 : i32
    %330 = arith.cmpi eq, %arg0, %c2_i32 : i32
    %331 = arith.extui %330 : i1 to i32
    %c0_i32_142 = arith.constant 0 : i32
    %332 = arith.cmpi ne, %331, %c0_i32_142 : i32
    scf.if %332 {
      %c56_143 = arith.constant 56 : index
      %c0_144 = arith.constant 0 : index
      %333 = vector.load %arg11[%c56_143, %c0_144] : memref<64x256xf32, #tpu.memory_space<vmem>>, vector<8x256xf32>
      %c0_145 = arith.constant 0 : index
      %c0_146 = arith.constant 0 : index
      %334 = vector.load %arg7[%c0_145, %c0_146] : memref<1x256xf32, #tpu.memory_space<vmem>>, vector<1x256xf32>
      %335 = vector.broadcast %334 : vector<1x256xf32> to vector<8x256xf32>
      %336 = arith.mulf %333, %335 : vector<8x256xf32>
      %cst_147 = arith.constant dense<0.000000e+00> : vector<8xf32>
      %337 = vector.multi_reduction <add>, %336, %cst_147 [1] : vector<8x256xf32> to vector<8xf32>
      %338 = vector.shape_cast %337 : vector<8xf32> to vector<8x1xf32>
      %c0_148 = arith.constant 0 : index
      %c0_149 = arith.constant 0 : index
      %339 = vector.load %arg8[%c0_148, %c0_149] : memref<1x1xf32, #tpu.memory_space<vmem>>, vector<1x1xf32>
      %340 = vector.broadcast %339 : vector<1x1xf32> to vector<8x1xf32>
      %341 = arith.addf %338, %340 : vector<8x1xf32>
      %c0_150 = arith.constant 0 : index
      %c0_151 = arith.constant 0 : index
      %342 = vector.load %arg9[%c0_150, %c0_151] : memref<8x1xf32, #tpu.memory_space<vmem>>, vector<8x1xf32>
      tpu.vector_store %arg9[%c0_150, %c0_151], %341 {strides = array<i32>} : memref<8x1xf32, #tpu.memory_space<vmem>>, vector<8x1xf32>,
    } else {
    }
    return
  }
  func.func @transform_0(%arg0: i32) -> (i32, i32) {
    %c0_i32 = arith.constant 0 : i32
    %c0_i32_0 = arith.constant 0 : i32
    %c0_i32_1 = arith.constant 0 : i32
    return %c0_i32, %c0_i32_0 : i32, i32
  }
  func.func @transform_1(%arg0: i32) -> (i32, i32, i32) {
    %c0_i32 = arith.constant 0 : i32
    %c0_i32_0 = arith.constant 0 : i32
    %c0_i32_1 = arith.constant 0 : i32
    return %arg0, %c0_i32, %c0_i32_0 : i32, i32, i32
  }
  func.func @transform_2(%arg0: i32) -> (i32, i32, i32) {
    %c0_i32 = arith.constant 0 : i32
    %c0_i32_0 = arith.constant 0 : i32
    %c0_i32_1 = arith.constant 0 : i32
    return %arg0, %c0_i32, %c0_i32_0 : i32, i32, i32
  }
  func.func @transform_3(%arg0: i32) -> (i32, i32, i32) {
    %c0_i32 = arith.constant 0 : i32
    %c0_i32_0 = arith.constant 0 : i32
    %c0_i32_1 = arith.constant 0 : i32
    return %arg0, %c0_i32, %c0_i32_0 : i32, i32, i32
  }
  func.func @transform_4(%arg0: i32) -> (i32, i32, i32) {
    %c0_i32 = arith.constant 0 : i32
    %c0_i32_0 = arith.constant 0 : i32
    %c0_i32_1 = arith.constant 0 : i32
    return %arg0, %c0_i32, %c0_i32_0 : i32, i32, i32
  }
  func.func @transform_5(%arg0: i32) -> (i32, i32, i32) {
    %c0_i32 = arith.constant 0 : i32
    %c0_i32_0 = arith.constant 0 : i32
    %c0_i32_1 = arith.constant 0 : i32
    return %arg0, %c0_i32, %c0_i32_0 : i32, i32, i32
  }
  func.func @transform_6(%arg0: i32) -> (i32, i32) {
    %c0_i32 = arith.constant 0 : i32
    %c0_i32_0 = arith.constant 0 : i32
    %c0_i32_1 = arith.constant 0 : i32
    return %c0_i32, %c0_i32_0 : i32, i32
  }
  func.func @transform_7(%arg0: i32) -> (i32, i32) {
    %c0_i32 = arith.constant 0 : i32
    %c0_i32_0 = arith.constant 0 : i32
    %c0_i32_1 = arith.constant 0 : i32
    return %c0_i32, %c0_i32_0 : i32, i32
  }
  func.func @transform_8(%arg0: i32) -> (i32, i32) {
    %c0_i32 = arith.constant 0 : i32
    %c0_i32_0 = arith.constant 0 : i32
    %c0_i32_1 = arith.constant 0 : i32
    return %c0_i32, %c0_i32_0 : i32, i32
  }
}

</mosaic_0001>

<bundles_post_ra>
// kernel: lstm_forward.1
= control target key start
LH: loop header
LB: loop body
LE: loop exit
PB: predicated region body
PF: predicated region fallthrough
CT: control target
= control target key end

     0   :  { %s11310_s0 = inlined_call_operand.vmem [shape: bf16[64,256], index: 0, kind: input, shape index: {}]   ;;  %s11311_s1 = inlined_call_operand.hbm [shape: bf16[3,256,1024], index: 1, kind: input, shape index: {}]   ;;  %s11312_s2 = inlined_call_operand.hbm [shape: bf16[3,128,1024], index: 2, kind: input, shape index: {}]   ;;  %s11313_s3 = inlined_call_operand.hbm [shape: f32[3,1,1024], index: 3, kind: input, shape index: {}]   ;;  %s11314_s4 = inlined_call_operand.vmem [shape: f32[3,16,128], index: 4, kind: input, shape index: {}]   ;;  %s11315_s5 = inlined_call_operand.vmem [shape: f32[3,16,128], index: 5, kind: input, shape index: {}]   ;;  %s11316_s6 = inlined_call_operand.hbm [shape: f32[1,256], index: 6, kind: input, shape index: {}]   ;;  %s11317_s7 = inlined_call_operand.<no memory space> [shape: f32[1,1], index: 7, kind: input, shape index: {}]   ;;  %s11318_s8 = inlined_call_operand.vmem [shape: f32[8,1], index: 8, kind: output, shape index: {}]  }
   0x1   :  { %11377 = sst [smem:[#allocation30_spill]] %s11312_s2  ;;  %v13_v0 = vstv %s11317_s7 }
   0x2   :  { %14 = vst [vmem:[#allocation4] sm:$0x1] %v13_v0 }
   0x3   :  { %15 = vsyncpa [#allocation6], 0 }
   0x4   :  { %17 = vsyncpa [#allocation6 + $0x1], 0 }
   0x5   :  { %18 = vsyncpa [#allocation8], 0 }
   0x6   :  { %20 = vsyncpa [#allocation8 + $0x1], 0 }
   0x7   :  { %21 = vsyncpa [#allocation11], 0  ;;  %s9092_s29 = smov 0   ;;  %s9094_s30 = smov 0  }
   0x8   :  { %s9096_s9 = smov 0   ;;  %s9098_s10 = smov 0  }
   0x9 LB: > { %11378 = sst [smem:[#allocation15_spill]] %s9031_s9  ;;  %s9113_s7 = sadd.s32 1, %s9035_s10   ;;  %s9035_s10 = sphi %s9098_s10, %s11487_s10   ;;  %s9031_s9 = sphi %s9096_s9, %s11489_s9   ;;  %s9027_s30 = sphi %s9094_s30, %s11491_s30   ;;  %s9023_s29 = sphi %s9092_s29, %s11490_s29  }
   0xa   : > { %11379 = sst [smem:[#allocation16_spill]] %s9113_s7  ;;  %s55_s11 = sadd.s32 1, %s9031_s9 }
   0xb   : > { %s52_s12 = ssub.s32 %s9035_s10, %s9113_s7  ;;  %p62_p0 = scmp.ne.s32.totalorder %s9031_s9, %s9027_s30 }
   0xc   : > { %p53_p1 = scmp.eq.s32.totalorder %s52_s12, 0  ;;  %p63_p2 = scmp.eq.s32.totalorder %s9035_s10, 0 }
   0xd   : > { %p8665_p3 = scmp.lt.s32.totalorder %s9035_s10, 3  ;;  %s9126_s14 = sand.u32 1, %s9031_s9  }
   0xe   : > { %s9123_s13 = scalar_select %p53_p1, %s9031_s9, %s55_s11  }
   0xf   : > { %p64_p4 = por %p63_p2, %p62_p0  ;;  %s297_s16 = sand.u32 1, %s9035_s10  }
  0x10   : > { %11380 = sst [smem:[#allocation17_spill]] %s9123_s13  ;;  %s7838_s17 = sshll.u32 %s9126_s14, 9 }
  0x11   : > { %p9128_p5 = pnand %p8665_p3, %p64_p4  ;;  %s8636_s18 = sshll.u32 %s9035_s10, 13 }
  0x12   : > { %s301_s19 = scalar_lea.vmem [#allocation7], %s7838_s17  ;;  %s11382_s2 = sld [smem:[#allocation30_spill]] }
  0x13   : > { %s11381_s15 = scalar_select %p9128_p5, 1, 0 }
  0x14   : > { %s308_s20 = sshll.u32 %s301_s19, 4  ;;  %s9142_s24 = scalar_lea.sflag [#allocation8], %s297_s16  ;;  %s9140_s20 = int_to_ptr.vmem [resolvable:$true] %s308_s20 }
  0x15   : > { %p9148_p7 = pneg %p9128_p5 }
  0x17   : > { %s11383_s26 = scalar_select %p9148_p7, 1, 0 }
  0x18   : > { %s9138_s23 = scalar_lea.hbm %s11382_s2, %s8636_s18  ;;  %s8880_s11 = scalar_lea.hbm %s11382_s2, 24576 }
  0x19   : > { %s8875_s25 = scalar_lea.hbm %s9138_s23, 8192  ;;  %p8881_p10 = scmp.lt.u32.totalorder %s9138_s23, %s11382_s2 }
  0x1a   : > { %p8876_p6 = scmp.ne.s32.totalorder %s9138_s23, %s8875_s25  ;;  %p8882_p11 = scmp.lt.u32.totalorder %s8880_s11, %s8875_s25 }
  0x1b   : > { %p8884_p13 = scmp.lt.u32.totalorder %s8875_s25, %s9138_s23 }
  0x1c   : > { %p8878_p8 = pnand %p9148_p7, %p8876_p6  ;;  %p8883_p12 = por %p8882_p11, %p8881_p10 }
  0x1e   : > { %p8879_p9 = pneg %p8878_p8  ;;  %p8885_p0 = por %p8884_p13, %p8883_p12 }
  0x20   : > { %p8886_p1 = pnand %p8885_p0, %p8879_p9 }
  0x22   : > { %8889 = shalt.err (!%p8886_p1)
}
  0x23   : > { %s8890_s16 = scalar_lea.vmem %s9140_s20, 8192  ;;  %s9037_s18 = smov [#allocation7]  }
  0x24   : > { %p8891_p2 = scmp.ne.s32.totalorder %s9140_s20, %s8890_s16  ;;  %s8895_s19 = sshll.u32 %s9037_s18, 4  ;;  %s8896_s19 = int_to_ptr.vmem [resolvable:$false] %s8895_s19 }
  0x25   : > { %s8897_s21 = scalar_lea.vmem %s8896_s19, 16384  ;;  %p8898_p6 = scmp.lt.s32.totalorder %s9140_s20, %s8896_s19 }
  0x26   : > { %p8893_p3 = pnand %p8891_p2, %p9148_p7  ;;  %p8899_p8 = scmp.lt.s32.totalorder %s8897_s21, %s8890_s16 }
  0x28   : > { %p8894_p4 = pneg %p8893_p3  ;;  %p8900_p10 = por %p8899_p8, %p8898_p6 }
  0x2a   : > { %p8901_p11 = pnand %p8900_p10, %p8894_p4 }
  0x2c   : > { %8904 = shalt.err (!%p8901_p11)
}
  0x2d   : > { %s11319_s22 = smov 512   ;;  %s11320_s25 = smov 32  }
  0x2e   : > { %8660 = dma.hbm_to_vmem [thread:$0]  (!%p9128_p5), %s9138_s23, 8192, %s9140_s20, %s9142_s24, %s11319_s22, %s11319_s22, %s11320_s25  }
  0x2f   : > { %s9176_s27 = sadd.s32 4294967295, %s9035_s10   ;;  %p68_p12 = scmp.ne.s32.totalorder %s9027_s30, %s9023_s29 }
  0x30   : > { %p11324_p9 = scmp.eq.s32.totalorder %s9176_s27, 0  ;;  %p7832_p13 = scmp.ge.s32.totalorder %s9035_s10, 1 }
  0x31   : > { %p246_p0 = scmp.lt.s32.totalorder %s9035_s10, 4  ;;  %s9040_s20 = smov [#allocation10]  }
  0x32   : > { %p9186_p2 = por %p11324_p9, %p68_p12  ;;  %s262_s23 = sshll.u32 %s9040_s20, 4  ;;  %s263_s23 = int_to_ptr.vmem [resolvable:$true] %s262_s23 }
  0x33   : > { %p9190_p3 = pnand %p7832_p13, %p246_p0  ;;  %s7835_s29 = sshll.u32 %s9126_s14, 10 }
  0x34   : > { %s11384_s28 = scalar_select %p9186_p2, 1, 0 }
  0x35   : > { %s11385_s11 = scalar_select %p9190_p3, 1, 0 }
  0x36   : > { %p8650_p4 = pneg %p9190_p3  ;;  %s8635_s12 = sshll.u32 %s9035_s10, 14 }
  0x37   : > { %s9207_s19 = scalar_lea.hbm %s11311_s1, %s8635_s12  ;;  %s280_s21 = scalar_lea.vmem [#allocation5], %s7835_s29 }
  0x38   : > { %p9200_p6 = pnand %p8650_p4, %p11324_p9  ;;  %s287_s22 = sshll.u32 %s280_s21, 4  ;;  %s9210_s22 = int_to_ptr.vmem [resolvable:$true] %s287_s22 }
  0x39   : > { %s7841_s25 = sshll.u32 %s9126_s14, 3  ;;  %s8905_s13 = scalar_lea.hbm %s11316_s6, 32 }
  0x3a   : > { %p8906_p8 = scmp.ne.s32.totalorder %s11316_s6, %s8905_s13  ;;  %p8907_p10 = pneg %p9200_p6 }
  0x3b   : > { %p8912_p13 = scmp.lt.u32.totalorder %s8905_s13, %s11316_s6 }
  0x3c   : > { %p8908_p11 = pnand %p8907_p10, %p8906_p8 }
  0x3e   : > { %p8909_p12 = pneg %p8908_p11 }
  0x40   : > { %p8914_p0 = pnand %p8912_p13, %p8909_p12 }
  0x42   : > { %8917 = shalt.err (!%p8914_p0)
}
  0x43   : > { %s8918_s29 = scalar_lea.vmem %s263_s23, 32  ;;  %p8926_p2 = scmp.lt.s32.totalorder %s263_s23, %s263_s23 }
  0x44   : > { %p8919_p4 = scmp.ne.s32.totalorder %s263_s23, %s8918_s29  ;;  %p8927_p3 = scmp.lt.s32.totalorder %s8918_s29, %s8918_s29 }
  0x46   : > { %p8921_p1 = pnand %p8919_p4, %p8907_p10  ;;  %p8928_p5 = por %p8927_p3, %p8926_p2 }
  0x48   : > { %p8922_p9 = pneg %p8921_p1 }
  0x4a   : > { %p8929_p7 = pnand %p8928_p5, %p8922_p9 }
  0x4c   : > { %8932 = shalt.err (!%p8929_p7)
}
  0x4d   : > { %8653 = dma.hbm_to_vmem [thread:$0]  (!%p9200_p6), %s11316_s6, 32, %s263_s23, [#allocation11]  }
  0x4e   : > { %s277_s7 = scalar_lea.sflag [#allocation6], %s9126_s14  ;;  %s8933_s13 = scalar_lea.hbm %s9207_s19, 16384 }
  0x4f   : > { %p8934_p1 = scmp.ne.s32.totalorder %s9207_s19, %s8933_s13  ;;  %p11387_p8 = scmp.ne.s32.totalorder %s11383_s26, 0 }
  0x50   : > { %s8938_s17 = scalar_lea.hbm %s11311_s1, 49152  ;;  %p8939_p5 = scmp.lt.u32.totalorder %s9207_s19, %s11311_s1 }
  0x51   : > { %p8936_p10 = pnand %p8934_p1, %p11387_p8  ;;  %p8940_p7 = scmp.lt.u32.totalorder %s8938_s17, %s8933_s13 }
  0x52   : > { %p8942_p3 = scmp.lt.u32.totalorder %s8933_s13, %s9207_s19 }
  0x53   : > { %p8937_p2 = pneg %p8936_p10  ;;  %p8941_p9 = por %p8940_p7, %p8939_p5 }
  0x55   : > { %p8943_p11 = por %p8942_p3, %p8941_p9 }
  0x57   : > { %p8944_p12 = pnand %p8943_p11, %p8937_p2 }
  0x59   : > { %8947 = shalt.err (!%p8944_p12)
}
  0x5a   : > { %s8948_s23 = scalar_lea.vmem %s9210_s22, 16384  ;;  %s9041_s12 = smov [#allocation5]  }
  0x5b   : > { %p8949_p6 = scmp.ne.s32.totalorder %s9210_s22, %s8948_s23  ;;  %s8953_s29 = sshll.u32 %s9041_s12, 4  ;;  %s8954_s29 = int_to_ptr.vmem [resolvable:$false] %s8953_s29 }
  0x5c   : > { %s8955_s2 = scalar_lea.vmem %s8954_s29, 32768  ;;  %p8956_p4 = scmp.lt.s32.totalorder %s9210_s22, %s8954_s29 }
  0x5d   : > { %p8951_p13 = pnand %p8949_p6, %p11387_p8  ;;  %p8957_p1 = scmp.lt.s32.totalorder %s8955_s2, %s8948_s23 }
  0x5f   : > { %p8952_p0 = pneg %p8951_p13  ;;  %p8958_p10 = por %p8957_p1, %p8956_p4 }
  0x61   : > { %p8959_p5 = pnand %p8958_p10, %p8952_p0 }
  0x63   : > { %8962 = shalt.err (!%p8959_p5)
}
  0x64   : > { %p11388_p2 = scmp.ne.s32.totalorder %s11381_s15, 0  ;;  %s11389_s9 = smov 32  }
  0x65   : > { %s11390_s13 = smov 512   ;;  %s8637_s18 = sshll.u32 %s9035_s10, 7 }
  0x66   : > { %8657 = dma.hbm_to_vmem [thread:$0]  (!%p11388_p2), %s9207_s19, 16384, %s9210_s22, %s277_s7, %s11390_s13, %s11390_s13, %s11389_s9  }
  0x67   : > { %s9259_s20 = scalar_lea.hbm %s11313_s3, %s8637_s18  ;;  %s322_s16 = scalar_lea.vmem [#allocation9], %s7841_s25 }
  0x68   : > { %s330_s23 = sshll.u32 %s322_s16, 4  ;;  %s8963_s12 = scalar_lea.hbm %s9259_s20, 128  ;;  %s331_s23 = int_to_ptr.vmem [resolvable:$true] %s330_s23 }
  0x69   : > { %p8964_p7 = scmp.ne.s32.totalorder %s9259_s20, %s8963_s12  ;;  %s8968_s19 = scalar_lea.hbm %s11313_s3, 384 }
  0x6a   : > { %p8969_p11 = scmp.lt.u32.totalorder %s9259_s20, %s11313_s3  ;;  %p8970_p12 = scmp.lt.u32.totalorder %s8968_s19, %s8963_s12 }
  0x6b   : > { %p8966_p9 = pnand %p8964_p7, %p11387_p8  ;;  %p8972_p13 = scmp.lt.u32.totalorder %s8963_s12, %s9259_s20 }
  0x6c   : > { %p8971_p6 = por %p8970_p12, %p8969_p11 }
  0x6d   : > { %p8967_p3 = pneg %p8966_p9 }
  0x6e   : > { %p8973_p0 = por %p8972_p13, %p8971_p6 }
  0x70   : > { %p8974_p4 = pnand %p8973_p0, %p8967_p3 }
  0x72   : > { %8977 = shalt.err (!%p8974_p4)
}
  0x73   : > { %s8978_s14 = scalar_lea.vmem %s331_s23, 128  ;;  %s9042_s25 = smov [#allocation9]  }
  0x74   : > { %p8979_p1 = scmp.ne.s32.totalorder %s331_s23, %s8978_s14  ;;  %s8983_s2 = sshll.u32 %s9042_s25, 4  ;;  %s8984_s2 = int_to_ptr.vmem [resolvable:$false] %s8983_s2 }
  0x75   : > { %s8985_s9 = scalar_lea.vmem %s8984_s2, 256  ;;  %p8986_p7 = scmp.lt.s32.totalorder %s331_s23, %s8984_s2 }
  0x76   : > { %p8981_p10 = pnand %p8979_p1, %p11387_p8  ;;  %p8987_p9 = scmp.lt.s32.totalorder %s8985_s9, %s8978_s14 }
  0x78   : > { %p8982_p5 = pneg %p8981_p10  ;;  %p8988_p2 = por %p8987_p9, %p8986_p7 }
  0x7a   : > { %p8989_p11 = pnand %p8988_p2, %p8982_p5 }
  0x7c   : > { %8992 = shalt.err (!%p8989_p11)
}
  0x7d   : > { %p11391_p12 = scmp.ne.s32.totalorder %s11381_s15, 0  ;;  %p11392_p3 = scmp.ne.s32.totalorder %s11385_s11, 0 }
  0x7f   : > { %8663 = dma.hbm_to_vmem [thread:$0]  (!%p11391_p12), %s9259_s20, 128, %s331_s23, %s9142_s24  }
  0x80   : > { %355 = sbr.rel (%p11392_p3) target bundleno = 3344 (0xd10), region = 52 }
  0x87   : > { %s357_s26 = sand.u32 1, %s9027_s30   ;;  %p11393_p8 = scmp.ne.s32.totalorder %s11384_s28, 0 }
  0x88   : > { %s7845_s13 = sshll.u32 %s357_s26, 10  ;;  %s358_s18 = scalar_lea.sflag [#allocation6], %s357_s26 }
  0x89   : > { %s9284_s21 = scalar_lea.vmem [#allocation5], %s7845_s13 }
  0x8a   : > { %9010 = dma.done.wait (%p11393_p8), %s358_s18, 16384  }
  0x8b   : > { %9012 = vsyncadd (%p11393_p8), %s358_s18, 4294950912  ;;  %s366_s15 = sand.u32 1, %s9176_s27   ;;  %s7846_s17 = sshll.u32 %s357_s26, 9 }
  0x8c   : > { %s367_s24 = scalar_lea.sflag [#allocation8], %s366_s15  ;;  %s9291_s20 = scalar_lea.vmem [#allocation7], %s7846_s17 }
  0x8d   : > { %9014 = dma.done.wait (%p11393_p8), %s367_s24, 8320  }
  0x8e   : > { %9016 = vsyncadd (%p11393_p8), %s367_s24, 4294958976  ;;  %s7847_s11 = sshll.u32 %s357_s26, 3  ;;  %p11394_p2 = scmp.eq.s32.totalorder %s9176_s27, 0 }
  0x8f   : > { %s9297_s16 = scalar_lea.vmem [#allocation9], %s7847_s11 }
  0x90   : > { %9018 = dma.done.wait (%p11394_p2), [#allocation11], 32   ;;  %p11395_p6 = pmov %p11394_p2 }
  0x91   : > { %p431_p13 = scmp.lt.s32.totalorder %s9176_s27, 2  ;;  %p11396_p0 = scmp.ne.s32.totalorder %s9176_s27, 0 }
  0x92   : > { %9020 = vsyncadd (%p11395_p6), [#allocation11], 4294967264  ;;  %v454_v1 = vld [vmem:[%s9284_s21] sm:$0xff] (!%p11396_p0)  ;;  %v455_v3 = vld [vmem:[%s9284_s21 + $0x8] sm:$0xff] (!%p11396_p0) }
  0x93   : > { %s432_s23 = scalar_select %p431_p13, %s9176_s27, 2 }
  0x94   : > { %445 = sbr.rel (%p11396_p0) target bundleno = 521 (0x209), region = 72  ;;  %v458_v2 = vld [vmem:[%s9284_s21 + $0x20] sm:$0xff] (!%p11396_p0)  ;;  %v459_v5 = vld [vmem:[%s9284_s21 + $0x28] sm:$0xff] (!%p11396_p0) }
  0x95   : > { %s8638_s12 = sshll.u32 %s432_s23, 4  ;;  %v7863_v4 = vcombine.high (!%p11396_p0), %v454_v1, %v458_v2  ;;  %v7862_v6 = vcombine.low (!%p11396_p0), %v454_v1, %v458_v2  ;;  %v462_v7 = vld [vmem:[%s9284_s21 + $0x40] sm:$0xff] (!%p11396_p0)  ;;  %v7865_v9 = vcombine.high (!%p11396_p0), %v455_v3, %v459_v5  ;;  %v7864_v10 = vcombine.low (!%p11396_p0), %v455_v3, %v459_v5  ;;  %v463_v12 = vld [vmem:[%s9284_s21 + $0x48] sm:$0xff] (!%p11396_p0) }
  0x96   : > { %s9308_s19 = scalar_lea.vmem %s11314_s4, %s8638_s12  ;;  %s9313_s29 = scalar_lea.vmem %s11315_s5, %s8638_s12  ;;  %v466_v8 = vld [vmem:[%s9284_s21 + $0x60] sm:$0xff] (!%p11396_p0)  ;;  %v467_v13 = vld [vmem:[%s9284_s21 + $0x68] sm:$0xff] (!%p11396_p0) }
  0x97   : > { %v7871_v11 = vcombine.high (!%p11396_p0), %v462_v7, %v466_v8  ;;  %v470_v14 = vld [vmem:[%s9284_s21 + $0x80] sm:$0xff] (!%p11396_p0)  ;;  %1304 = vmatprep.subr.bf16.mxu0 (!%p11396_p0), %v7863_v4  ;;  %v7873_v15 = vcombine.high (!%p11396_p0), %v463_v12, %v467_v13  ;;  %v471_v17 = vld [vmem:[%s9284_s21 + $0x88] sm:$0xff] (!%p11396_p0)  ;;  %1377 = vmatprep.subr.bf16.mxu1 (!%p11396_p0), %v7865_v9  ;;  %v7870_v19 = vcombine.low (!%p11396_p0), %v462_v7, %v466_v8 }
  0x98   : > { %v474_v16 = vld [vmem:[%s9284_s21 + $0xa0] sm:$0xff] (!%p11396_p0)  ;;  %v475_v18 = vld [vmem:[%s9284_s21 + $0xa8] sm:$0xff] (!%p11396_p0)  ;;  %1305 = vmatpush1.bf16.msra.mxu0 (!%p11396_p0), %v7862_v6  ;;  %1378 = vmatpush1.bf16.msra.mxu1 (!%p11396_p0), %v7864_v10  ;;  %v7872_v20 = vcombine.low (!%p11396_p0), %v463_v12, %v467_v13 }
  0x99   : > { %1306 = vmatprep.subr.bf16.mxu0 (!%p11396_p0), %v7871_v11  ;;  %v7879_v21 = vcombine.high (!%p11396_p0), %v470_v14, %v474_v16  ;;  %1379 = vmatprep.subr.bf16.mxu1 (!%p11396_p0), %v7873_v15  ;;  %v7881_v22 = vcombine.high (!%p11396_p0), %v471_v17, %v475_v18  ;;  %v478_v23 = vld [vmem:[%s9284_s21 + $0xc0] sm:$0xff] (!%p11396_p0)  ;;  %v479_v25 = vld [vmem:[%s9284_s21 + $0xc8] sm:$0xff] (!%p11396_p0)  ;;  %v7878_v27 = vcombine.low (!%p11396_p0), %v470_v14, %v474_v16 }
  0x9a   : > { %v482_v24 = vld [vmem:[%s9284_s21 + $0xe0] sm:$0xff] (!%p11396_p0)  ;;  %v483_v26 = vld [vmem:[%s9284_s21 + $0xe8] sm:$0xff] (!%p11396_p0)  ;;  %v7880_v28 = vcombine.low (!%p11396_p0), %v471_v17, %v475_v18 }
  0x9b   : > { %v7887_v29 = vcombine.high %v478_v23, %v482_v24  ;;  %v7889_v30 = vcombine.high %v479_v25, %v483_v26  ;;  %v486_v31 = vld [vmem:[%s9284_s21 + $0x100] sm:$0xff]  ;;  %v487_v33 = vld [vmem:[%s9284_s21 + $0x108] sm:$0xff]  ;;  %v7886_v35 = vcombine.low %v478_v23, %v482_v24  ;;  %v7888_v36 = vcombine.low %v479_v25, %v483_v26 }
  0x9c   : > { %1307 = vmatpush1.bf16.msra.mxu0 %v7870_v19  ;;  %1380 = vmatpush1.bf16.msra.mxu1 %v7872_v20  ;;  %v490_v32 = vld [vmem:[%s9284_s21 + $0x120] sm:$0xff]  ;;  %v491_v34 = vld [vmem:[%s9284_s21 + $0x128] sm:$0xff] }
  0x9d   : > { %1308 = vmatprep.subr.bf16.mxu0 %v7879_v21  ;;  %1381 = vmatprep.subr.bf16.mxu1 %v7881_v22  ;;  %v7895_v37 = vcombine.high %v486_v31, %v490_v32  ;;  %v7897_v38 = vcombine.high %v487_v33, %v491_v34  ;;  %v494_v39 = vld [vmem:[%s9284_s21 + $0x140] sm:$0xff]  ;;  %v495_v41 = vld [vmem:[%s9284_s21 + $0x148] sm:$0xff]  ;;  %v7894_v43 = vcombine.low %v486_v31, %v490_v32 }
  0x9e   : > { %v498_v40 = vld [vmem:[%s9284_s21 + $0x160] sm:$0xff]  ;;  %v499_v42 = vld [vmem:[%s9284_s21 + $0x168] sm:$0xff]  ;;  %v7896_v44 = vcombine.low %v487_v33, %v491_v34 }
  0x9f   : > { %v7903_v45 = vcombine.high %v494_v39, %v498_v40  ;;  %v7905_v46 = vcombine.high %v495_v41, %v499_v42  ;;  %v502_v47 = vld [vmem:[%s9284_s21 + $0x180] sm:$0xff]  ;;  %v503_v49 = vld [vmem:[%s9284_s21 + $0x188] sm:$0xff]  ;;  %v7902_v51 = vcombine.low %v494_v39, %v498_v40  ;;  %v7904_v52 = vcombine.low %v495_v41, %v499_v42 }
  0xa0   : > { %1309 = vmatpush1.bf16.msra.mxu0 %v7878_v27  ;;  %1382 = vmatpush1.bf16.msra.mxu1 %v7880_v28  ;;  %v506_v48 = vld [vmem:[%s9284_s21 + $0x1a0] sm:$0xff]  ;;  %v507_v50 = vld [vmem:[%s9284_s21 + $0x1a8] sm:$0xff] }
  0xa1   : > { %1310 = vmatprep.subr.bf16.mxu0 %v7887_v29  ;;  %1383 = vmatprep.subr.bf16.mxu1 %v7889_v30  ;;  %v7911_v53 = vcombine.high %v502_v47, %v506_v48  ;;  %v7913_v54 = vcombine.high %v503_v49, %v507_v50  ;;  %v510_v55 = vld [vmem:[%s9284_s21 + $0x1c0] sm:$0xff]  ;;  %v511_v58 = vld [vmem:[%s9284_s21 + $0x1c8] sm:$0xff]  ;;  %v7910_v60 = vcombine.low %v502_v47, %v506_v48 }
  0xa2   : > { %v514_v56 = vld [vmem:[%s9284_s21 + $0x1e0] sm:$0xff]  ;;  %v515_v59 = vld [vmem:[%s9284_s21 + $0x1e8] sm:$0xff]  ;;  %v7912_v61 = vcombine.low %v503_v49, %v507_v50 }
  0xa3   : > { %v9350_v57 = vld [vmem:[%s11310_s0 + $0x4] ss:$8 sps:$4 sm:$0xff]   ;;  %v7919_v62 = vcombine.high %v510_v55, %v514_v56  ;;  %v7921_v63 = vcombine.high %v511_v58, %v515_v59  ;;  %v7918_v4 = vcombine.low %v510_v55, %v514_v56  ;;  %v7920_v5 = vcombine.low %v511_v58, %v515_v59 }
  0xa4   : > { %1311 = vmatpush1.bf16.msra.mxu0 %v7886_v35  ;;  %1384 = vmatpush1.bf16.msra.mxu1 %v7888_v36  ;;  %v518_v0 = vld [vmem:[%s9284_s21 + $0x200] sm:$0xff]  ;;  %v519_v2 = vld [vmem:[%s9284_s21 + $0x208] sm:$0xff] }
  0xa5   : > { %1312 = vmatprep.subr.bf16.mxu0 %v7895_v37  ;;  %1385 = vmatprep.subr.bf16.mxu1 %v7897_v38  ;;  %v522_v1 = vld [vmem:[%s9284_s21 + $0x220] sm:$0xff]  ;;  %v523_v3 = vld [vmem:[%s9284_s21 + $0x228] sm:$0xff] }
  0xa6   : > { %1336 = vmatprep.mubr.bf16.mxu0 %v9350_v57  ;;  %1409 = vmatprep.mubr.bf16.mxu1 %v9350_v57  ;;  %v7927_v6 = vcombine.high %v518_v0, %v522_v1  ;;  %v7929_v7 = vcombine.high %v519_v2, %v523_v3  ;;  %v526_v8 = vld [vmem:[%s9284_s21 + $0x240] sm:$0xff]  ;;  %v527_v10 = vld [vmem:[%s9284_s21 + $0x248] sm:$0xff]  ;;  %v7926_v12 = vcombine.low %v518_v0, %v522_v1  ;;  %v456_v1 = vld [vmem:[%s9284_s21 + $0x10] sm:$0xff] }
  0xa7   : > { %v530_v9 = vld [vmem:[%s9284_s21 + $0x260] sm:$0xff]  ;;  %v531_v11 = vld [vmem:[%s9284_s21 + $0x268] sm:$0xff]  ;;  %v7928_v13 = vcombine.low %v519_v2, %v523_v3  ;;  %v460_v2 = vld [vmem:[%s9284_s21 + $0x30] sm:$0xff] }
  0xa8   : > { %1313 = vmatpush1.bf16.msra.mxu0 %v7894_v43  ;;  %1386 = vmatpush1.bf16.msra.mxu1 %v7896_v44  ;;  %v7935_v14 = vcombine.high %v526_v8, %v530_v9  ;;  %v7937_v15 = vcombine.high %v527_v10, %v531_v11  ;;  %v534_v16 = vld [vmem:[%s9284_s21 + $0x280] sm:$0xff]  ;;  %v535_v18 = vld [vmem:[%s9284_s21 + $0x288] sm:$0xff]  ;;  %v7934_v20 = vcombine.low %v526_v8, %v530_v9  ;;  %v457_v3 = vld [vmem:[%s9284_s21 + $0x18] sm:$0xff] }
  0xa9   : > { %1314 = vmatprep.subr.bf16.mxu0 %v7903_v45  ;;  %1387 = vmatprep.subr.bf16.mxu1 %v7905_v46  ;;  %v538_v17 = vld [vmem:[%s9284_s21 + $0x2a0] sm:$0xff]  ;;  %v539_v19 = vld [vmem:[%s9284_s21 + $0x2a8] sm:$0xff]  ;;  %v7936_v21 = vcombine.low %v527_v10, %v531_v11  ;;  %v464_v9 = vld [vmem:[%s9284_s21 + $0x50] sm:$0xff] }
  0xaa   : > { %v7943_v22 = vcombine.high %v534_v16, %v538_v17  ;;  %v7945_v23 = vcombine.high %v535_v18, %v539_v19  ;;  %v542_v24 = vld [vmem:[%s9284_s21 + $0x2c0] sm:$0xff]  ;;  %v543_v26 = vld [vmem:[%s9284_s21 + $0x2c8] sm:$0xff]  ;;  %v7942_v28 = vcombine.low %v534_v16, %v538_v17  ;;  %v7944_v29 = vcombine.low %v535_v18, %v539_v19  ;;  %v468_v10 = vld [vmem:[%s9284_s21 + $0x70] sm:$0xff] }
  0xab   : > { %v546_v25 = vld [vmem:[%s9284_s21 + $0x2e0] sm:$0xff]  ;;  %v547_v27 = vld [vmem:[%s9284_s21 + $0x2e8] sm:$0xff]  ;;  %v7875_v16 = vcombine.high %v464_v9, %v468_v10  ;;  %v472_v18 = vld [vmem:[%s9284_s21 + $0x90] sm:$0xff] }
  0xac   : > { %1315 = vmatpush1.bf16.msra.mxu0 %v7902_v51  ;;  %1388 = vmatpush1.bf16.msra.mxu1 %v7904_v52  ;;  %v7951_v30 = vcombine.high %v542_v24, %v546_v25  ;;  %v7953_v31 = vcombine.high %v543_v26, %v547_v27  ;;  %v550_v32 = vld [vmem:[%s9284_s21 + $0x300] sm:$0xff]  ;;  %v551_v34 = vld [vmem:[%s9284_s21 + $0x308] sm:$0xff]  ;;  %v7950_v36 = vcombine.low %v542_v24, %v546_v25  ;;  %v476_v19 = vld [vmem:[%s9284_s21 + $0xb0] sm:$0xff] }
  0xad   : > { %1316 = vmatprep.subr.bf16.mxu0 %v7911_v53  ;;  %1389 = vmatprep.subr.bf16.mxu1 %v7913_v54  ;;  %v554_v33 = vld [vmem:[%s9284_s21 + $0x320] sm:$0xff]  ;;  %v555_v35 = vld [vmem:[%s9284_s21 + $0x328] sm:$0xff]  ;;  %v7952_v37 = vcombine.low %v543_v26, %v547_v27  ;;  %v7883_v25 = vcombine.high %v472_v18, %v476_v19  ;;  %v480_v27 = vld [vmem:[%s9284_s21 + $0xd0] sm:$0xff] }
  0xae   : > { %v7959_v38 = vcombine.high %v550_v32, %v554_v33  ;;  %v7961_v39 = vcombine.high %v551_v34, %v555_v35  ;;  %v558_v40 = vld [vmem:[%s9284_s21 + $0x340] sm:$0xff]  ;;  %v559_v42 = vld [vmem:[%s9284_s21 + $0x348] sm:$0xff]  ;;  %v7958_v44 = vcombine.low %v550_v32, %v554_v33  ;;  %v7960_v45 = vcombine.low %v551_v34, %v555_v35 }
  0xaf   : > { %v562_v41 = vld [vmem:[%s9284_s21 + $0x360] sm:$0xff]  ;;  %v563_v43 = vld [vmem:[%s9284_s21 + $0x368] sm:$0xff]  ;;  %v7882_v32 = vcombine.low %v472_v18, %v476_v19  ;;  %v528_v18 = vld [vmem:[%s9284_s21 + $0x250] sm:$0xff] }
  0xb0   : > { %1317 = vmatpush1.bf16.msra.mxu0 %v7910_v60  ;;  %1390 = vmatpush1.bf16.msra.mxu1 %v7912_v61  ;;  %v7967_v46 = vcombine.high %v558_v40, %v562_v41  ;;  %v7969_v47 = vcombine.high %v559_v42, %v563_v43  ;;  %v566_v48 = vld [vmem:[%s9284_s21 + $0x380] sm:$0xff]  ;;  %v567_v50 = vld [vmem:[%s9284_s21 + $0x388] sm:$0xff]  ;;  %v7966_v52 = vcombine.low %v558_v40, %v562_v41  ;;  %v493_v40 = vld [vmem:[%s9284_s21 + $0x138] sm:$0xff] }
  0xb1   : > { %1318 = vmatprep.subr.bf16.mxu0 %v7919_v62  ;;  %1391 = vmatprep.subr.bf16.mxu1 %v7921_v63  ;;  %v570_v49 = vld [vmem:[%s9284_s21 + $0x3a0] sm:$0xff]  ;;  %v571_v51 = vld [vmem:[%s9284_s21 + $0x3a8] sm:$0xff]  ;;  %v7968_v53 = vcombine.low %v559_v42, %v563_v43  ;;  %v532_v19 = vld [vmem:[%s9284_s21 + $0x270] sm:$0xff] }
  0xb2   : > { %v7975_v54 = vcombine.high %v566_v48, %v570_v49  ;;  %v7977_v55 = vcombine.high %v567_v50, %v571_v51  ;;  %v574_v56 = vld [vmem:[%s9284_s21 + $0x3c0] sm:$0xff]  ;;  %v575_v59 = vld [vmem:[%s9284_s21 + $0x3c8] sm:$0xff]  ;;  %v7974_v61 = vcombine.low %v566_v48, %v570_v49  ;;  %v7976_v62 = vcombine.low %v567_v50, %v571_v51  ;;  %v501_v48 = vld [vmem:[%s9284_s21 + $0x178] sm:$0xff] }
  0xb3   : > { %v578_v58 = vld [vmem:[%s9284_s21 + $0x3e0] sm:$0xff]  ;;  %v579_v60 = vld [vmem:[%s9284_s21 + $0x3e8] sm:$0xff] }
  0xb4   : > { %1319 = vmatpush1.bf16.msra.mxu0 %v7918_v4  ;;  %1392 = vmatpush1.bf16.msra.mxu1 %v7920_v5  ;;  %v7983_v63 = vcombine.high %v574_v56, %v578_v58  ;;  %v7985_v0 = vcombine.high %v575_v59, %v579_v60  ;;  %v461_v4 = vld [vmem:[%s9284_s21 + $0x38] sm:$0xff]  ;;  %v7982_v5 = vcombine.low %v574_v56, %v578_v58 }
  0xb5   : > { %1320 = vmatprep.subr.bf16.mxu0 %v7927_v6  ;;  %1393 = vmatprep.subr.bf16.mxu1 %v7929_v7  ;;  %v7984_v6 = vcombine.low %v575_v59, %v579_v60  ;;  %v7867_v7 = vcombine.high %v456_v1, %v460_v2  ;;  %v7869_v8 = vcombine.high %v457_v3, %v461_v4  ;;  %v9397_v11 = vld [vmem:[%s11310_s0] ss:$8 sps:$4 sm:$0xff]   ;;  %v9450_v56 = vld [vmem:[%s11310_s0 + $0x34] ss:$8 sps:$4 sm:$0xff]  }
  0xb6   : > { %v9443_v49 = vld [vmem:[%s11310_s0 + $0x20] ss:$8 sps:$4 sm:$0xff]  }
  0xb7   : > { %v505_v58 = vld [vmem:[%s9284_s21 + $0x198] sm:$0xff] }
  0xb8   : > { %1321 = vmatpush1.bf16.msra.mxu0 %v7926_v12  ;;  %1394 = vmatpush1.bf16.msra.mxu1 %v7928_v13  ;;  %v465_v12 = vld [vmem:[%s9284_s21 + $0x58] sm:$0xff] }
  0xb9   : > { %1322 = vmatprep.subr.bf16.mxu0 %v7935_v14  ;;  %1395 = vmatprep.subr.bf16.mxu1 %v7937_v15  ;;  %v469_v13 = vld [vmem:[%s9284_s21 + $0x78] sm:$0xff]  ;;  %v7866_v14 = vcombine.low %v456_v1, %v460_v2  ;;  %v7868_v15 = vcombine.low %v457_v3, %v461_v4  ;;  %v516_v1 = vld [vmem:[%s9284_s21 + $0x1f0] sm:$0xff] }
  0xba   : > { %v7877_v17 = vcombine.high %v465_v12, %v469_v13  ;;  %v7876_v24 = vcombine.low %v465_v12, %v469_v13  ;;  %v509_v59 = vld [vmem:[%s9284_s21 + $0x1b8] sm:$0xff] }
  0xbb   : > { %v513_v2 = vld [vmem:[%s9284_s21 + $0x1d8] sm:$0xff] }
  0xbc   : > { %1323 = vmatpush1.bf16.msra.mxu0 %v7934_v20  ;;  %1396 = vmatpush1.bf16.msra.mxu1 %v7936_v21  ;;  %v9406_v20 = vld [vmem:[%s11310_s0 + $0x14] ss:$8 sps:$4 sm:$0xff]   ;;  %v9465_v4 = vld [vmem:[%s11310_s0 + $0x30] ss:$8 sps:$4 sm:$0xff]  }
  0xbd   : > { %1324 = vmatprep.subr.bf16.mxu0 %v7943_v22  ;;  %1397 = vmatprep.subr.bf16.mxu1 %v7945_v23  ;;  %v473_v21 = vld [vmem:[%s9284_s21 + $0x98] sm:$0xff]  ;;  %v7874_v23 = vcombine.low %v464_v9, %v468_v10  ;;  %v520_v9 = vld [vmem:[%s9284_s21 + $0x210] sm:$0xff] }
  0xbe   : > { %v477_v22 = vld [vmem:[%s9284_s21 + $0xb8] sm:$0xff]  ;;  %v524_v10 = vld [vmem:[%s9284_s21 + $0x230] sm:$0xff] }
  0xbf   : > { %v7885_v26 = vcombine.high %v473_v21, %v477_v22  ;;  %v7884_v33 = vcombine.low %v473_v21, %v477_v22  ;;  %v517_v3 = vld [vmem:[%s9284_s21 + $0x1f8] sm:$0xff] }
  0xc0   : > { %1325 = vmatpush1.bf16.msra.mxu0 %v7942_v28  ;;  %1398 = vmatpush1.bf16.msra.mxu1 %v7944_v29  ;;  %v484_v28 = vld [vmem:[%s9284_s21 + $0xf0] sm:$0xff]  ;;  %v481_v29 = vld [vmem:[%s9284_s21 + $0xd8] sm:$0xff] }
  0xc1   : > { %1326 = vmatprep.subr.bf16.mxu0 %v7951_v30  ;;  %1399 = vmatprep.subr.bf16.mxu1 %v7953_v31  ;;  %v485_v30 = vld [vmem:[%s9284_s21 + $0xf8] sm:$0xff]  ;;  %v7891_v34 = vcombine.high %v480_v27, %v484_v28  ;;  %v7890_v41 = vcombine.low %v480_v27, %v484_v28  ;;  %v536_v27 = vld [vmem:[%s9284_s21 + $0x290] sm:$0xff] }
  0xc2   : > { %v9421_v31 = vld [vmem:[%s11310_s0 + $0x10] ss:$8 sps:$4 sm:$0xff]   ;;  %v7893_v35 = vcombine.high %v481_v29, %v485_v30  ;;  %v7892_v42 = vcombine.low %v481_v29, %v485_v30 }
  0xc3   : > { %v521_v12 = vld [vmem:[%s9284_s21 + $0x218] sm:$0xff]  ;;  %v540_v28 = vld [vmem:[%s9284_s21 + $0x2b0] sm:$0xff] }
  0xc4   : > { %1327 = vmatpush1.bf16.msra.mxu0 %v7950_v36  ;;  %1400 = vmatpush1.bf16.msra.mxu1 %v7952_v37  ;;  %v488_v36 = vld [vmem:[%s9284_s21 + $0x110] sm:$0xff]  ;;  %v525_v13 = vld [vmem:[%s9284_s21 + $0x238] sm:$0xff] }
  0xc5   : > { %1328 = vmatprep.subr.bf16.mxu0 %v7959_v38  ;;  %1401 = vmatprep.subr.bf16.mxu1 %v7961_v39  ;;  %v492_v37 = vld [vmem:[%s9284_s21 + $0x130] sm:$0xff]  ;;  %v9428_v38 = vld [vmem:[%s11310_s0 + $0x24] ss:$8 sps:$4 sm:$0xff]   ;;  %v489_v39 = vld [vmem:[%s9284_s21 + $0x118] sm:$0xff] }
  0xc6   : > { %v7899_v43 = vcombine.high %v488_v36, %v492_v37  ;;  %v7898_v50 = vcombine.low %v488_v36, %v492_v37  ;;  %v7900_v51 = vcombine.low %v489_v39, %v493_v40  ;;  %v529_v21 = vld [vmem:[%s9284_s21 + $0x258] sm:$0xff]  ;;  %v548_v36 = vld [vmem:[%s9284_s21 + $0x2f0] sm:$0xff] }
  0xc7   : > { %v533_v22 = vld [vmem:[%s9284_s21 + $0x278] sm:$0xff] }
  0xc8   : > { %1329 = vmatpush1.bf16.msra.mxu0 %v7958_v44  ;;  %1402 = vmatpush1.bf16.msra.mxu1 %v7960_v45  ;;  %v7901_v44 = vcombine.high %v489_v39, %v493_v40  ;;  %v496_v45 = vld [vmem:[%s9284_s21 + $0x150] sm:$0xff]  ;;  %v537_v29 = vld [vmem:[%s9284_s21 + $0x298] sm:$0xff]  ;;  %v7946_v40 = vcombine.low %v536_v27, %v540_v28 }
  0xc9   : > { %1330 = vmatprep.subr.bf16.mxu0 %v7967_v46  ;;  %1403 = vmatprep.subr.bf16.mxu1 %v7969_v47  ;;  %v500_v46 = vld [vmem:[%s9284_s21 + $0x170] sm:$0xff]  ;;  %v497_v47 = vld [vmem:[%s9284_s21 + $0x158] sm:$0xff] }
  0xca   : > { %v7906_v60 = vcombine.low %v496_v45, %v500_v46  ;;  %v541_v30 = vld [vmem:[%s9284_s21 + $0x2b8] sm:$0xff] }
  0xcb   : > { %v545_v37 = vld [vmem:[%s9284_s21 + $0x2d8] sm:$0xff] }
  0xcc   : > { %1331 = vmatpush1.bf16.msra.mxu0 %v7966_v52  ;;  %1404 = vmatpush1.bf16.msra.mxu1 %v7968_v53  ;;  %v7907_v52 = vcombine.high %v496_v45, %v500_v46  ;;  %v7909_v53 = vcombine.high %v497_v47, %v501_v48  ;;  %v549_v39 = vld [vmem:[%s9284_s21 + $0x2f8] sm:$0xff]  ;;  %v556_v45 = vld [vmem:[%s9284_s21 + $0x330] sm:$0xff] }
  0xcd   : > { %1332 = vmatprep.subr.bf16.mxu0 %v7975_v54  ;;  %1405 = vmatprep.subr.bf16.mxu1 %v7977_v55  ;;  %v504_v54 = vld [vmem:[%s9284_s21 + $0x190] sm:$0xff]  ;;  %v553_v46 = vld [vmem:[%s9284_s21 + $0x318] sm:$0xff] }
  0xce   : > { %v508_v55 = vld [vmem:[%s9284_s21 + $0x1b0] sm:$0xff] }
  0xd0   : > { %1333 = vmatpush1.bf16.msra.mxu0 %v7974_v61  ;;  %1406 = vmatpush1.bf16.msra.mxu1 %v7976_v62  ;;  %v7908_v61 = vcombine.low %v497_v47, %v501_v48  ;;  %v7915_v62 = vcombine.high %v504_v54, %v508_v55  ;;  %v557_v47 = vld [vmem:[%s9284_s21 + $0x338] sm:$0xff] }
  0xd1   : > { %1334 = vmatprep.subr.bf16.mxu0 %v7983_v63  ;;  %1407 = vmatprep.subr.bf16.mxu1 %v7985_v0  ;;  %v7917_v63 = vcombine.high %v505_v58, %v509_v59  ;;  %v512_v0 = vld [vmem:[%s9284_s21 + $0x1d0] sm:$0xff] }
  0xd4   : > { %1335 = vmatpush1.bf16.msra.mxu0 %v7982_v5  ;;  %1408 = vmatpush1.bf16.msra.mxu1 %v7984_v6  ;;  %v7914_v5 = vcombine.low %v504_v54, %v508_v55  ;;  %v7916_v6 = vcombine.low %v505_v58, %v509_v59  ;;  %v564_v54 = vld [vmem:[%s9284_s21 + $0x370] sm:$0xff]  ;;  %v561_v55 = vld [vmem:[%s9284_s21 + $0x358] sm:$0xff] }
  0xd5   : > { %1450 = vmatprep.subr.bf16.mxu0 %v7867_v7  ;;  %1523 = vmatprep.subr.bf16.mxu1 %v7869_v8  ;;  %v7923_v7 = vcombine.high %v512_v0, %v516_v1  ;;  %v7925_v8 = vcombine.high %v513_v2, %v517_v3  ;;  %v565_v58 = vld [vmem:[%s9284_s21 + $0x378] sm:$0xff] }
  0xd7   : > { %1337 = vmatmul.mubr.bf16.vlgmr.msra.gmra.mrb[0].mxu0 %v9397_v11  ;;  %1410 = vmatmul.mubr.bf16.vlgmr.msra.gmra.mrb[0].mxu1 %v9397_v11 }
  0xd8   : > { %1451 = vmatpush1.bf16.msra.mxu0 %v7866_v14  ;;  %1524 = vmatpush1.bf16.msra.mxu1 %v7868_v15  ;;  %v7922_v14 = vcombine.low %v512_v0, %v516_v1  ;;  %v7924_v15 = vcombine.low %v513_v2, %v517_v3  ;;  %v572_v0 = vld [vmem:[%s9284_s21 + $0x3b0] sm:$0xff]  ;;  %v569_v1 = vld [vmem:[%s9284_s21 + $0x398] sm:$0xff] }
  0xd9   : > { %1452 = vmatprep.subr.bf16.mxu0 %v7875_v16  ;;  %1525 = vmatprep.subr.bf16.mxu1 %v7877_v17  ;;  %v7931_v16 = vcombine.high %v520_v9, %v524_v10  ;;  %v7933_v17 = vcombine.high %v521_v12, %v525_v13  ;;  %v573_v2 = vld [vmem:[%s9284_s21 + $0x3b8] sm:$0xff] }
  0xda   : > { %1346 = vmatprep.mubr.bf16.mxu0 %v9406_v20  ;;  %1419 = vmatprep.mubr.bf16.mxu1 %v9406_v20 }
  0xdc   : > { %1453 = vmatpush1.bf16.msra.mxu0 %v7874_v23  ;;  %1526 = vmatpush1.bf16.msra.mxu1 %v7876_v24  ;;  %v7930_v23 = vcombine.low %v520_v9, %v524_v10  ;;  %v7932_v24 = vcombine.low %v521_v12, %v525_v13  ;;  %v580_v9 = vld [vmem:[%s9284_s21 + $0x3f0] sm:$0xff]  ;;  %v577_v10 = vld [vmem:[%s9284_s21 + $0x3d8] sm:$0xff] }
  0xdd   : > { %1454 = vmatprep.subr.bf16.mxu0 %v7883_v25  ;;  %1527 = vmatprep.subr.bf16.mxu1 %v7885_v26  ;;  %v7939_v25 = vcombine.high %v528_v18, %v532_v19  ;;  %v7941_v26 = vcombine.high %v529_v21, %v533_v22  ;;  %v581_v12 = vld [vmem:[%s9284_s21 + $0x3f8] sm:$0xff] }
  0xdf   : > { %1347 = vmatmul.mubr.bf16.gmra.mrb[4].mxu0 %v9421_v31  ;;  %1420 = vmatmul.mubr.bf16.gmra.mrb[4].mxu1 %v9421_v31 }
  0xe0   : > { %1455 = vmatpush1.bf16.msra.mxu0 %v7882_v32  ;;  %1528 = vmatpush1.bf16.msra.mxu1 %v7884_v33  ;;  %v7938_v32 = vcombine.low %v528_v18, %v532_v19  ;;  %v7947_v33 = vcombine.high %v536_v27, %v540_v28  ;;  %v7988_v18 = vcombine.low %v577_v10, %v581_v12  ;;  %v9521_v19 = vld [vmem:[%s9297_s16] sm:$0xff] }
  0xe1   : > { %1456 = vmatprep.subr.bf16.mxu0 %v7891_v34  ;;  %1529 = vmatprep.subr.bf16.mxu1 %v7893_v35  ;;  %v7949_v34 = vcombine.high %v537_v29, %v541_v30  ;;  %v544_v35 = vld [vmem:[%s9284_s21 + $0x2d0] sm:$0xff] }
  0xe2   : > { %1356 = vmatprep.mubr.bf16.mxu0 %v9428_v38  ;;  %1429 = vmatprep.mubr.bf16.mxu1 %v9428_v38  ;;  %v7954_v48 = vcombine.low %v544_v35, %v548_v36 }
  0xe4   : > { %1457 = vmatpush1.bf16.msra.mxu0 %v7890_v41  ;;  %1530 = vmatpush1.bf16.msra.mxu1 %v7892_v42  ;;  %v7948_v41 = vcombine.low %v537_v29, %v541_v30  ;;  %v7955_v42 = vcombine.high %v544_v35, %v548_v36 }
  0xe5   : > { %1458 = vmatprep.subr.bf16.mxu0 %v7899_v43  ;;  %1531 = vmatprep.subr.bf16.mxu1 %v7901_v44  ;;  %v7957_v43 = vcombine.high %v545_v37, %v549_v39  ;;  %v552_v44 = vld [vmem:[%s9284_s21 + $0x310] sm:$0xff] }
  0xe6   : > { %v7962_v59 = vcombine.low %v552_v44, %v556_v45 }
  0xe7   : > { %1357 = vmatmul.mubr.bf16.gmra.mrb[8].mxu0 %v9443_v49  ;;  %1430 = vmatmul.mubr.bf16.gmra.mrb[8].mxu1 %v9443_v49 }
  0xe8   : > { %1459 = vmatpush1.bf16.msra.mxu0 %v7898_v50  ;;  %1532 = vmatpush1.bf16.msra.mxu1 %v7900_v51  ;;  %v7956_v50 = vcombine.low %v545_v37, %v549_v39  ;;  %v7963_v51 = vcombine.high %v552_v44, %v556_v45 }
  0xe9   : > { %1460 = vmatprep.subr.bf16.mxu0 %v7907_v52  ;;  %1533 = vmatprep.subr.bf16.mxu1 %v7909_v53  ;;  %v7965_v52 = vcombine.high %v553_v46, %v557_v47  ;;  %v560_v53 = vld [vmem:[%s9284_s21 + $0x350] sm:$0xff] }
  0xea   : > { %1366 = vmatprep.mubr.bf16.mxu0 %v9450_v56  ;;  %1439 = vmatprep.mubr.bf16.mxu1 %v9450_v56  ;;  %v7970_v3 = vcombine.low %v560_v53, %v564_v54 }
  0xec   : > { %1461 = vmatpush1.bf16.msra.mxu0 %v7906_v60  ;;  %1534 = vmatpush1.bf16.msra.mxu1 %v7908_v61  ;;  %v7964_v60 = vcombine.low %v553_v46, %v557_v47  ;;  %v7971_v61 = vcombine.high %v560_v53, %v564_v54 }
  0xed   : > { %1462 = vmatprep.subr.bf16.mxu0 %v7915_v62  ;;  %1535 = vmatprep.subr.bf16.mxu1 %v7917_v63  ;;  %v7973_v62 = vcombine.high %v561_v55, %v565_v58  ;;  %v568_v63 = vld [vmem:[%s9284_s21 + $0x390] sm:$0xff] }
  0xee   : > { %v7978_v13 = vcombine.low %v568_v63, %v572_v0 }
  0xef   : > { %1367 = vmatmul.mubr.bf16.gmra.mrb[12].mxu0 %v9465_v4  ;;  %1440 = vmatmul.mubr.bf16.gmra.mrb[12].mxu1 %v9465_v4 }
  0xf0   : > { %1463 = vmatpush1.bf16.msra.mxu0 %v7914_v5  ;;  %1536 = vmatpush1.bf16.msra.mxu1 %v7916_v6  ;;  %v7972_v5 = vcombine.low %v561_v55, %v565_v58  ;;  %v7979_v6 = vcombine.high %v568_v63, %v572_v0 }
  0xf1   : > { %1464 = vmatprep.subr.bf16.mxu0 %v7923_v7  ;;  %1537 = vmatprep.subr.bf16.mxu1 %v7925_v8  ;;  %v7981_v7 = vcombine.high %v569_v1, %v573_v2  ;;  %v576_v8 = vld [vmem:[%s9284_s21 + $0x3d0] sm:$0xff] }
  0xf2   : > { %1482 = vmatprep.mubr.bf16.mxu0 %v9350_v57  ;;  %1555 = vmatprep.mubr.bf16.mxu1 %v9350_v57  ;;  %v7940_v57 = vcombine.low %v529_v21, %v533_v22 }
  0xf4   : > { %1465 = vmatpush1.bf16.msra.mxu0 %v7922_v14  ;;  %1538 = vmatpush1.bf16.msra.mxu1 %v7924_v15  ;;  %v7980_v14 = vcombine.low %v569_v1, %v573_v2  ;;  %v7987_v15 = vcombine.high %v576_v8, %v580_v9 }
  0xf5   : > { %1466 = vmatprep.subr.bf16.mxu0 %v7931_v16  ;;  %1539 = vmatprep.subr.bf16.mxu1 %v7933_v17  ;;  %v7989_v16 = vcombine.high %v577_v10, %v581_v12  ;;  %v7986_v17 = vcombine.low %v576_v8, %v580_v9 }
  0xf8   : > { %1467 = vmatpush1.bf16.msra.mxu0 %v7930_v23  ;;  %1540 = vmatpush1.bf16.msra.mxu1 %v7932_v24 }
  0xf9   : > { %1468 = vmatprep.subr.bf16.mxu0 %v7939_v25  ;;  %1541 = vmatprep.subr.bf16.mxu1 %v7941_v26 }
  0xfc   : > { %1469 = vmatpush1.bf16.msra.mxu0 %v7938_v32  ;;  %1542 = vmatpush1.bf16.msra.mxu1 %v7940_v57 }
  0xfd   : > { %1470 = vmatprep.subr.bf16.mxu0 %v7947_v33  ;;  %1543 = vmatprep.subr.bf16.mxu1 %v7949_v34 }
 0x100   : > { %1471 = vmatpush1.bf16.msra.mxu0 %v7946_v40  ;;  %1544 = vmatpush1.bf16.msra.mxu1 %v7948_v41 }
 0x101   : > { %1472 = vmatprep.subr.bf16.mxu0 %v7955_v42  ;;  %1545 = vmatprep.subr.bf16.mxu1 %v7957_v43 }
 0x104   : > { %1473 = vmatpush1.bf16.msra.mxu0 %v7954_v48  ;;  %1546 = vmatpush1.bf16.msra.mxu1 %v7956_v50 }
 0x105   : > { %1474 = vmatprep.subr.bf16.mxu0 %v7963_v51  ;;  %1547 = vmatprep.subr.bf16.mxu1 %v7965_v52 }
 0x108   : > { %1475 = vmatpush1.bf16.msra.mxu0 %v7962_v59  ;;  %1548 = vmatpush1.bf16.msra.mxu1 %v7964_v60 }
 0x109   : > { %1476 = vmatprep.subr.bf16.mxu0 %v7971_v61  ;;  %1549 = vmatprep.subr.bf16.mxu1 %v7973_v62 }
 0x10c   : > { %1477 = vmatpush1.bf16.msra.mxu0 %v7970_v3  ;;  %1550 = vmatpush1.bf16.msra.mxu1 %v7972_v5 }
 0x10d   : > { %1478 = vmatprep.subr.bf16.mxu0 %v7979_v6  ;;  %1551 = vmatprep.subr.bf16.mxu1 %v7981_v7 }
 0x110   : > { %1479 = vmatpush1.bf16.msra.mxu0 %v7978_v13  ;;  %1552 = vmatpush1.bf16.msra.mxu1 %v7980_v14 }
 0x111   : > { %1480 = vmatprep.subr.bf16.mxu0 %v7987_v15  ;;  %1553 = vmatprep.subr.bf16.mxu1 %v7989_v16 }
 0x114   : > { %1481 = vmatpush1.bf16.msra.mxu0 %v7986_v17  ;;  %1554 = vmatpush1.bf16.msra.mxu1 %v7988_v18 }
 0x117   : > { %1483 = vmatmul.mubr.bf16.vlgmr.msra.gmra.mrb[16].mxu0 %v9397_v11  ;;  %1556 = vmatmul.mubr.bf16.vlgmr.msra.gmra.mrb[16].mxu1 %v9397_v11  ;;  %v584_v11 = vlaneseq }
 0x118   : > { %1492 = vmatprep.mubr.bf16.mxu0 %v9406_v20  ;;  %1565 = vmatprep.mubr.bf16.mxu1 %v9406_v20 }
 0x119   : > { %v9517_v20 = vshrl.u32 %v584_v11, 7 }
 0x11b   : > { %v590_v21 = vsub.s32 1, %v9517_v20 }
 0x11f   : > { %1493 = vmatmul.mubr.bf16.gmra.mrb[20].mxu0 %v9421_v31  ;;  %1566 = vmatmul.mubr.bf16.gmra.mrb[20].mxu1 %v9421_v31  ;;  %v586_v31 = vsub.s32 0, %v9517_v20 }
 0x120   : > { %1502 = vmatprep.mubr.bf16.mxu0 %v9428_v38  ;;  %1575 = vmatprep.mubr.bf16.mxu1 %v9428_v38  ;;  %v594_v38 = vsub.s32 2, %v9517_v20 }
 0x121   : > { %v9527_v22 = vrot.slane %v9521_v19, %v586_v31 }
 0x127   : > { %1503 = vmatmul.mubr.bf16.gmra.mrb[24].mxu0 %v9443_v49  ;;  %1576 = vmatmul.mubr.bf16.gmra.mrb[24].mxu1 %v9443_v49  ;;  %v598_v49 = vsub.s32 3, %v9517_v20 }
 0x128   : > { %1512 = vmatprep.mubr.bf16.mxu0 %v9450_v56  ;;  %1585 = vmatprep.mubr.bf16.mxu1 %v9450_v56  ;;  %v9530_v56 = vrot.slane %v9521_v19, %v594_v38 }
 0x129   : > { %v9536_v23 = vrot.slane %v9521_v19, %v598_v49 }
 0x12f   : > { %1513 = vmatmul.mubr.bf16.gmra.mrb[28].mxu0 %v9465_v4  ;;  %1586 = vmatmul.mubr.bf16.gmra.mrb[28].mxu1 %v9465_v4  ;;  %v9533_v4 = vrot.slane %v9521_v19, %v590_v21 }
 0x1aa   : > { %v1338_v24 = vpop.f32.mrb[0].mxu0  ;;  %v1411_v26 = vpop.f32.mrb[0].mxu1 }
 0x1ab   : > { %v1339_v25 = vadd.f32 %v1338_v24, %v9527_v22  ;;  %v1340_v27 = vpop.f32.mrb[1].mxu0  ;;  %v1412_v28 = vadd.f32 %v1411_v26, %v9530_v56  ;;  %v1413_v30 = vpop.f32.mrb[1].mxu1 }
 0x1ac   : > { %v1341_v29 = vadd.f32 %v1340_v27, %v9533_v4  ;;  %v1342_v32 = vpop.f32.mrb[2].mxu0  ;;  %v1414_v57 = vadd.f32 %v1413_v30, %v9536_v23  ;;  %v1415_v34 = vpop.f32.mrb[2].mxu1  ;;  %v602_v30 = vsub.s32 4, %v9517_v20 }
 0x1ad   : > { %1596 = vst [vmem:[#allocation2] sm:$0xff] %v1339_v25  ;;  %v1343_v33 = vadd.f32 %v1342_v32, %v9527_v22  ;;  %v1344_v35 = vpop.f32.mrb[3].mxu0  ;;  %1598 = vst [vmem:[#allocation2 + $0x10] sm:$0xff] %v1412_v28  ;;  %v1416_v36 = vadd.f32 %v1415_v34, %v9530_v56  ;;  %v1417_v39 = vpop.f32.mrb[3].mxu1  ;;  %v606_v32 = vsub.s32 5, %v9517_v20 }
 0x1ae   : > { %1597 = vst [vmem:[#allocation2 + $0x8] sm:$0xff] %v1341_v29  ;;  %v1345_v37 = vadd.f32 %v1344_v35, %v9533_v4  ;;  %1599 = vst [vmem:[#allocation2 + $0x18] sm:$0xff] %v1414_v57  ;;  %v1418_v40 = vadd.f32 %v1417_v39, %v9536_v23  ;;  %v614_v57 = vsub.s32 7, %v9517_v20 }
 0x1af   : > { %1604 = vst [vmem:[#allocation2 + $0x40] sm:$0xff] %v1343_v33  ;;  %1606 = vst [vmem:[#allocation2 + $0x50] sm:$0xff] %v1416_v36  ;;  %v9581_v33 = vrot.slane %v9521_v19, %v606_v32 }
 0x1b0   : > { %1605 = vst [vmem:[#allocation2 + $0x48] sm:$0xff] %v1345_v37  ;;  %1607 = vst [vmem:[#allocation2 + $0x58] sm:$0xff] %v1418_v40 }
 0x1b2   : > { %v1348_v41 = vpop.f32.mrb[4].mxu0  ;;  %v1421_v43 = vpop.f32.mrb[4].mxu1 }
 0x1b3   : > { %v1349_v42 = vadd.f32 %v1348_v41, %v9527_v22  ;;  %v1350_v44 = vpop.f32.mrb[5].mxu0  ;;  %v1422_v45 = vadd.f32 %v1421_v43, %v9530_v56  ;;  %v1423_v47 = vpop.f32.mrb[5].mxu1 }
 0x1b4   : > { %v1351_v46 = vadd.f32 %v1350_v44, %v9533_v4  ;;  %v1352_v48 = vpop.f32.mrb[6].mxu0  ;;  %v1424_v50 = vadd.f32 %v1423_v47, %v9536_v23  ;;  %v1425_v52 = vpop.f32.mrb[6].mxu1 }
 0x1b5   : > { %1612 = vst [vmem:[#allocation2 + $0x80] sm:$0xff] %v1349_v42  ;;  %v1353_v51 = vadd.f32 %v1352_v48, %v9527_v22  ;;  %v1354_v53 = vpop.f32.mrb[7].mxu0  ;;  %1614 = vst [vmem:[#allocation2 + $0x90] sm:$0xff] %v1422_v45  ;;  %v1426_v54 = vadd.f32 %v1425_v52, %v9530_v56  ;;  %v1427_v58 = vpop.f32.mrb[7].mxu1 }
 0x1b6   : > { %1613 = vst [vmem:[#allocation2 + $0x88] sm:$0xff] %v1351_v46  ;;  %v1355_v55 = vadd.f32 %v1354_v53, %v9533_v4  ;;  %1615 = vst [vmem:[#allocation2 + $0x98] sm:$0xff] %v1424_v50  ;;  %v1428_v59 = vadd.f32 %v1427_v58, %v9536_v23 }
 0x1b7   : > { %1620 = vst [vmem:[#allocation2 + $0xc0] sm:$0xff] %v1353_v51  ;;  %1622 = vst [vmem:[#allocation2 + $0xd0] sm:$0xff] %v1426_v54 }
 0x1b8   : > { %1621 = vst [vmem:[#allocation2 + $0xc8] sm:$0xff] %v1355_v55  ;;  %1623 = vst [vmem:[#allocation2 + $0xd8] sm:$0xff] %v1428_v59 }
 0x1ba   : > { %v1358_v60 = vpop.f32.mrb[8].mxu0  ;;  %v1431_v62 = vpop.f32.mrb[8].mxu1 }
 0x1bb   : > { %v1359_v61 = vadd.f32 %v1358_v60, %v9527_v22  ;;  %v1360_v63 = vpop.f32.mrb[9].mxu0  ;;  %v1432_v0 = vadd.f32 %v1431_v62, %v9530_v56  ;;  %v1433_v2 = vpop.f32.mrb[9].mxu1 }
 0x1bc   : > { %v1361_v1 = vadd.f32 %v1360_v63, %v9533_v4  ;;  %v1362_v3 = vpop.f32.mrb[10].mxu0  ;;  %v1434_v5 = vadd.f32 %v1433_v2, %v9536_v23  ;;  %v1435_v7 = vpop.f32.mrb[10].mxu1 }
 0x1bd   : > { %1628 = vst [vmem:[#allocation2 + $0x100] sm:$0xff] %v1359_v61  ;;  %v1363_v6 = vadd.f32 %v1362_v3, %v9527_v22  ;;  %v1364_v8 = vpop.f32.mrb[11].mxu0  ;;  %1630 = vst [vmem:[#allocation2 + $0x110] sm:$0xff] %v1432_v0  ;;  %v1436_v9 = vadd.f32 %v1435_v7, %v9530_v56  ;;  %v1437_v12 = vpop.f32.mrb[11].mxu1 }
 0x1be   : > { %1629 = vst [vmem:[#allocation2 + $0x108] sm:$0xff] %v1361_v1  ;;  %v1365_v10 = vadd.f32 %v1364_v8, %v9533_v4  ;;  %1631 = vst [vmem:[#allocation2 + $0x118] sm:$0xff] %v1434_v5  ;;  %v1438_v13 = vadd.f32 %v1437_v12, %v9536_v23 }
 0x1bf   : > { %1636 = vst [vmem:[#allocation2 + $0x140] sm:$0xff] %v1363_v6  ;;  %1638 = vst [vmem:[#allocation2 + $0x150] sm:$0xff] %v1436_v9 }
 0x1c0   : > { %1637 = vst [vmem:[#allocation2 + $0x148] sm:$0xff] %v1365_v10  ;;  %1639 = vst [vmem:[#allocation2 + $0x158] sm:$0xff] %v1438_v13 }
 0x1c2   : > { %v1368_v14 = vpop.f32.mrb[12].mxu0  ;;  %v1441_v16 = vpop.f32.mrb[12].mxu1 }
 0x1c3   : > { %v1369_v15 = vadd.f32 %v1368_v14, %v9527_v22  ;;  %v1370_v17 = vpop.f32.mrb[13].mxu0  ;;  %v1442_v18 = vadd.f32 %v1441_v16, %v9530_v56  ;;  %v1443_v31 = vpop.f32.mrb[13].mxu1 }
 0x1c4   : > { %v1371_v11 = vadd.f32 %v1370_v17, %v9533_v4  ;;  %v1372_v38 = vpop.f32.mrb[14].mxu0  ;;  %v1444_v21 = vadd.f32 %v1443_v31, %v9536_v23  ;;  %v1445_v24 = vpop.f32.mrb[14].mxu1 }
 0x1c5   : > { %1644 = vst [vmem:[#allocation2 + $0x180] sm:$0xff] %v1369_v15  ;;  %v1373_v49 = vadd.f32 %v1372_v38, %v9527_v22  ;;  %v1374_v25 = vpop.f32.mrb[15].mxu0  ;;  %1646 = vst [vmem:[#allocation2 + $0x190] sm:$0xff] %v1442_v18  ;;  %v1446_v26 = vadd.f32 %v1445_v24, %v9530_v56  ;;  %v1447_v28 = vpop.f32.mrb[15].mxu1  ;;  %v610_v22 = vsub.s32 6, %v9517_v20  ;;  %v9575_v56 = vrot.slane %v9521_v19, %v602_v30 }
 0x1c6   : > { %1645 = vst [vmem:[#allocation2 + $0x188] sm:$0xff] %v1371_v11  ;;  %v1375_v27 = vadd.f32 %v1374_v25, %v9533_v4  ;;  %1647 = vst [vmem:[#allocation2 + $0x198] sm:$0xff] %v1444_v21  ;;  %v1448_v29 = vadd.f32 %v1447_v28, %v9536_v23  ;;  %v9584_v23 = vrot.slane %v9521_v19, %v614_v57 }
 0x1c7   : > { %1652 = vst [vmem:[#allocation2 + $0x1c0] sm:$0xff] %v1373_v49  ;;  %1654 = vst [vmem:[#allocation2 + $0x1d0] sm:$0xff] %v1446_v26  ;;  %v9578_v4 = vrot.slane %v9521_v19, %v610_v22 }
 0x1c8   : > { %1653 = vst [vmem:[#allocation2 + $0x1c8] sm:$0xff] %v1375_v27  ;;  %1655 = vst [vmem:[#allocation2 + $0x1d8] sm:$0xff] %v1448_v29 }
 0x1ea   : > { %v1484_v34 = vpop.f32.mrb[16].mxu0  ;;  %v1557_v36 = vpop.f32.mrb[16].mxu1 }
 0x1eb   : > { %v1485_v35 = vadd.f32 %v1484_v34, %v9575_v56  ;;  %v1486_v37 = vpop.f32.mrb[17].mxu0  ;;  %v1558_v39 = vadd.f32 %v1557_v36, %v9578_v4  ;;  %v1559_v40 = vpop.f32.mrb[17].mxu1 }
 0x1ec   : > { %v1487_v20 = vadd.f32 %v1486_v37, %v9581_v33  ;;  %v1488_v41 = vpop.f32.mrb[18].mxu0  ;;  %v1560_v42 = vadd.f32 %v1559_v40, %v9584_v23  ;;  %v1561_v44 = vpop.f32.mrb[18].mxu1 }
 0x1ed   : > { %1600 = vst [vmem:[#allocation2 + $0x20] sm:$0xff] %v1485_v35  ;;  %v1489_v43 = vadd.f32 %v1488_v41, %v9575_v56  ;;  %v1490_v45 = vpop.f32.mrb[19].mxu0  ;;  %1602 = vst [vmem:[#allocation2 + $0x30] sm:$0xff] %v1558_v39  ;;  %v1562_v19 = vadd.f32 %v1561_v44, %v9578_v4  ;;  %v1563_v47 = vpop.f32.mrb[19].mxu1 }
 0x1ee   : > { %1601 = vst [vmem:[#allocation2 + $0x28] sm:$0xff] %v1487_v20  ;;  %v1491_v46 = vadd.f32 %v1490_v45, %v9581_v33  ;;  %1603 = vst [vmem:[#allocation2 + $0x38] sm:$0xff] %v1560_v42  ;;  %v1564_v48 = vadd.f32 %v1563_v47, %v9584_v23 }
 0x1ef   : > { %1608 = vst [vmem:[#allocation2 + $0x60] sm:$0xff] %v1489_v43  ;;  %1610 = vst [vmem:[#allocation2 + $0x70] sm:$0xff] %v1562_v19 }
 0x1f0   : > { %1609 = vst [vmem:[#allocation2 + $0x68] sm:$0xff] %v1491_v46  ;;  %1611 = vst [vmem:[#allocation2 + $0x78] sm:$0xff] %v1564_v48 }
 0x1f2   : > { %v1494_v50 = vpop.f32.mrb[20].mxu0  ;;  %v1567_v52 = vpop.f32.mrb[20].mxu1 }
 0x1f3   : > { %v1495_v51 = vadd.f32 %v1494_v50, %v9575_v56  ;;  %v1496_v53 = vpop.f32.mrb[21].mxu0  ;;  %v1568_v54 = vadd.f32 %v1567_v52, %v9578_v4  ;;  %v1569_v58 = vpop.f32.mrb[21].mxu1 }
 0x1f4   : > { %v1497_v55 = vadd.f32 %v1496_v53, %v9581_v33  ;;  %v1498_v59 = vpop.f32.mrb[22].mxu0  ;;  %v1570_v60 = vadd.f32 %v1569_v58, %v9584_v23  ;;  %v1571_v62 = vpop.f32.mrb[22].mxu1 }
 0x1f5   : > { %1616 = vst [vmem:[#allocation2 + $0xa0] sm:$0xff] %v1495_v51  ;;  %v1499_v61 = vadd.f32 %v1498_v59, %v9575_v56  ;;  %v1500_v63 = vpop.f32.mrb[23].mxu0  ;;  %1618 = vst [vmem:[#allocation2 + $0xb0] sm:$0xff] %v1568_v54  ;;  %v1572_v0 = vadd.f32 %v1571_v62, %v9578_v4  ;;  %v1573_v2 = vpop.f32.mrb[23].mxu1 }
 0x1f6   : > { %1617 = vst [vmem:[#allocation2 + $0xa8] sm:$0xff] %v1497_v55  ;;  %v1501_v1 = vadd.f32 %v1500_v63, %v9581_v33  ;;  %1619 = vst [vmem:[#allocation2 + $0xb8] sm:$0xff] %v1570_v60  ;;  %v1574_v3 = vadd.f32 %v1573_v2, %v9584_v23 }
 0x1f7   : > { %1624 = vst [vmem:[#allocation2 + $0xe0] sm:$0xff] %v1499_v61  ;;  %1626 = vst [vmem:[#allocation2 + $0xf0] sm:$0xff] %v1572_v0 }
 0x1f8   : > { %1625 = vst [vmem:[#allocation2 + $0xe8] sm:$0xff] %v1501_v1  ;;  %1627 = vst [vmem:[#allocation2 + $0xf8] sm:$0xff] %v1574_v3 }
 0x1fa   : > { %v1504_v5 = vpop.f32.mrb[24].mxu0  ;;  %v1577_v7 = vpop.f32.mrb[24].mxu1 }
 0x1fb   : > { %v1505_v6 = vadd.f32 %v1504_v5, %v9575_v56  ;;  %v1506_v8 = vpop.f32.mrb[25].mxu0  ;;  %v1578_v9 = vadd.f32 %v1577_v7, %v9578_v4  ;;  %v1579_v12 = vpop.f32.mrb[25].mxu1 }
 0x1fc   : > { %v1507_v10 = vadd.f32 %v1506_v8, %v9581_v33  ;;  %v1508_v13 = vpop.f32.mrb[26].mxu0  ;;  %v1580_v14 = vadd.f32 %v1579_v12, %v9584_v23  ;;  %v1581_v16 = vpop.f32.mrb[26].mxu1 }
 0x1fd   : > { %1632 = vst [vmem:[#allocation2 + $0x120] sm:$0xff] %v1505_v6  ;;  %v1509_v15 = vadd.f32 %v1508_v13, %v9575_v56  ;;  %v1510_v17 = vpop.f32.mrb[27].mxu0  ;;  %1634 = vst [vmem:[#allocation2 + $0x130] sm:$0xff] %v1578_v9  ;;  %v1582_v18 = vadd.f32 %v1581_v16, %v9578_v4  ;;  %v1583_v31 = vpop.f32.mrb[27].mxu1 }
 0x1fe   : > { %1633 = vst [vmem:[#allocation2 + $0x128] sm:$0xff] %v1507_v10  ;;  %v1511_v11 = vadd.f32 %v1510_v17, %v9581_v33  ;;  %1635 = vst [vmem:[#allocation2 + $0x138] sm:$0xff] %v1580_v14  ;;  %v1584_v38 = vadd.f32 %v1583_v31, %v9584_v23 }
 0x1ff   : > { %1640 = vst [vmem:[#allocation2 + $0x160] sm:$0xff] %v1509_v15  ;;  %1642 = vst [vmem:[#allocation2 + $0x170] sm:$0xff] %v1582_v18 }
 0x200   : > { %1641 = vst [vmem:[#allocation2 + $0x168] sm:$0xff] %v1511_v11  ;;  %1643 = vst [vmem:[#allocation2 + $0x178] sm:$0xff] %v1584_v38 }
 0x202   : > { %v1514_v21 = vpop.f32.mrb[28].mxu0  ;;  %v1587_v24 = vpop.f32.mrb[28].mxu1 }
 0x203   : > { %v1515_v49 = vadd.f32 %v1514_v21, %v9575_v56  ;;  %v1516_v25 = vpop.f32.mrb[29].mxu0  ;;  %v1588_v26 = vadd.f32 %v1587_v24, %v9578_v4  ;;  %v1589_v28 = vpop.f32.mrb[29].mxu1 }
 0x204   : > { %v1517_v27 = vadd.f32 %v1516_v25, %v9581_v33  ;;  %v1518_v29 = vpop.f32.mrb[30].mxu0  ;;  %v1590_v30 = vadd.f32 %v1589_v28, %v9584_v23  ;;  %v1591_v32 = vpop.f32.mrb[30].mxu1 }
 0x205   : > { %1648 = vst [vmem:[#allocation2 + $0x1a0] sm:$0xff] %v1515_v49  ;;  %v1519_v22 = vadd.f32 %v1518_v29, %v9575_v56  ;;  %v1520_v57 = vpop.f32.mrb[31].mxu0  ;;  %1650 = vst [vmem:[#allocation2 + $0x1b0] sm:$0xff] %v1588_v26  ;;  %v1592_v34 = vadd.f32 %v1591_v32, %v9578_v4  ;;  %v1593_v36 = vpop.f32.mrb[31].mxu1 }
 0x206   : > { %1649 = vst [vmem:[#allocation2 + $0x1a8] sm:$0xff] %v1517_v27  ;;  %v1521_v35 = vadd.f32 %v1520_v57, %v9581_v33  ;;  %1651 = vst [vmem:[#allocation2 + $0x1b8] sm:$0xff] %v1590_v30  ;;  %v1594_v37 = vadd.f32 %v1593_v36, %v9584_v23 }
 0x207   : > { %1656 = vst [vmem:[#allocation2 + $0x1e0] sm:$0xff] %v1519_v22  ;;  %1658 = vst [vmem:[#allocation2 + $0x1f0] sm:$0xff] %v1592_v34 }
 0x208   : > { %1657 = vst [vmem:[#allocation2 + $0x1e8] sm:$0xff] %v1521_v35  ;;  %1659 = vst [vmem:[#allocation2 + $0x1f8] sm:$0xff] %v1594_v37 }
 0x209 PF: > { %p11397_p4 = scmp.eq.s32.totalorder %s9176_s27, 0 }
 0x20a   : > { %v1688_v56 = vld [vmem:[%s9284_s21] sm:$0xff] (!%p11397_p4)  ;;  %v1689_v33 = vld [vmem:[%s9284_s21 + $0x8] sm:$0xff] (!%p11397_p4)  ;;  %v1667_v28 = vld [vmem:[#allocation3 + $0x18] sm:$0xff] (!%p11397_p4) }
 0x20b   : > { %1663 = sbr.rel (%p11397_p4) target bundleno = 896 (0x380), region = 76  ;;  %v1692_v4 = vld [vmem:[%s9284_s21 + $0x20] sm:$0xff] (!%p11397_p4)  ;;  %v1693_v39 = vld [vmem:[%s9284_s21 + $0x28] sm:$0xff] (!%p11397_p4) }
 0x20c   : > { %v7992_v23 = vcombine.high (!%p11397_p4), %v1688_v56, %v1692_v4  ;;  %v7991_v20 = vcombine.low (!%p11397_p4), %v1688_v56, %v1692_v4  ;;  %v1696_v40 = vld [vmem:[%s9284_s21 + $0x40] sm:$0xff] (!%p11397_p4)  ;;  %v7994_v42 = vcombine.high (!%p11397_p4), %v1689_v33, %v1693_v39  ;;  %v7993_v43 = vcombine.low (!%p11397_p4), %v1689_v33, %v1693_v39  ;;  %v1697_v45 = vld [vmem:[%s9284_s21 + $0x48] sm:$0xff] (!%p11397_p4) }
 0x20d   : > { %v1700_v41 = vld [vmem:[%s9284_s21 + $0x60] sm:$0xff] (!%p11397_p4)  ;;  %v1701_v19 = vld [vmem:[%s9284_s21 + $0x68] sm:$0xff] (!%p11397_p4) }
 0x20e   : > { %v8000_v44 = vcombine.high (!%p11397_p4), %v1696_v40, %v1700_v41  ;;  %v1704_v46 = vld [vmem:[%s9284_s21 + $0x80] sm:$0xff] (!%p11397_p4)  ;;  %2498 = vmatprep.subr.bf16.mxu0 (!%p11397_p4), %v7992_v23  ;;  %v8002_v47 = vcombine.high (!%p11397_p4), %v1697_v45, %v1701_v19  ;;  %v1705_v50 = vld [vmem:[%s9284_s21 + $0x88] sm:$0xff] (!%p11397_p4)  ;;  %2571 = vmatprep.subr.bf16.mxu1 (!%p11397_p4), %v7994_v42  ;;  %v7999_v52 = vcombine.low (!%p11397_p4), %v1696_v40, %v1700_v41 }
 0x20f   : > { %v1708_v48 = vld [vmem:[%s9284_s21 + $0xa0] sm:$0xff] (!%p11397_p4)  ;;  %v1709_v51 = vld [vmem:[%s9284_s21 + $0xa8] sm:$0xff] (!%p11397_p4)  ;;  %2499 = vmatpush1.bf16.msra.mxu0 (!%p11397_p4), %v7991_v20  ;;  %2572 = vmatpush1.bf16.msra.mxu1 (!%p11397_p4), %v7993_v43  ;;  %v8001_v53 = vcombine.low (!%p11397_p4), %v1697_v45, %v1701_v19 }
 0x210   : > { %2500 = vmatprep.subr.bf16.mxu0 (!%p11397_p4), %v8000_v44  ;;  %v8008_v54 = vcombine.high (!%p11397_p4), %v1704_v46, %v1708_v48  ;;  %2573 = vmatprep.subr.bf16.mxu1 (!%p11397_p4), %v8002_v47  ;;  %v8010_v55 = vcombine.high (!%p11397_p4), %v1705_v50, %v1709_v51  ;;  %v1712_v58 = vld [vmem:[%s9284_s21 + $0xc0] sm:$0xff] (!%p11397_p4)  ;;  %v1713_v60 = vld [vmem:[%s9284_s21 + $0xc8] sm:$0xff] (!%p11397_p4)  ;;  %v8007_v62 = vcombine.low (!%p11397_p4), %v1704_v46, %v1708_v48 }
 0x211   : > { %v1716_v59 = vld [vmem:[%s9284_s21 + $0xe0] sm:$0xff] (!%p11397_p4)  ;;  %v1717_v61 = vld [vmem:[%s9284_s21 + $0xe8] sm:$0xff] (!%p11397_p4)  ;;  %v8009_v63 = vcombine.low (!%p11397_p4), %v1705_v50, %v1709_v51 }
 0x212   : > { %v8016_v0 = vcombine.high %v1712_v58, %v1716_v59  ;;  %v8018_v1 = vcombine.high %v1713_v60, %v1717_v61  ;;  %v1720_v2 = vld [vmem:[%s9284_s21 + $0x100] sm:$0xff]  ;;  %v1721_v5 = vld [vmem:[%s9284_s21 + $0x108] sm:$0xff]  ;;  %v8015_v7 = vcombine.low %v1712_v58, %v1716_v59  ;;  %v8017_v8 = vcombine.low %v1713_v60, %v1717_v61 }
 0x213   : > { %2501 = vmatpush1.bf16.msra.mxu0 %v7999_v52  ;;  %2574 = vmatpush1.bf16.msra.mxu1 %v8001_v53  ;;  %v1724_v3 = vld [vmem:[%s9284_s21 + $0x120] sm:$0xff]  ;;  %v1725_v6 = vld [vmem:[%s9284_s21 + $0x128] sm:$0xff] }
 0x214   : > { %2502 = vmatprep.subr.bf16.mxu0 %v8008_v54  ;;  %2575 = vmatprep.subr.bf16.mxu1 %v8010_v55  ;;  %v8024_v9 = vcombine.high %v1720_v2, %v1724_v3  ;;  %v8026_v10 = vcombine.high %v1721_v5, %v1725_v6  ;;  %v1728_v12 = vld [vmem:[%s9284_s21 + $0x140] sm:$0xff]  ;;  %v1729_v14 = vld [vmem:[%s9284_s21 + $0x148] sm:$0xff]  ;;  %v8023_v16 = vcombine.low %v1720_v2, %v1724_v3 }
 0x215   : > { %v1732_v13 = vld [vmem:[%s9284_s21 + $0x160] sm:$0xff]  ;;  %v1733_v15 = vld [vmem:[%s9284_s21 + $0x168] sm:$0xff]  ;;  %v8025_v17 = vcombine.low %v1721_v5, %v1725_v6 }
 0x216   : > { %v8032_v18 = vcombine.high %v1728_v12, %v1732_v13  ;;  %v8034_v11 = vcombine.high %v1729_v14, %v1733_v15  ;;  %v1736_v31 = vld [vmem:[%s9284_s21 + $0x180] sm:$0xff]  ;;  %v1737_v21 = vld [vmem:[%s9284_s21 + $0x188] sm:$0xff]  ;;  %v8031_v24 = vcombine.low %v1728_v12, %v1732_v13  ;;  %v8033_v25 = vcombine.low %v1729_v14, %v1733_v15 }
 0x217   : > { %2503 = vmatpush1.bf16.msra.mxu0 %v8007_v62  ;;  %2576 = vmatpush1.bf16.msra.mxu1 %v8009_v63  ;;  %v1740_v38 = vld [vmem:[%s9284_s21 + $0x1a0] sm:$0xff]  ;;  %v1741_v49 = vld [vmem:[%s9284_s21 + $0x1a8] sm:$0xff] }
 0x218   : > { %2504 = vmatprep.subr.bf16.mxu0 %v8016_v0  ;;  %2577 = vmatprep.subr.bf16.mxu1 %v8018_v1  ;;  %v8040_v26 = vcombine.high %v1736_v31, %v1740_v38  ;;  %v1665_v27 = vld [vmem:[#allocation3 + $0x8] sm:$0xff]  ;;  %v8042_v29 = vcombine.high %v1737_v21, %v1741_v49  ;;  %v8039_v35 = vcombine.low %v1736_v31, %v1740_v38 }
 0x219   : > { %v1744_v30 = vld [vmem:[%s9284_s21 + $0x1c0] sm:$0xff]  ;;  %v9650_v32 = vpack.c.bf16 %v1667_v28, %v1665_v27  ;;  %v1745_v57 = vld [vmem:[%s9284_s21 + $0x1c8] sm:$0xff]  ;;  %v8041_v36 = vcombine.low %v1737_v21, %v1741_v49 }
 0x21a   : > { %v1748_v22 = vld [vmem:[%s9284_s21 + $0x1e0] sm:$0xff]  ;;  %v1749_v34 = vld [vmem:[%s9284_s21 + $0x1e8] sm:$0xff] }
 0x21b   : > { %2505 = vmatpush1.bf16.msra.mxu0 %v8015_v7  ;;  %2578 = vmatpush1.bf16.msra.mxu1 %v8017_v8  ;;  %v8048_v37 = vcombine.high %v1744_v30, %v1748_v22  ;;  %v8050_v56 = vcombine.high %v1745_v57, %v1749_v34  ;;  %v1752_v4 = vld [vmem:[%s9284_s21 + $0x200] sm:$0xff]  ;;  %v1753_v23 = vld [vmem:[%s9284_s21 + $0x208] sm:$0xff]  ;;  %v8047_v20 = vcombine.low %v1744_v30, %v1748_v22 }
 0x21c   : > { %2506 = vmatprep.subr.bf16.mxu0 %v8024_v9  ;;  %2579 = vmatprep.subr.bf16.mxu1 %v8026_v10  ;;  %v1756_v33 = vld [vmem:[%s9284_s21 + $0x220] sm:$0xff]  ;;  %v1757_v39 = vld [vmem:[%s9284_s21 + $0x228] sm:$0xff]  ;;  %v8049_v40 = vcombine.low %v1745_v57, %v1749_v34 }
 0x21d   : > { %2530 = vmatprep.mubr.bf16.mxu0 %v9650_v32  ;;  %2603 = vmatprep.mubr.bf16.mxu1 %v9650_v32  ;;  %v8056_v41 = vcombine.high %v1752_v4, %v1756_v33  ;;  %v8058_v42 = vcombine.high %v1753_v23, %v1757_v39  ;;  %v1760_v43 = vld [vmem:[%s9284_s21 + $0x240] sm:$0xff]  ;;  %v1761_v45 = vld [vmem:[%s9284_s21 + $0x248] sm:$0xff]  ;;  %v8055_v46 = vcombine.low %v1752_v4, %v1756_v33  ;;  %v1690_v33 = vld [vmem:[%s9284_s21 + $0x10] sm:$0xff] }
 0x21e   : > { %v1764_v44 = vld [vmem:[%s9284_s21 + $0x260] sm:$0xff]  ;;  %v1765_v19 = vld [vmem:[%s9284_s21 + $0x268] sm:$0xff]  ;;  %v8057_v47 = vcombine.low %v1753_v23, %v1757_v39  ;;  %v1694_v23 = vld [vmem:[%s9284_s21 + $0x30] sm:$0xff] }
 0x21f   : > { %2507 = vmatpush1.bf16.msra.mxu0 %v8023_v16  ;;  %2580 = vmatpush1.bf16.msra.mxu1 %v8025_v17  ;;  %v8064_v48 = vcombine.high %v1760_v43, %v1764_v44  ;;  %v8066_v50 = vcombine.high %v1761_v45, %v1765_v19  ;;  %v1768_v51 = vld [vmem:[%s9284_s21 + $0x280] sm:$0xff]  ;;  %v1769_v53 = vld [vmem:[%s9284_s21 + $0x288] sm:$0xff]  ;;  %v8063_v55 = vcombine.low %v1760_v43, %v1764_v44  ;;  %v1691_v39 = vld [vmem:[%s9284_s21 + $0x18] sm:$0xff] }
 0x220   : > { %2508 = vmatprep.subr.bf16.mxu0 %v8032_v18  ;;  %2581 = vmatprep.subr.bf16.mxu1 %v8034_v11  ;;  %v1772_v52 = vld [vmem:[%s9284_s21 + $0x2a0] sm:$0xff]  ;;  %v1773_v54 = vld [vmem:[%s9284_s21 + $0x2a8] sm:$0xff]  ;;  %v8065_v58 = vcombine.low %v1761_v45, %v1765_v19  ;;  %v7996_v44 = vcombine.high %v1690_v33, %v1694_v23  ;;  %v1698_v19 = vld [vmem:[%s9284_s21 + $0x50] sm:$0xff] }
 0x221   : > { %v8072_v59 = vcombine.high %v1768_v51, %v1772_v52  ;;  %v8074_v60 = vcombine.high %v1769_v53, %v1773_v54  ;;  %v1776_v61 = vld [vmem:[%s9284_s21 + $0x2c0] sm:$0xff]  ;;  %v1777_v63 = vld [vmem:[%s9284_s21 + $0x2c8] sm:$0xff]  ;;  %v8071_v1 = vcombine.low %v1768_v51, %v1772_v52  ;;  %v8073_v2 = vcombine.low %v1769_v53, %v1773_v54  ;;  %v1671_v52 = vld [vmem:[#allocation3 + $0x38] sm:$0xff] }
 0x222   : > { %v1780_v62 = vld [vmem:[%s9284_s21 + $0x2e0] sm:$0xff]  ;;  %v1781_v0 = vld [vmem:[%s9284_s21 + $0x2e8] sm:$0xff]  ;;  %v7995_v53 = vcombine.low %v1690_v33, %v1694_v23 }
 0x223   : > { %2509 = vmatpush1.bf16.msra.mxu0 %v8031_v24  ;;  %2582 = vmatpush1.bf16.msra.mxu1 %v8033_v25  ;;  %v8080_v3 = vcombine.high %v1776_v61, %v1780_v62  ;;  %v8082_v5 = vcombine.high %v1777_v63, %v1781_v0  ;;  %v1784_v6 = vld [vmem:[%s9284_s21 + $0x300] sm:$0xff]  ;;  %v1785_v8 = vld [vmem:[%s9284_s21 + $0x308] sm:$0xff]  ;;  %v8079_v10 = vcombine.low %v1776_v61, %v1780_v62  ;;  %v1707_v62 = vld [vmem:[%s9284_s21 + $0x98] sm:$0xff] }
 0x224   : > { %2510 = vmatprep.subr.bf16.mxu0 %v8040_v26  ;;  %2583 = vmatprep.subr.bf16.mxu1 %v8042_v29  ;;  %v1788_v7 = vld [vmem:[%s9284_s21 + $0x320] sm:$0xff]  ;;  %v1789_v9 = vld [vmem:[%s9284_s21 + $0x328] sm:$0xff]  ;;  %v8081_v12 = vcombine.low %v1777_v63, %v1781_v0  ;;  %v1711_v63 = vld [vmem:[%s9284_s21 + $0xb8] sm:$0xff] }
 0x225   : > { %v8088_v13 = vcombine.high %v1784_v6, %v1788_v7  ;;  %v8090_v14 = vcombine.high %v1785_v8, %v1789_v9  ;;  %v1792_v15 = vld [vmem:[%s9284_s21 + $0x340] sm:$0xff]  ;;  %v1793_v17 = vld [vmem:[%s9284_s21 + $0x348] sm:$0xff]  ;;  %v8087_v11 = vcombine.low %v1784_v6, %v1788_v7  ;;  %v8089_v31 = vcombine.low %v1785_v8, %v1789_v9  ;;  %v1714_v7 = vld [vmem:[%s9284_s21 + $0xd0] sm:$0xff] }
 0x226   : > { %v1796_v16 = vld [vmem:[%s9284_s21 + $0x360] sm:$0xff]  ;;  %v1797_v18 = vld [vmem:[%s9284_s21 + $0x368] sm:$0xff]  ;;  %v8014_v6 = vcombine.high %v1707_v62, %v1711_v63  ;;  %v1718_v8 = vld [vmem:[%s9284_s21 + $0xf0] sm:$0xff] }
 0x227   : > { %2511 = vmatpush1.bf16.msra.mxu0 %v8039_v35  ;;  %2584 = vmatpush1.bf16.msra.mxu1 %v8041_v36  ;;  %v8096_v38 = vcombine.high %v1792_v15, %v1796_v16  ;;  %v8098_v21 = vcombine.high %v1793_v17, %v1797_v18  ;;  %v1800_v49 = vld [vmem:[%s9284_s21 + $0x380] sm:$0xff]  ;;  %v1801_v25 = vld [vmem:[%s9284_s21 + $0x388] sm:$0xff]  ;;  %v8095_v27 = vcombine.low %v1792_v15, %v1796_v16  ;;  %v1715_v9 = vld [vmem:[%s9284_s21 + $0xd8] sm:$0xff] }
 0x228   : > { %2512 = vmatprep.subr.bf16.mxu0 %v8048_v37  ;;  %2585 = vmatprep.subr.bf16.mxu1 %v8050_v56  ;;  %v1804_v24 = vld [vmem:[%s9284_s21 + $0x3a0] sm:$0xff]  ;;  %v1805_v26 = vld [vmem:[%s9284_s21 + $0x3a8] sm:$0xff]  ;;  %v8097_v28 = vcombine.low %v1793_v17, %v1797_v18  ;;  %v8013_v16 = vcombine.low %v1707_v62, %v1711_v63  ;;  %v8020_v17 = vcombine.high %v1714_v7, %v1718_v8  ;;  %v1754_v62 = vld [vmem:[%s9284_s21 + $0x210] sm:$0xff] }
 0x229   : > { %v8104_v29 = vcombine.high %v1800_v49, %v1804_v24  ;;  %v8106_v30 = vcombine.high %v1801_v25, %v1805_v26  ;;  %v1808_v22 = vld [vmem:[%s9284_s21 + $0x3c0] sm:$0xff]  ;;  %v1809_v34 = vld [vmem:[%s9284_s21 + $0x3c8] sm:$0xff]  ;;  %v8103_v36 = vcombine.low %v1800_v49, %v1804_v24  ;;  %v8105_v37 = vcombine.low %v1801_v25, %v1805_v26  ;;  %v1727_v49 = vld [vmem:[%s9284_s21 + $0x138] sm:$0xff] }
 0x22a   : > { %v1812_v57 = vld [vmem:[%s9284_s21 + $0x3e0] sm:$0xff]  ;;  %v1813_v35 = vld [vmem:[%s9284_s21 + $0x3e8] sm:$0xff]  ;;  %v8019_v24 = vcombine.low %v1714_v7, %v1718_v8  ;;  %v1758_v63 = vld [vmem:[%s9284_s21 + $0x230] sm:$0xff] }
 0x22b   : > { %2513 = vmatpush1.bf16.msra.mxu0 %v8047_v20  ;;  %2586 = vmatpush1.bf16.msra.mxu1 %v8049_v40  ;;  %v8112_v56 = vcombine.high %v1808_v22, %v1812_v57  ;;  %v8114_v4 = vcombine.high %v1809_v34, %v1813_v35  ;;  %v1695_v20 = vld [vmem:[%s9284_s21 + $0x38] sm:$0xff]  ;;  %v8111_v40 = vcombine.low %v1808_v22, %v1812_v57  ;;  %v1669_v51 = vld [vmem:[#allocation3 + $0x28] sm:$0xff]  ;;  %v1674_v26 = vld [vmem:[#allocation3 + $0x50] sm:$0xff] }
 0x22c   : > { %2514 = vmatprep.subr.bf16.mxu0 %v8056_v41  ;;  %2587 = vmatprep.subr.bf16.mxu1 %v8058_v42  ;;  %v1664_v41 = vld [vmem:[#allocation3] sm:$0xff]  ;;  %v1666_v42 = vld [vmem:[#allocation3 + $0x10] sm:$0xff]  ;;  %v8113_v43 = vcombine.low %v1809_v34, %v1813_v35  ;;  %v7998_v45 = vcombine.high %v1691_v39, %v1695_v20  ;;  %v7997_v54 = vcombine.low %v1691_v39, %v1695_v20 }
 0x22d   : > { %v9700_v61 = vpack.c.bf16 %v1671_v52, %v1669_v51  ;;  %v1672_v25 = vld [vmem:[#allocation3 + $0x40] sm:$0xff]  ;;  %v1734_v22 = vld [vmem:[%s9284_s21 + $0x170] sm:$0xff] }
 0x22e   : > { %v1731_v57 = vld [vmem:[%s9284_s21 + $0x158] sm:$0xff]  ;;  %v9728_v35 = vpack.c.bf16 %v1674_v26, %v1672_v25  ;;  %v1738_v39 = vld [vmem:[%s9284_s21 + $0x190] sm:$0xff] }
 0x22f   : > { %2515 = vmatpush1.bf16.msra.mxu0 %v8055_v46  ;;  %2588 = vmatpush1.bf16.msra.mxu1 %v8057_v47  ;;  %v1702_v46 = vld [vmem:[%s9284_s21 + $0x70] sm:$0xff]  ;;  %v1699_v47 = vld [vmem:[%s9284_s21 + $0x58] sm:$0xff] }
 0x230   : > { %2516 = vmatprep.subr.bf16.mxu0 %v8064_v48  ;;  %2589 = vmatprep.subr.bf16.mxu1 %v8066_v50  ;;  %v9695_v48 = vpack.c.bf16 %v1666_v42, %v1664_v41  ;;  %v1703_v50 = vld [vmem:[%s9284_s21 + $0x78] sm:$0xff]  ;;  %v8003_v0 = vcombine.low %v1698_v19, %v1702_v46  ;;  %v1742_v20 = vld [vmem:[%s9284_s21 + $0x1b0] sm:$0xff] }
 0x231   : > { %v1735_v34 = vld [vmem:[%s9284_s21 + $0x178] sm:$0xff]  ;;  %v1750_v51 = vld [vmem:[%s9284_s21 + $0x1f0] sm:$0xff] }
 0x232   : > { %v8038_v23 = vcombine.high %v1731_v57, %v1735_v34  ;;  %v1739_v41 = vld [vmem:[%s9284_s21 + $0x198] sm:$0xff]  ;;  %v1762_v7 = vld [vmem:[%s9284_s21 + $0x250] sm:$0xff] }
 0x233   : > { %2517 = vmatpush1.bf16.msra.mxu0 %v8063_v55  ;;  %2590 = vmatpush1.bf16.msra.mxu1 %v8065_v58  ;;  %v8004_v55 = vcombine.high %v1698_v19, %v1702_v46  ;;  %v8006_v58 = vcombine.high %v1699_v47, %v1703_v50  ;;  %v1743_v42 = vld [vmem:[%s9284_s21 + $0x1b8] sm:$0xff]  ;;  %v8037_v19 = vcombine.low %v1731_v57, %v1735_v34  ;;  %v1766_v8 = vld [vmem:[%s9284_s21 + $0x270] sm:$0xff] }
 0x234   : > { %2518 = vmatprep.subr.bf16.mxu0 %v8072_v59  ;;  %2591 = vmatprep.subr.bf16.mxu1 %v8074_v60  ;;  %v1706_v59 = vld [vmem:[%s9284_s21 + $0x90] sm:$0xff]  ;;  %v8044_v46 = vcombine.high %v1738_v39, %v1742_v20  ;;  %v1747_v52 = vld [vmem:[%s9284_s21 + $0x1d8] sm:$0xff] }
 0x235   : > { %v1710_v60 = vld [vmem:[%s9284_s21 + $0xb0] sm:$0xff] }
 0x236   : > { %v8011_v15 = vcombine.low %v1706_v59, %v1710_v60  ;;  %v1778_v25 = vld [vmem:[%s9284_s21 + $0x2d0] sm:$0xff] }
 0x237   : > { %2519 = vmatpush1.bf16.msra.mxu0 %v8071_v1  ;;  %2592 = vmatpush1.bf16.msra.mxu1 %v8073_v2  ;;  %v1668_v1 = vld [vmem:[#allocation3 + $0x20] sm:$0xff]  ;;  %v1670_v2 = vld [vmem:[#allocation3 + $0x30] sm:$0xff] }
 0x238   : > { %2520 = vmatprep.subr.bf16.mxu0 %v8080_v3  ;;  %2593 = vmatprep.subr.bf16.mxu1 %v8082_v5  ;;  %v8005_v3 = vcombine.low %v1699_v47, %v1703_v50  ;;  %v8012_v5 = vcombine.high %v1706_v59, %v1710_v60  ;;  %v8046_v47 = vcombine.high %v1739_v41, %v1743_v42  ;;  %v1746_v50 = vld [vmem:[%s9284_s21 + $0x1d0] sm:$0xff] }
 0x239   : > { %v8052_v59 = vcombine.high %v1746_v50, %v1750_v51  ;;  %v1782_v26 = vld [vmem:[%s9284_s21 + $0x2f0] sm:$0xff] }
 0x23a   : > { %v1786_v34 = vld [vmem:[%s9284_s21 + $0x310] sm:$0xff] }
 0x23b   : > { %2521 = vmatpush1.bf16.msra.mxu0 %v8079_v10  ;;  %2594 = vmatpush1.bf16.msra.mxu1 %v8081_v12  ;;  %v1719_v10 = vld [vmem:[%s9284_s21 + $0xf8] sm:$0xff]  ;;  %v9712_v12 = vpack.c.bf16 %v1670_v2, %v1668_v1  ;;  %v8051_v2 = vcombine.low %v1746_v50, %v1750_v51  ;;  %v1806_v50 = vld [vmem:[%s9284_s21 + $0x3b0] sm:$0xff] }
 0x23c   : > { %2522 = vmatprep.subr.bf16.mxu0 %v8088_v13  ;;  %2595 = vmatprep.subr.bf16.mxu1 %v8090_v14  ;;  %v1673_v13 = vld [vmem:[#allocation3 + $0x48] sm:$0xff]  ;;  %v1675_v14 = vld [vmem:[#allocation3 + $0x58] sm:$0xff]  ;;  %v8022_v18 = vcombine.high %v1715_v9, %v1719_v10 }
 0x23d   : > { %v1759_v1 = vld [vmem:[%s9284_s21 + $0x238] sm:$0xff] }
 0x23e   : > { %v1803_v51 = vld [vmem:[%s9284_s21 + $0x398] sm:$0xff] }
 0x23f   : > { %2523 = vmatpush1.bf16.msra.mxu0 %v8087_v11  ;;  %2596 = vmatpush1.bf16.msra.mxu1 %v8089_v31  ;;  %v1722_v11 = vld [vmem:[%s9284_s21 + $0x110] sm:$0xff] }
 0x240   : > { %2524 = vmatprep.subr.bf16.mxu0 %v8096_v38  ;;  %2597 = vmatprep.subr.bf16.mxu1 %v8098_v21  ;;  %v1726_v31 = vld [vmem:[%s9284_s21 + $0x130] sm:$0xff]  ;;  %v9716_v38 = vpack.c.bf16 %v1675_v14, %v1673_v13  ;;  %v1723_v21 = vld [vmem:[%s9284_s21 + $0x118] sm:$0xff]  ;;  %v8059_v13 = vcombine.low %v1754_v62, %v1758_v63 }
 0x243   : > { %2525 = vmatpush1.bf16.msra.mxu0 %v8095_v27  ;;  %2598 = vmatpush1.bf16.msra.mxu1 %v8097_v28  ;;  %v8021_v27 = vcombine.low %v1715_v9, %v1719_v10  ;;  %v8028_v28 = vcombine.high %v1722_v11, %v1726_v31  ;;  %v1763_v9 = vld [vmem:[%s9284_s21 + $0x258] sm:$0xff] }
 0x244   : > { %2526 = vmatprep.subr.bf16.mxu0 %v8104_v29  ;;  %2599 = vmatprep.subr.bf16.mxu1 %v8106_v30  ;;  %v8030_v29 = vcombine.high %v1723_v21, %v1727_v49  ;;  %v1730_v30 = vld [vmem:[%s9284_s21 + $0x150] sm:$0xff]  ;;  %v1767_v10 = vld [vmem:[%s9284_s21 + $0x278] sm:$0xff] }
 0x245   : > { %v8036_v33 = vcombine.high %v1730_v30, %v1734_v22 }
 0x247   : > { %2527 = vmatpush1.bf16.msra.mxu0 %v8103_v36  ;;  %2600 = vmatpush1.bf16.msra.mxu1 %v8105_v37  ;;  %v1677_v36 = vld [vmem:[#allocation3 + $0x68] sm:$0xff]  ;;  %v1679_v37 = vld [vmem:[#allocation3 + $0x78] sm:$0xff] }
 0x248   : > { %2528 = vmatprep.subr.bf16.mxu0 %v8112_v56  ;;  %2601 = vmatprep.subr.bf16.mxu1 %v8114_v4  ;;  %v8027_v56 = vcombine.low %v1722_v11, %v1726_v31  ;;  %v8029_v4 = vcombine.low %v1723_v21, %v1727_v49  ;;  %v1771_v11 = vld [vmem:[%s9284_s21 + $0x298] sm:$0xff]  ;;  %v8067_v21 = vcombine.low %v1762_v7, %v1766_v8 }
 0x249   : > { %v1775_v31 = vld [vmem:[%s9284_s21 + $0x2b8] sm:$0xff] }
 0x24b   : > { %2529 = vmatpush1.bf16.msra.mxu0 %v8111_v40  ;;  %2602 = vmatpush1.bf16.msra.mxu1 %v8113_v43  ;;  %v9732_v40 = vpack.c.bf16 %v1679_v37, %v1677_v36  ;;  %v8035_v43 = vcombine.low %v1730_v30, %v1734_v22  ;;  %v8077_v30 = vcombine.low %v1771_v11, %v1775_v31  ;;  %v1790_v36 = vld [vmem:[%s9284_s21 + $0x330] sm:$0xff]  ;;  %v1787_v37 = vld [vmem:[%s9284_s21 + $0x318] sm:$0xff] }
 0x24c   : > { %2644 = vmatprep.subr.bf16.mxu0 %v7996_v44  ;;  %2717 = vmatprep.subr.bf16.mxu1 %v7998_v45  ;;  %v1676_v44 = vld [vmem:[#allocation3 + $0x60] sm:$0xff]  ;;  %v1678_v45 = vld [vmem:[#allocation3 + $0x70] sm:$0xff]  ;;  %v8084_v22 = vcombine.high %v1778_v25, %v1782_v26 }
 0x24e   : > { %2531 = vmatmul.mubr.bf16.vlgmr.msra.gmra.mrb[0].mxu0 %v9695_v48  ;;  %2604 = vmatmul.mubr.bf16.vlgmr.msra.gmra.mrb[0].mxu1 %v9695_v48 }
 0x24f   : > { %2645 = vmatpush1.bf16.msra.mxu0 %v7995_v53  ;;  %2718 = vmatpush1.bf16.msra.mxu1 %v7997_v54  ;;  %v1751_v53 = vld [vmem:[%s9284_s21 + $0x1f8] sm:$0xff]  ;;  %v9744_v54 = vpack.c.bf16 %v1678_v45, %v1676_v44  ;;  %v8091_v44 = vcombine.low %v1786_v34, %v1790_v36 }
 0x250   : > { %2646 = vmatprep.subr.bf16.mxu0 %v8004_v55  ;;  %2719 = vmatprep.subr.bf16.mxu1 %v8006_v58  ;;  %v8043_v55 = vcombine.low %v1738_v39, %v1742_v20  ;;  %v8045_v58 = vcombine.low %v1739_v41, %v1743_v42  ;;  %v8054_v60 = vcombine.high %v1747_v52, %v1751_v53  ;;  %v1794_v20 = vld [vmem:[%s9284_s21 + $0x350] sm:$0xff]  ;;  %v1795_v42 = vld [vmem:[%s9284_s21 + $0x358] sm:$0xff] }
 0x251   : > { %2540 = vmatprep.mubr.bf16.mxu0 %v9700_v61  ;;  %2613 = vmatprep.mubr.bf16.mxu1 %v9700_v61  ;;  %v1798_v41 = vld [vmem:[%s9284_s21 + $0x370] sm:$0xff] }
 0x253   : > { %2647 = vmatpush1.bf16.msra.mxu0 %v8003_v0  ;;  %2720 = vmatpush1.bf16.msra.mxu1 %v8005_v3  ;;  %v1755_v0 = vld [vmem:[%s9284_s21 + $0x218] sm:$0xff]  ;;  %v8053_v3 = vcombine.low %v1747_v52, %v1751_v53  ;;  %v8099_v53 = vcombine.low %v1794_v20, %v1798_v41 }
 0x254   : > { %2648 = vmatprep.subr.bf16.mxu0 %v8012_v5  ;;  %2721 = vmatprep.subr.bf16.mxu1 %v8014_v6  ;;  %v8060_v5 = vcombine.high %v1754_v62, %v1758_v63  ;;  %v8062_v6 = vcombine.high %v1755_v0, %v1759_v1  ;;  %v8061_v14 = vcombine.low %v1755_v0, %v1759_v1  ;;  %v1807_v52 = vld [vmem:[%s9284_s21 + $0x3b8] sm:$0xff]  ;;  %v1814_v62 = vld [vmem:[%s9284_s21 + $0x3f0] sm:$0xff] }
 0x255   : > { %v1811_v63 = vld [vmem:[%s9284_s21 + $0x3d8] sm:$0xff] }
 0x256   : > { %2541 = vmatmul.mubr.bf16.gmra.mrb[4].mxu0 %v9712_v12  ;;  %2614 = vmatmul.mubr.bf16.gmra.mrb[4].mxu1 %v9712_v12  ;;  %v1815_v0 = vld [vmem:[%s9284_s21 + $0x3f8] sm:$0xff] }
 0x257   : > { %2649 = vmatpush1.bf16.msra.mxu0 %v8011_v15  ;;  %2722 = vmatpush1.bf16.msra.mxu1 %v8013_v16  ;;  %v8068_v15 = vcombine.high %v1762_v7, %v1766_v8  ;;  %v8070_v16 = vcombine.high %v1763_v9, %v1767_v10  ;;  %v8117_v7 = vcombine.low %v1811_v63, %v1815_v0  ;;  %v9800_v8 = vld [vmem:[%s9297_s16] sm:$0xff] }
 0x258   : > { %2650 = vmatprep.subr.bf16.mxu0 %v8020_v17  ;;  %2723 = vmatprep.subr.bf16.mxu1 %v8022_v18  ;;  %v1770_v17 = vld [vmem:[%s9284_s21 + $0x290] sm:$0xff] }
 0x259   : > { %2550 = vmatprep.mubr.bf16.mxu0 %v9716_v38  ;;  %2623 = vmatprep.mubr.bf16.mxu1 %v9716_v38  ;;  %v1774_v18 = vld [vmem:[%s9284_s21 + $0x2b0] sm:$0xff] }
 0x25a   : > { %v8076_v49 = vcombine.high %v1770_v17, %v1774_v18 }
 0x25b   : > { %2651 = vmatpush1.bf16.msra.mxu0 %v8019_v24  ;;  %2724 = vmatpush1.bf16.msra.mxu1 %v8021_v27  ;;  %v8078_v24 = vcombine.high %v1771_v11, %v1775_v31  ;;  %v1779_v27 = vld [vmem:[%s9284_s21 + $0x2d8] sm:$0xff] }
 0x25c   : > { %2652 = vmatprep.subr.bf16.mxu0 %v8028_v28  ;;  %2725 = vmatprep.subr.bf16.mxu1 %v8030_v29  ;;  %v1783_v28 = vld [vmem:[%s9284_s21 + $0x2f8] sm:$0xff]  ;;  %v8075_v29 = vcombine.low %v1770_v17, %v1774_v18 }
 0x25d   : > { %v8086_v57 = vcombine.high %v1779_v27, %v1783_v28 }
 0x25e   : > { %2551 = vmatmul.mubr.bf16.gmra.mrb[8].mxu0 %v9728_v35  ;;  %2624 = vmatmul.mubr.bf16.gmra.mrb[8].mxu1 %v9728_v35 }
 0x25f   : > { %2653 = vmatpush1.bf16.msra.mxu0 %v8027_v56  ;;  %2726 = vmatpush1.bf16.msra.mxu1 %v8029_v4  ;;  %v1791_v56 = vld [vmem:[%s9284_s21 + $0x338] sm:$0xff]  ;;  %v8083_v4 = vcombine.low %v1778_v25, %v1782_v26 }
 0x260   : > { %2654 = vmatprep.subr.bf16.mxu0 %v8036_v33  ;;  %2727 = vmatprep.subr.bf16.mxu1 %v8038_v23  ;;  %v8085_v33 = vcombine.low %v1779_v27, %v1783_v28  ;;  %v8092_v23 = vcombine.high %v1786_v34, %v1790_v36  ;;  %v8094_v39 = vcombine.high %v1787_v37, %v1791_v56 }
 0x261   : > { %2560 = vmatprep.mubr.bf16.mxu0 %v9732_v40  ;;  %2633 = vmatprep.mubr.bf16.mxu1 %v9732_v40  ;;  %v8093_v45 = vcombine.low %v1787_v37, %v1791_v56 }
 0x263   : > { %2655 = vmatpush1.bf16.msra.mxu0 %v8035_v43  ;;  %2728 = vmatpush1.bf16.msra.mxu1 %v8037_v19  ;;  %v1799_v43 = vld [vmem:[%s9284_s21 + $0x378] sm:$0xff]  ;;  %v8100_v19 = vcombine.high %v1794_v20, %v1798_v41 }
 0x264   : > { %2656 = vmatprep.subr.bf16.mxu0 %v8044_v46  ;;  %2729 = vmatprep.subr.bf16.mxu1 %v8046_v47  ;;  %v8102_v46 = vcombine.high %v1795_v42, %v1799_v43  ;;  %v1802_v47 = vld [vmem:[%s9284_s21 + $0x390] sm:$0xff] }
 0x265   : > { %v8107_v1 = vcombine.low %v1802_v47, %v1806_v50 }
 0x266   : > { %2561 = vmatmul.mubr.bf16.gmra.mrb[12].mxu0 %v9744_v54  ;;  %2634 = vmatmul.mubr.bf16.gmra.mrb[12].mxu1 %v9744_v54 }
 0x267   : > { %2657 = vmatpush1.bf16.msra.mxu0 %v8043_v55  ;;  %2730 = vmatpush1.bf16.msra.mxu1 %v8045_v58  ;;  %v8101_v55 = vcombine.low %v1795_v42, %v1799_v43  ;;  %v8108_v58 = vcombine.high %v1802_v47, %v1806_v50 }
 0x268   : > { %2658 = vmatprep.subr.bf16.mxu0 %v8052_v59  ;;  %2731 = vmatprep.subr.bf16.mxu1 %v8054_v60  ;;  %v8110_v59 = vcombine.high %v1803_v51, %v1807_v52  ;;  %v1810_v60 = vld [vmem:[%s9284_s21 + $0x3d0] sm:$0xff] }
 0x269   : > { %2676 = vmatprep.mubr.bf16.mxu0 %v9650_v32  ;;  %2749 = vmatprep.mubr.bf16.mxu1 %v9650_v32  ;;  %v8069_v32 = vcombine.low %v1763_v9, %v1767_v10 }
 0x26b   : > { %2659 = vmatpush1.bf16.msra.mxu0 %v8051_v2  ;;  %2732 = vmatpush1.bf16.msra.mxu1 %v8053_v3  ;;  %v8109_v2 = vcombine.low %v1803_v51, %v1807_v52  ;;  %v8116_v3 = vcombine.high %v1810_v60, %v1814_v62 }
 0x26c   : > { %2660 = vmatprep.subr.bf16.mxu0 %v8060_v5  ;;  %2733 = vmatprep.subr.bf16.mxu1 %v8062_v6  ;;  %v8118_v5 = vcombine.high %v1811_v63, %v1815_v0  ;;  %v8115_v6 = vcombine.low %v1810_v60, %v1814_v62 }
 0x26f   : > { %2661 = vmatpush1.bf16.msra.mxu0 %v8059_v13  ;;  %2734 = vmatpush1.bf16.msra.mxu1 %v8061_v14 }
 0x270   : > { %2662 = vmatprep.subr.bf16.mxu0 %v8068_v15  ;;  %2735 = vmatprep.subr.bf16.mxu1 %v8070_v16 }
 0x273   : > { %2663 = vmatpush1.bf16.msra.mxu0 %v8067_v21  ;;  %2736 = vmatpush1.bf16.msra.mxu1 %v8069_v32 }
 0x274   : > { %2664 = vmatprep.subr.bf16.mxu0 %v8076_v49  ;;  %2737 = vmatprep.subr.bf16.mxu1 %v8078_v24 }
 0x277   : > { %2665 = vmatpush1.bf16.msra.mxu0 %v8075_v29  ;;  %2738 = vmatpush1.bf16.msra.mxu1 %v8077_v30 }
 0x278   : > { %2666 = vmatprep.subr.bf16.mxu0 %v8084_v22  ;;  %2739 = vmatprep.subr.bf16.mxu1 %v8086_v57 }
 0x27b   : > { %2667 = vmatpush1.bf16.msra.mxu0 %v8083_v4  ;;  %2740 = vmatpush1.bf16.msra.mxu1 %v8085_v33 }
 0x27c   : > { %2668 = vmatprep.subr.bf16.mxu0 %v8092_v23  ;;  %2741 = vmatprep.subr.bf16.mxu1 %v8094_v39 }
 0x27f   : > { %2669 = vmatpush1.bf16.msra.mxu0 %v8091_v44  ;;  %2742 = vmatpush1.bf16.msra.mxu1 %v8093_v45 }
 0x280   : > { %2670 = vmatprep.subr.bf16.mxu0 %v8100_v19  ;;  %2743 = vmatprep.subr.bf16.mxu1 %v8102_v46 }
 0x283   : > { %2671 = vmatpush1.bf16.msra.mxu0 %v8099_v53  ;;  %2744 = vmatpush1.bf16.msra.mxu1 %v8101_v55 }
 0x284   : > { %2672 = vmatprep.subr.bf16.mxu0 %v8108_v58  ;;  %2745 = vmatprep.subr.bf16.mxu1 %v8110_v59 }
 0x287   : > { %2673 = vmatpush1.bf16.msra.mxu0 %v8107_v1  ;;  %2746 = vmatpush1.bf16.msra.mxu1 %v8109_v2 }
 0x288   : > { %2674 = vmatprep.subr.bf16.mxu0 %v8116_v3  ;;  %2747 = vmatprep.subr.bf16.mxu1 %v8118_v5 }
 0x28b   : > { %2675 = vmatpush1.bf16.msra.mxu0 %v8115_v6  ;;  %2748 = vmatpush1.bf16.msra.mxu1 %v8117_v7 }
 0x28e   : > { %2677 = vmatmul.mubr.bf16.vlgmr.msra.gmra.mrb[16].mxu0 %v9695_v48  ;;  %2750 = vmatmul.mubr.bf16.vlgmr.msra.gmra.mrb[16].mxu1 %v9695_v48  ;;  %v1818_v48 = vlaneseq }
 0x28f   : > { %2686 = vmatprep.mubr.bf16.mxu0 %v9700_v61  ;;  %2759 = vmatprep.mubr.bf16.mxu1 %v9700_v61 }
 0x290   : > { %v9796_v61 = vshrl.u32 %v1818_v48, 7 }
 0x292   : > { %v1824_v9 = vsub.s32 1, %v9796_v61 }
 0x296   : > { %2687 = vmatmul.mubr.bf16.gmra.mrb[20].mxu0 %v9712_v12  ;;  %2760 = vmatmul.mubr.bf16.gmra.mrb[20].mxu1 %v9712_v12  ;;  %v1820_v12 = vsub.s32 0, %v9796_v61 }
 0x297   : > { %2696 = vmatprep.mubr.bf16.mxu0 %v9716_v38  ;;  %2769 = vmatprep.mubr.bf16.mxu1 %v9716_v38  ;;  %v1828_v38 = vsub.s32 2, %v9796_v61 }
 0x298   : > { %v9806_v10 = vrot.slane %v9800_v8, %v1820_v12 }
 0x29e   : > { %2697 = vmatmul.mubr.bf16.gmra.mrb[24].mxu0 %v9728_v35  ;;  %2770 = vmatmul.mubr.bf16.gmra.mrb[24].mxu1 %v9728_v35  ;;  %v1832_v35 = vsub.s32 3, %v9796_v61 }
 0x29f   : > { %2706 = vmatprep.mubr.bf16.mxu0 %v9732_v40  ;;  %2779 = vmatprep.mubr.bf16.mxu1 %v9732_v40  ;;  %v9809_v40 = vrot.slane %v9800_v8, %v1828_v38 }
 0x2a0   : > { %v9815_v13 = vrot.slane %v9800_v8, %v1832_v35 }
 0x2a6   : > { %2707 = vmatmul.mubr.bf16.gmra.mrb[28].mxu0 %v9744_v54  ;;  %2780 = vmatmul.mubr.bf16.gmra.mrb[28].mxu1 %v9744_v54  ;;  %v9812_v54 = vrot.slane %v9800_v8, %v1824_v9 }
 0x321   : > { %v2532_v14 = vpop.f32.mrb[0].mxu0  ;;  %v2605_v16 = vpop.f32.mrb[0].mxu1 }
 0x322   : > { %v2533_v15 = vadd.f32 %v2532_v14, %v9806_v10  ;;  %v2534_v17 = vpop.f32.mrb[1].mxu0  ;;  %v2606_v18 = vadd.f32 %v2605_v16, %v9809_v40  ;;  %v2607_v31 = vpop.f32.mrb[1].mxu1 }
 0x323   : > { %v2535_v11 = vadd.f32 %v2534_v17, %v9812_v54  ;;  %v2536_v21 = vpop.f32.mrb[2].mxu0  ;;  %v2608_v32 = vadd.f32 %v2607_v31, %v9815_v13  ;;  %v2609_v24 = vpop.f32.mrb[2].mxu1  ;;  %v1836_v31 = vsub.s32 4, %v9796_v61 }
 0x324   : > { %2790 = vst [vmem:[#allocation2] sm:$0xff] %v2533_v15  ;;  %v2537_v49 = vadd.f32 %v2536_v21, %v9806_v10  ;;  %v2538_v25 = vpop.f32.mrb[3].mxu0  ;;  %2792 = vst [vmem:[#allocation2 + $0x10] sm:$0xff] %v2606_v18  ;;  %v2610_v26 = vadd.f32 %v2609_v24, %v9809_v40  ;;  %v2611_v28 = vpop.f32.mrb[3].mxu1  ;;  %v1840_v21 = vsub.s32 5, %v9796_v61 }
 0x325   : > { %2791 = vst [vmem:[#allocation2 + $0x8] sm:$0xff] %v2535_v11  ;;  %v2539_v27 = vadd.f32 %v2538_v25, %v9812_v54  ;;  %2793 = vst [vmem:[#allocation2 + $0x18] sm:$0xff] %v2608_v32  ;;  %v2612_v29 = vadd.f32 %v2611_v28, %v9815_v13  ;;  %v1848_v32 = vsub.s32 7, %v9796_v61 }
 0x326   : > { %2798 = vst [vmem:[#allocation2 + $0x40] sm:$0xff] %v2537_v49  ;;  %2800 = vst [vmem:[#allocation2 + $0x50] sm:$0xff] %v2610_v26  ;;  %v9860_v49 = vrot.slane %v9800_v8, %v1840_v21 }
 0x327   : > { %2799 = vst [vmem:[#allocation2 + $0x48] sm:$0xff] %v2539_v27  ;;  %2801 = vst [vmem:[#allocation2 + $0x58] sm:$0xff] %v2612_v29 }
 0x329   : > { %v2542_v30 = vpop.f32.mrb[4].mxu0  ;;  %v2615_v57 = vpop.f32.mrb[4].mxu1 }
 0x32a   : > { %v2543_v22 = vadd.f32 %v2542_v30, %v9806_v10  ;;  %v2544_v34 = vpop.f32.mrb[5].mxu0  ;;  %v2616_v36 = vadd.f32 %v2615_v57, %v9809_v40  ;;  %v2617_v56 = vpop.f32.mrb[5].mxu1 }
 0x32b   : > { %v2545_v37 = vadd.f32 %v2544_v34, %v9812_v54  ;;  %v2546_v4 = vpop.f32.mrb[6].mxu0  ;;  %v2618_v33 = vadd.f32 %v2617_v56, %v9815_v13  ;;  %v2619_v39 = vpop.f32.mrb[6].mxu1 }
 0x32c   : > { %2806 = vst [vmem:[#allocation2 + $0x80] sm:$0xff] %v2543_v22  ;;  %v2547_v23 = vadd.f32 %v2546_v4, %v9806_v10  ;;  %v2548_v20 = vpop.f32.mrb[7].mxu0  ;;  %2808 = vst [vmem:[#allocation2 + $0x90] sm:$0xff] %v2616_v36  ;;  %v2620_v41 = vadd.f32 %v2619_v39, %v9809_v40  ;;  %v2621_v43 = vpop.f32.mrb[7].mxu1 }
 0x32d   : > { %2807 = vst [vmem:[#allocation2 + $0x88] sm:$0xff] %v2545_v37  ;;  %v2549_v42 = vadd.f32 %v2548_v20, %v9812_v54  ;;  %2809 = vst [vmem:[#allocation2 + $0x98] sm:$0xff] %v2618_v33  ;;  %v2622_v44 = vadd.f32 %v2621_v43, %v9815_v13 }
 0x32e   : > { %2814 = vst [vmem:[#allocation2 + $0xc0] sm:$0xff] %v2547_v23  ;;  %2816 = vst [vmem:[#allocation2 + $0xd0] sm:$0xff] %v2620_v41 }
 0x32f   : > { %2815 = vst [vmem:[#allocation2 + $0xc8] sm:$0xff] %v2549_v42  ;;  %2817 = vst [vmem:[#allocation2 + $0xd8] sm:$0xff] %v2622_v44 }
 0x331   : > { %v2552_v45 = vpop.f32.mrb[8].mxu0  ;;  %v2625_v46 = vpop.f32.mrb[8].mxu1 }
 0x332   : > { %v2553_v19 = vadd.f32 %v2552_v45, %v9806_v10  ;;  %v2554_v47 = vpop.f32.mrb[9].mxu0  ;;  %v2626_v50 = vadd.f32 %v2625_v46, %v9809_v40  ;;  %v2627_v52 = vpop.f32.mrb[9].mxu1 }
 0x333   : > { %v2555_v51 = vadd.f32 %v2554_v47, %v9812_v54  ;;  %v2556_v53 = vpop.f32.mrb[10].mxu0  ;;  %v2628_v55 = vadd.f32 %v2627_v52, %v9815_v13  ;;  %v2629_v59 = vpop.f32.mrb[10].mxu1 }
 0x334   : > { %2822 = vst [vmem:[#allocation2 + $0x100] sm:$0xff] %v2553_v19  ;;  %v2557_v58 = vadd.f32 %v2556_v53, %v9806_v10  ;;  %v2558_v60 = vpop.f32.mrb[11].mxu0  ;;  %2824 = vst [vmem:[#allocation2 + $0x110] sm:$0xff] %v2626_v50  ;;  %v2630_v62 = vadd.f32 %v2629_v59, %v9809_v40  ;;  %v2631_v0 = vpop.f32.mrb[11].mxu1 }
 0x335   : > { %2823 = vst [vmem:[#allocation2 + $0x108] sm:$0xff] %v2555_v51  ;;  %v2559_v63 = vadd.f32 %v2558_v60, %v9812_v54  ;;  %2825 = vst [vmem:[#allocation2 + $0x118] sm:$0xff] %v2628_v55  ;;  %v2632_v1 = vadd.f32 %v2631_v0, %v9815_v13 }
 0x336   : > { %2830 = vst [vmem:[#allocation2 + $0x140] sm:$0xff] %v2557_v58  ;;  %2832 = vst [vmem:[#allocation2 + $0x150] sm:$0xff] %v2630_v62 }
 0x337   : > { %2831 = vst [vmem:[#allocation2 + $0x148] sm:$0xff] %v2559_v63  ;;  %2833 = vst [vmem:[#allocation2 + $0x158] sm:$0xff] %v2632_v1 }
 0x339   : > { %v2562_v2 = vpop.f32.mrb[12].mxu0  ;;  %v2635_v5 = vpop.f32.mrb[12].mxu1 }
 0x33a   : > { %v2563_v3 = vadd.f32 %v2562_v2, %v9806_v10  ;;  %v2564_v6 = vpop.f32.mrb[13].mxu0  ;;  %v2636_v7 = vadd.f32 %v2635_v5, %v9809_v40  ;;  %v2637_v12 = vpop.f32.mrb[13].mxu1 }
 0x33b   : > { %v2565_v48 = vadd.f32 %v2564_v6, %v9812_v54  ;;  %v2566_v38 = vpop.f32.mrb[14].mxu0  ;;  %v2638_v9 = vadd.f32 %v2637_v12, %v9815_v13  ;;  %v2639_v14 = vpop.f32.mrb[14].mxu1 }
 0x33c   : > { %2838 = vst [vmem:[#allocation2 + $0x180] sm:$0xff] %v2563_v3  ;;  %v2567_v35 = vadd.f32 %v2566_v38, %v9806_v10  ;;  %v2568_v15 = vpop.f32.mrb[15].mxu0  ;;  %2840 = vst [vmem:[#allocation2 + $0x190] sm:$0xff] %v2636_v7  ;;  %v2640_v16 = vadd.f32 %v2639_v14, %v9809_v40  ;;  %v2641_v18 = vpop.f32.mrb[15].mxu1  ;;  %v1844_v10 = vsub.s32 6, %v9796_v61  ;;  %v9854_v40 = vrot.slane %v9800_v8, %v1836_v31 }
 0x33d   : > { %2839 = vst [vmem:[#allocation2 + $0x188] sm:$0xff] %v2565_v48  ;;  %v2569_v17 = vadd.f32 %v2568_v15, %v9812_v54  ;;  %2841 = vst [vmem:[#allocation2 + $0x198] sm:$0xff] %v2638_v9  ;;  %v2642_v11 = vadd.f32 %v2641_v18, %v9815_v13  ;;  %v9863_v13 = vrot.slane %v9800_v8, %v1848_v32 }
 0x33e   : > { %2846 = vst [vmem:[#allocation2 + $0x1c0] sm:$0xff] %v2567_v35  ;;  %2848 = vst [vmem:[#allocation2 + $0x1d0] sm:$0xff] %v2640_v16  ;;  %v9857_v54 = vrot.slane %v9800_v8, %v1844_v10 }
 0x33f   : > { %2847 = vst [vmem:[#allocation2 + $0x1c8] sm:$0xff] %v2569_v17  ;;  %2849 = vst [vmem:[#allocation2 + $0x1d8] sm:$0xff] %v2642_v11 }
 0x361   : > { %v2678_v24 = vpop.f32.mrb[16].mxu0  ;;  %v2751_v26 = vpop.f32.mrb[16].mxu1 }
 0x362   : > { %v2679_v25 = vadd.f32 %v2678_v24, %v9854_v40  ;;  %v2680_v27 = vpop.f32.mrb[17].mxu0  ;;  %v2752_v28 = vadd.f32 %v2751_v26, %v9857_v54  ;;  %v2753_v29 = vpop.f32.mrb[17].mxu1 }
 0x363   : > { %v2681_v61 = vadd.f32 %v2680_v27, %v9860_v49  ;;  %v2682_v30 = vpop.f32.mrb[18].mxu0  ;;  %v2754_v22 = vadd.f32 %v2753_v29, %v9863_v13  ;;  %v2755_v34 = vpop.f32.mrb[18].mxu1 }
 0x364   : > { %2794 = vst [vmem:[#allocation2 + $0x20] sm:$0xff] %v2679_v25  ;;  %v2683_v57 = vadd.f32 %v2682_v30, %v9854_v40  ;;  %v2684_v36 = vpop.f32.mrb[19].mxu0  ;;  %2796 = vst [vmem:[#allocation2 + $0x30] sm:$0xff] %v2752_v28  ;;  %v2756_v8 = vadd.f32 %v2755_v34, %v9857_v54  ;;  %v2757_v56 = vpop.f32.mrb[19].mxu1 }
 0x365   : > { %2795 = vst [vmem:[#allocation2 + $0x28] sm:$0xff] %v2681_v61  ;;  %v2685_v37 = vadd.f32 %v2684_v36, %v9860_v49  ;;  %2797 = vst [vmem:[#allocation2 + $0x38] sm:$0xff] %v2754_v22  ;;  %v2758_v4 = vadd.f32 %v2757_v56, %v9863_v13 }
 0x366   : > { %2802 = vst [vmem:[#allocation2 + $0x60] sm:$0xff] %v2683_v57  ;;  %2804 = vst [vmem:[#allocation2 + $0x70] sm:$0xff] %v2756_v8 }
 0x367   : > { %2803 = vst [vmem:[#allocation2 + $0x68] sm:$0xff] %v2685_v37  ;;  %2805 = vst [vmem:[#allocation2 + $0x78] sm:$0xff] %v2758_v4 }
 0x369   : > { %v2688_v33 = vpop.f32.mrb[20].mxu0  ;;  %v2761_v39 = vpop.f32.mrb[20].mxu1 }
 0x36a   : > { %v2689_v23 = vadd.f32 %v2688_v33, %v9854_v40  ;;  %v2690_v20 = vpop.f32.mrb[21].mxu0  ;;  %v2762_v41 = vadd.f32 %v2761_v39, %v9857_v54  ;;  %v2763_v43 = vpop.f32.mrb[21].mxu1 }
 0x36b   : > { %v2691_v42 = vadd.f32 %v2690_v20, %v9860_v49  ;;  %v2692_v44 = vpop.f32.mrb[22].mxu0  ;;  %v2764_v45 = vadd.f32 %v2763_v43, %v9863_v13  ;;  %v2765_v46 = vpop.f32.mrb[22].mxu1 }
 0x36c   : > { %2810 = vst [vmem:[#allocation2 + $0xa0] sm:$0xff] %v2689_v23  ;;  %v2693_v19 = vadd.f32 %v2692_v44, %v9854_v40  ;;  %v2694_v47 = vpop.f32.mrb[23].mxu0  ;;  %2812 = vst [vmem:[#allocation2 + $0xb0] sm:$0xff] %v2762_v41  ;;  %v2766_v50 = vadd.f32 %v2765_v46, %v9857_v54  ;;  %v2767_v52 = vpop.f32.mrb[23].mxu1 }
 0x36d   : > { %2811 = vst [vmem:[#allocation2 + $0xa8] sm:$0xff] %v2691_v42  ;;  %v2695_v51 = vadd.f32 %v2694_v47, %v9860_v49  ;;  %2813 = vst [vmem:[#allocation2 + $0xb8] sm:$0xff] %v2764_v45  ;;  %v2768_v53 = vadd.f32 %v2767_v52, %v9863_v13 }
 0x36e   : > { %2818 = vst [vmem:[#allocation2 + $0xe0] sm:$0xff] %v2693_v19  ;;  %2820 = vst [vmem:[#allocation2 + $0xf0] sm:$0xff] %v2766_v50 }
 0x36f   : > { %2819 = vst [vmem:[#allocation2 + $0xe8] sm:$0xff] %v2695_v51  ;;  %2821 = vst [vmem:[#allocation2 + $0xf8] sm:$0xff] %v2768_v53 }
 0x371   : > { %v2698_v55 = vpop.f32.mrb[24].mxu0  ;;  %v2771_v59 = vpop.f32.mrb[24].mxu1 }
 0x372   : > { %v2699_v58 = vadd.f32 %v2698_v55, %v9854_v40  ;;  %v2700_v60 = vpop.f32.mrb[25].mxu0  ;;  %v2772_v62 = vadd.f32 %v2771_v59, %v9857_v54  ;;  %v2773_v0 = vpop.f32.mrb[25].mxu1 }
 0x373   : > { %v2701_v63 = vadd.f32 %v2700_v60, %v9860_v49  ;;  %v2702_v1 = vpop.f32.mrb[26].mxu0  ;;  %v2774_v2 = vadd.f32 %v2773_v0, %v9863_v13  ;;  %v2775_v5 = vpop.f32.mrb[26].mxu1 }
 0x374   : > { %2826 = vst [vmem:[#allocation2 + $0x120] sm:$0xff] %v2699_v58  ;;  %v2703_v3 = vadd.f32 %v2702_v1, %v9854_v40  ;;  %v2704_v6 = vpop.f32.mrb[27].mxu0  ;;  %2828 = vst [vmem:[#allocation2 + $0x130] sm:$0xff] %v2772_v62  ;;  %v2776_v7 = vadd.f32 %v2775_v5, %v9857_v54  ;;  %v2777_v12 = vpop.f32.mrb[27].mxu1 }
 0x375   : > { %2827 = vst [vmem:[#allocation2 + $0x128] sm:$0xff] %v2701_v63  ;;  %v2705_v48 = vadd.f32 %v2704_v6, %v9860_v49  ;;  %2829 = vst [vmem:[#allocation2 + $0x138] sm:$0xff] %v2774_v2  ;;  %v2778_v38 = vadd.f32 %v2777_v12, %v9863_v13 }
 0x376   : > { %2834 = vst [vmem:[#allocation2 + $0x160] sm:$0xff] %v2703_v3  ;;  %2836 = vst [vmem:[#allocation2 + $0x170] sm:$0xff] %v2776_v7 }
 0x377   : > { %2835 = vst [vmem:[#allocation2 + $0x168] sm:$0xff] %v2705_v48  ;;  %2837 = vst [vmem:[#allocation2 + $0x178] sm:$0xff] %v2778_v38 }
 0x379   : > { %v2708_v9 = vpop.f32.mrb[28].mxu0  ;;  %v2781_v14 = vpop.f32.mrb[28].mxu1 }
 0x37a   : > { %v2709_v35 = vadd.f32 %v2708_v9, %v9854_v40  ;;  %v2710_v15 = vpop.f32.mrb[29].mxu0  ;;  %v2782_v16 = vadd.f32 %v2781_v14, %v9857_v54  ;;  %v2783_v18 = vpop.f32.mrb[29].mxu1 }
 0x37b   : > { %v2711_v17 = vadd.f32 %v2710_v15, %v9860_v49  ;;  %v2712_v11 = vpop.f32.mrb[30].mxu0  ;;  %v2784_v31 = vadd.f32 %v2783_v18, %v9863_v13  ;;  %v2785_v21 = vpop.f32.mrb[30].mxu1 }
 0x37c   : > { %2842 = vst [vmem:[#allocation2 + $0x1a0] sm:$0xff] %v2709_v35  ;;  %v2713_v10 = vadd.f32 %v2712_v11, %v9854_v40  ;;  %v2714_v32 = vpop.f32.mrb[31].mxu0  ;;  %2844 = vst [vmem:[#allocation2 + $0x1b0] sm:$0xff] %v2782_v16  ;;  %v2786_v24 = vadd.f32 %v2785_v21, %v9857_v54  ;;  %v2787_v26 = vpop.f32.mrb[31].mxu1 }
 0x37d   : > { %2843 = vst [vmem:[#allocation2 + $0x1a8] sm:$0xff] %v2711_v17  ;;  %v2715_v25 = vadd.f32 %v2714_v32, %v9860_v49  ;;  %2845 = vst [vmem:[#allocation2 + $0x1b8] sm:$0xff] %v2784_v31  ;;  %v2788_v27 = vadd.f32 %v2787_v26, %v9863_v13 }
 0x37e   : > { %2850 = vst [vmem:[#allocation2 + $0x1e0] sm:$0xff] %v2713_v10  ;;  %2852 = vst [vmem:[#allocation2 + $0x1f0] sm:$0xff] %v2786_v24 }
 0x37f   : > { %2851 = vst [vmem:[#allocation2 + $0x1e8] sm:$0xff] %v2715_v25  ;;  %2853 = vst [vmem:[#allocation2 + $0x1f8] sm:$0xff] %v2788_v27 }
 0x380 PF: > { %v2859_v40 = vld [vmem:[%s9291_s20] sm:$0xff]  ;;  %v2860_v29 = vld [vmem:[%s9291_s20 + $0x8] sm:$0xff]  ;;  %v11331_v22 = vmov 0   ;;  %v2861_v27 = vld [vmem:[%s9291_s20 + $0x10] sm:$0xff]  ;;  %p8631_p1 = scmp.ne.s32.totalorder %s9176_s27, 2 }
 0x381   : > { %v2863_v54 = vld [vmem:[%s9291_s20 + $0x20] sm:$0xff]  ;;  %v2864_v30 = vld [vmem:[%s9291_s20 + $0x28] sm:$0xff]  ;;  %3275 = vmatprep.mubr.bf16.mxu0 %v11331_v22  ;;  %3316 = vmatprep.mubr.bf16.mxu1 %v11331_v22  ;;  %vm7713_vm0 = vcmask (!%p8631_p1), 7168  }
 0x382   : > { %v2867_v49 = vld [vmem:[%s9291_s20 + $0x40] sm:$0xff]  ;;  %v9900_v28 = vcombine.high %v2859_v40, %v2863_v54  ;;  %v9902_v13 = vcombine.low %v2859_v40, %v2863_v54  ;;  %v9911_v34 = vcombine.high %v2860_v29, %v2864_v30  ;;  %v9913_v36 = vcombine.low %v2860_v29, %v2864_v30  ;;  %v2868_v56 = vld [vmem:[%s9291_s20 + $0x48] sm:$0xff]  ;;  %v2865_v40 = vld [vmem:[%s9291_s20 + $0x30] sm:$0xff] }
 0x383   : > { %v2871_v61 = vld [vmem:[%s9291_s20 + $0x60] sm:$0xff]  ;;  %v2872_v4 = vld [vmem:[%s9291_s20 + $0x68] sm:$0xff]  ;;  %v2862_v54 = vld [vmem:[%s9291_s20 + $0x18] sm:$0xff] }
 0x384   : > { %v9909_v57 = vcombine.high %v2867_v49, %v2871_v61  ;;  %v2875_v8 = vld [vmem:[%s9291_s20 + $0x80] sm:$0xff]  ;;  %3243 = vmatprep.subr.bf16.mxu0 %v9900_v28  ;;  %3284 = vmatprep.subr.bf16.mxu1 %v9911_v34  ;;  %v9922_v33 = vcombine.low %v2867_v49, %v2871_v61  ;;  %v9924_v23 = vcombine.high %v2868_v56, %v2872_v4  ;;  %v2876_v39 = vld [vmem:[%s9291_s20 + $0x88] sm:$0xff]  ;;  %v2866_v49 = vld [vmem:[%s9291_s20 + $0x38] sm:$0xff] }
 0x385   : > { %v2879_v37 = vld [vmem:[%s9291_s20 + $0xa0] sm:$0xff]  ;;  %3244 = vmatpush1.bf16.msra.mxu0 %v9902_v13  ;;  %v2880_v20 = vld [vmem:[%s9291_s20 + $0xa8] sm:$0xff]  ;;  %3285 = vmatpush1.bf16.msra.mxu1 %v9913_v36  ;;  %v9932_v42 = vcombine.low %v2868_v56, %v2872_v4  ;;  %v2869_v56 = vld [vmem:[%s9291_s20 + $0x50] sm:$0xff] }
 0x386   : > { %3245 = vmatprep.subr.bf16.mxu0 %v9909_v57  ;;  %v9930_v41 = vcombine.high %v2875_v8, %v2879_v37  ;;  %3286 = vmatprep.subr.bf16.mxu1 %v9924_v23  ;;  %v2883_v43 = vld [vmem:[%s9291_s20 + $0xc0] sm:$0xff]  ;;  %v9937_v45 = vcombine.high %v2876_v39, %v2880_v20  ;;  %v2884_v19 = vld [vmem:[%s9291_s20 + $0xc8] sm:$0xff]  ;;  %v9942_v47 = vcombine.low %v2875_v8, %v2879_v37  ;;  %v2873_v4 = vld [vmem:[%s9291_s20 + $0x70] sm:$0xff] }
 0x387   : > { %v2887_v44 = vld [vmem:[%s9291_s20 + $0xe0] sm:$0xff]  ;;  %v2888_v46 = vld [vmem:[%s9291_s20 + $0xe8] sm:$0xff]  ;;  %v9948_v51 = vcombine.low %v2876_v39, %v2880_v20  ;;  %v10028_v8 = vcombine.high %v2861_v27, %v2865_v40  ;;  %v10035_v39 = vcombine.high %v2862_v54, %v2866_v49 }
 0x388   : > { %v9946_v50 = vcombine.high %v2883_v43, %v2887_v44  ;;  %v2891_v52 = vld [vmem:[%s9291_s20 + $0x100] sm:$0xff]  ;;  %v9953_v55 = vcombine.high %v2884_v19, %v2888_v46  ;;  %v2892_v58 = vld [vmem:[%s9291_s20 + $0x108] sm:$0xff]  ;;  %v9958_v60 = vcombine.low %v2883_v43, %v2887_v44  ;;  %v9964_v63 = vcombine.low %v2884_v19, %v2888_v46  ;;  %v2870_v43 = vld [vmem:[%s9291_s20 + $0x58] sm:$0xff] }
 0x389   : > { %3246 = vmatpush1.bf16.msra.mxu0 %v9922_v33  ;;  %3287 = vmatpush1.bf16.msra.mxu1 %v9932_v42  ;;  %v2895_v53 = vld [vmem:[%s9291_s20 + $0x120] sm:$0xff]  ;;  %v2896_v59 = vld [vmem:[%s9291_s20 + $0x128] sm:$0xff]  ;;  %v2874_v44 = vld [vmem:[%s9291_s20 + $0x78] sm:$0xff]  ;;  %v10042_v19 = vcombine.low %v2861_v27, %v2865_v40  ;;  %v10046_v46 = vcombine.high %v2869_v56, %v2873_v4 }
 0x38a   : > { %3247 = vmatprep.subr.bf16.mxu0 %v9930_v41  ;;  %3288 = vmatprep.subr.bf16.mxu1 %v9937_v45  ;;  %v9962_v62 = vcombine.high %v2891_v52, %v2895_v53  ;;  %v2899_v0 = vld [vmem:[%s9291_s20 + $0x140] sm:$0xff]  ;;  %v9969_v2 = vcombine.high %v2892_v58, %v2896_v59  ;;  %v2900_v3 = vld [vmem:[%s9291_s20 + $0x148] sm:$0xff]  ;;  %v9974_v6 = vcombine.low %v2891_v52, %v2895_v53  ;;  %v2877_v53 = vld [vmem:[%s9291_s20 + $0x90] sm:$0xff] }
 0x38b   : > { %v2903_v1 = vld [vmem:[%s9291_s20 + $0x160] sm:$0xff]  ;;  %v2904_v5 = vld [vmem:[%s9291_s20 + $0x168] sm:$0xff]  ;;  %v9980_v48 = vcombine.low %v2892_v58, %v2896_v59  ;;  %v10048_v52 = vcombine.low %v2862_v54, %v2866_v49  ;;  %v2881_v58 = vld [vmem:[%s9291_s20 + $0xb0] sm:$0xff]  ;;  %v10053_v59 = vcombine.high %v2870_v43, %v2874_v44 }
 0x38c   : > { %v9978_v7 = vcombine.high %v2899_v0, %v2903_v1  ;;  %v2907_v12 = vld [vmem:[%s9291_s20 + $0x180] sm:$0xff]  ;;  %v9985_v9 = vcombine.high %v2900_v3, %v2904_v5  ;;  %v2908_v35 = vld [vmem:[%s9291_s20 + $0x188] sm:$0xff]  ;;  %v9990_v15 = vcombine.low %v2899_v0, %v2903_v1  ;;  %v9996_v17 = vcombine.low %v2900_v3, %v2904_v5  ;;  %v2878_v0 = vld [vmem:[%s9291_s20 + $0x98] sm:$0xff] }
 0x38d   : > { %3248 = vmatpush1.bf16.msra.mxu0 %v9942_v47  ;;  %3289 = vmatpush1.bf16.msra.mxu1 %v9948_v51  ;;  %v2911_v38 = vld [vmem:[%s9291_s20 + $0x1a0] sm:$0xff]  ;;  %v2912_v14 = vld [vmem:[%s9291_s20 + $0x1a8] sm:$0xff]  ;;  %v2882_v1 = vld [vmem:[%s9291_s20 + $0xb8] sm:$0xff]  ;;  %v10059_v3 = vcombine.low %v2869_v56, %v2873_v4  ;;  %v10064_v5 = vcombine.high %v2877_v53, %v2881_v58 }
 0x38e   : > { %3249 = vmatprep.subr.bf16.mxu0 %v9946_v50  ;;  %3290 = vmatprep.subr.bf16.mxu1 %v9953_v55  ;;  %v9994_v16 = vcombine.high %v2907_v12, %v2911_v38  ;;  %v2915_v18 = vld [vmem:[%s9291_s20 + $0x1c0] sm:$0xff]  ;;  %v10001_v31 = vcombine.high %v2908_v35, %v2912_v14  ;;  %v2916_v10 = vld [vmem:[%s9291_s20 + $0x1c8] sm:$0xff]  ;;  %v10006_v32 = vcombine.low %v2907_v12, %v2911_v38  ;;  %v2885_v38 = vld [vmem:[%s9291_s20 + $0xd0] sm:$0xff] }
 0x38f   : > { %v2919_v11 = vld [vmem:[%s9291_s20 + $0x1e0] sm:$0xff]  ;;  %v2920_v21 = vld [vmem:[%s9291_s20 + $0x1e8] sm:$0xff]  ;;  %v10012_v25 = vcombine.low %v2908_v35, %v2912_v14  ;;  %v10066_v12 = vcombine.low %v2870_v43, %v2874_v44  ;;  %v2889_v35 = vld [vmem:[%s9291_s20 + $0xf0] sm:$0xff]  ;;  %v10071_v14 = vcombine.high %v2878_v0, %v2882_v1  ;;  %v10084_v27 = vcombine.low %v2878_v0, %v2882_v1 }
 0x390   : > { %v10010_v24 = vcombine.high %v2915_v18, %v2919_v11  ;;  %v10015_v26 = vcombine.high %v2916_v10, %v2920_v21  ;;  %v10022_v61 = vcombine.low %v2915_v18, %v2919_v11  ;;  %v2854_v29 = vld [vmem:[%s9308_s19] sm:$0xff]  ;;  %v2855_v30 = vld [vmem:[%s9308_s19 + $0x8] sm:$0xff]  ;;  %v10030_v37 = vcombine.low %v2916_v10, %v2920_v21  ;;  %v2893_v40 = vld [vmem:[%s9291_s20 + $0x110] sm:$0xff] }
 0x391   : > { %3250 = vmatpush1.bf16.msra.mxu0 %v9958_v60  ;;  %3291 = vmatpush1.bf16.msra.mxu1 %v9964_v63  ;;  %v10037_v20 = vpack.c.bf16 %v2855_v30, %v2854_v29  ;;  %v2886_v18 = vld [vmem:[%s9291_s20 + $0xd8] sm:$0xff]  ;;  %v10078_v10 = vcombine.low %v2877_v53, %v2881_v58  ;;  %v10082_v21 = vcombine.high %v2885_v38, %v2889_v35  ;;  %v2897_v54 = vld [vmem:[%s9291_s20 + $0x130] sm:$0xff] }
 0x392   : > { %3251 = vmatprep.subr.bf16.mxu0 %v9962_v62  ;;  %3292 = vmatprep.subr.bf16.mxu1 %v9969_v2  ;;  %v2890_v11 = vld [vmem:[%s9291_s20 + $0xf8] sm:$0xff]  ;;  %11399 = vst [vmem:[#allocation19_spill] sm:$0xff] %v10084_v27  ;;  %v10094_v56 = vcombine.low %v2885_v38, %v2889_v35  ;;  %v10098_v4 = vcombine.high %v2893_v40, %v2897_v54  ;;  %v2901_v44 = vld [vmem:[%s9291_s20 + $0x150] sm:$0xff] }
 0x393   : > { %11398 = vst [vmem:[#allocation18_spill] sm:$0xff] %v10082_v21  ;;  %v10089_v49 = vcombine.high %v2886_v18, %v2890_v11  ;;  %v2894_v29 = vld [vmem:[%s9291_s20 + $0x118] sm:$0xff]  ;;  %v10100_v43 = vcombine.low %v2886_v18, %v2890_v11  ;;  %v2905_v53 = vld [vmem:[%s9291_s20 + $0x170] sm:$0xff]  ;;  %v10110_v38 = vcombine.low %v2893_v40, %v2897_v54 }
 0x394   : > { %v2898_v30 = vld [vmem:[%s9291_s20 + $0x138] sm:$0xff]  ;;  %11401 = vst [vmem:[#allocation21_spill] sm:$0xff] %v10094_v56  ;;  %11402 = vst [vmem:[#allocation22_spill] sm:$0xff] %v10098_v4  ;;  %v10114_v35 = vcombine.high %v2901_v44, %v2905_v53  ;;  %v2909_v11 = vld [vmem:[%s9291_s20 + $0x190] sm:$0xff] }
 0x395   : > { %3252 = vmatpush1.bf16.msra.mxu0 %v9974_v6  ;;  %3293 = vmatpush1.bf16.msra.mxu1 %v9980_v48  ;;  %11400 = vst [vmem:[#allocation20_spill] sm:$0xff] %v10089_v49  ;;  %11403 = vst [vmem:[#allocation23_spill] sm:$0xff] %v10100_v43  ;;  %v10105_v58 = vcombine.high %v2894_v29, %v2898_v30  ;;  %v2902_v0 = vld [vmem:[%s9291_s20 + $0x158] sm:$0xff]  ;;  %v10116_v18 = vcombine.low %v2894_v29, %v2898_v30 }
 0x396   : > { %3253 = vmatprep.subr.bf16.mxu0 %v9978_v7  ;;  %3294 = vmatprep.subr.bf16.mxu1 %v9985_v9  ;;  %v2906_v1 = vld [vmem:[%s9291_s20 + $0x178] sm:$0xff] }
 0x397   : > { %11404 = vst [vmem:[#allocation24_spill] sm:$0xff] %v10105_v58  ;;  %v2910_v40 = vld [vmem:[%s9291_s20 + $0x198] sm:$0xff]  ;;  %v10132_v30 = vcombine.low %v2902_v0, %v2906_v1 }
 0x398   : > { %v2914_v54 = vld [vmem:[%s9291_s20 + $0x1b8] sm:$0xff] }
 0x399   : > { %3254 = vmatpush1.bf16.msra.mxu0 %v9990_v15  ;;  %3295 = vmatpush1.bf16.msra.mxu1 %v9996_v17 }
 0x39a   : > { %3255 = vmatprep.subr.bf16.mxu0 %v9994_v16  ;;  %3296 = vmatprep.subr.bf16.mxu1 %v10001_v31 }
 0x39d   : > { %3256 = vmatpush1.bf16.msra.mxu0 %v10006_v32  ;;  %3297 = vmatpush1.bf16.msra.mxu1 %v10012_v25 }
 0x39e   : > { %3257 = vmatprep.subr.bf16.mxu0 %v10010_v24  ;;  %3298 = vmatprep.subr.bf16.mxu1 %v10015_v26 }
 0x3a1   : > { %3258 = vmatpush1.bf16.msra.mxu0 %v10022_v61  ;;  %3299 = vmatpush1.bf16.msra.mxu1 %v10030_v37 }
 0x3a2   : > { %3325 = vmatprep.subr.bf16.mxu0 %v10028_v8  ;;  %3366 = vmatprep.subr.bf16.mxu1 %v10035_v39 }
 0x3a4   : > { %3276 = vmatmul.mubr.bf16.vlgmr.msra.gmra.mrb[0].mxu0 %v10037_v20  ;;  %3317 = vmatmul.mubr.bf16.vlgmr.msra.gmra.mrb[0].mxu1 %v10037_v20 }
 0x3a5   : > { %3326 = vmatpush1.bf16.msra.mxu0 %v10042_v19  ;;  %3367 = vmatpush1.bf16.msra.mxu1 %v10048_v52 }
 0x3a6   : > { %3327 = vmatprep.subr.bf16.mxu0 %v10046_v46  ;;  %3368 = vmatprep.subr.bf16.mxu1 %v10053_v59 }
 0x3a7   : > { %3357 = vmatprep.mubr.bf16.mxu0 %v11331_v22  ;;  %3398 = vmatprep.mubr.bf16.mxu1 %v11331_v22  ;;  %v2913_v22 = vld [vmem:[%s9291_s20 + $0x1b0] sm:$0xff] }
 0x3a8   : > { %v10130_v29 = vcombine.high %v2909_v11, %v2913_v22 }
 0x3a9   : > { %3328 = vmatpush1.bf16.msra.mxu0 %v10059_v3  ;;  %3369 = vmatpush1.bf16.msra.mxu1 %v10066_v12 }
 0x3aa   : > { %3329 = vmatprep.subr.bf16.mxu0 %v10064_v5  ;;  %3370 = vmatprep.subr.bf16.mxu1 %v10071_v14 }
 0x3ad   : > { %3330 = vmatpush1.bf16.msra.mxu0 %v10078_v10  ;;  %3371 = vmatpush1.bf16.msra.mxu1 %v10084_v27  ;;  %v2922_v27 = vld [vmem:[%s9291_s20 + $0x1f8] sm:$0xff] }
 0x3ae   : > { %3331 = vmatprep.subr.bf16.mxu0 %v10082_v21  ;;  %3372 = vmatprep.subr.bf16.mxu1 %v10089_v49  ;;  %v10121_v49 = vcombine.high %v2902_v0, %v2906_v1  ;;  %v2918_v21 = vld [vmem:[%s9291_s20 + $0x1d8] sm:$0xff]  ;;  %v10148_v0 = vcombine.low %v2910_v40, %v2914_v54 }
 0x3af   : > { %v10151_v1 = vcombine.high %v2918_v21, %v2922_v27 }
 0x3b0   : > { %11405 = vst [vmem:[#allocation25_spill] sm:$0xff] %v10121_v49 }
 0x3b1   : > { %3332 = vmatpush1.bf16.msra.mxu0 %v10094_v56  ;;  %3373 = vmatpush1.bf16.msra.mxu1 %v10100_v43  ;;  %v2921_v43 = vld [vmem:[%s9291_s20 + $0x1f0] sm:$0xff]  ;;  %v10137_v56 = vcombine.high %v2910_v40, %v2914_v54 }
 0x3b2   : > { %3333 = vmatprep.subr.bf16.mxu0 %v10098_v4  ;;  %3374 = vmatprep.subr.bf16.mxu1 %v10105_v58  ;;  %v10126_v4 = vcombine.low %v2901_v44, %v2905_v53  ;;  %v2917_v58 = vld [vmem:[%s9291_s20 + $0x1d0] sm:$0xff]  ;;  %v10142_v44 = vcombine.low %v2909_v11, %v2913_v22  ;;  %v10158_v22 = vcombine.low %v2918_v21, %v2922_v27  ;;  %v11406_v21 = vmov 0   ;;  %v3416_v27 = vld [vmem:[#allocation2 + $0x1e8] sm:$0xff] }
 0x3b3   : > { %v10146_v53 = vcombine.high %v2917_v58, %v2921_v43  ;;  %v3417_v54 = vld [vmem:[#allocation2 + $0x1f0] sm:$0xff] }
 0x3b5   : > { %3334 = vmatpush1.bf16.msra.mxu0 %v10110_v38  ;;  %3375 = vmatpush1.bf16.msra.mxu1 %v10116_v18 }
 0x3b6   : > { %3335 = vmatprep.subr.bf16.mxu0 %v10114_v35  ;;  %3376 = vmatprep.subr.bf16.mxu1 %v10121_v49  ;;  %v10154_v49 = vcombine.low %v2917_v58, %v2921_v43 }
 0x3b9   : > { %3336 = vmatpush1.bf16.msra.mxu0 %v10126_v4  ;;  %3377 = vmatpush1.bf16.msra.mxu1 %v10132_v30 }
 0x3ba   : > { %3337 = vmatprep.subr.bf16.mxu0 %v10130_v29  ;;  %3378 = vmatprep.subr.bf16.mxu1 %v10137_v56 }
 0x3bd   : > { %3338 = vmatpush1.bf16.msra.mxu0 %v10142_v44  ;;  %3379 = vmatpush1.bf16.msra.mxu1 %v10148_v0 }
 0x3be   : > { %3339 = vmatprep.subr.bf16.mxu0 %v10146_v53  ;;  %3380 = vmatprep.subr.bf16.mxu1 %v10151_v1 }
 0x3c1   : > { %3340 = vmatpush1.bf16.msra.mxu0 %v10154_v49  ;;  %3381 = vmatpush1.bf16.msra.mxu1 %v10158_v22 }
 0x3c2   : > { %3846 = vmatprep.subr.bf16.mxu0 %v9900_v28  ;;  %3887 = vmatprep.subr.bf16.mxu1 %v9911_v34  ;;  %v3407_v28 = vld [vmem:[#allocation2] sm:$0xff]  ;;  %v3409_v34 = vld [vmem:[#allocation2 + $0x10] sm:$0xff] }
 0x3c4   : > { %3358 = vmatmul.mubr.bf16.vlgmr.msra.gmra.mrb[4].mxu0 %v10037_v20  ;;  %3399 = vmatmul.mubr.bf16.vlgmr.msra.gmra.mrb[4].mxu1 %v10037_v20 }
 0x3c5   : > { %3847 = vmatpush1.bf16.msra.mxu0 %v9902_v13  ;;  %3888 = vmatpush1.bf16.msra.mxu1 %v9913_v36  ;;  %v3408_v13 = vld [vmem:[#allocation2 + $0x8] sm:$0xff] }
 0x3c6   : > { %3848 = vmatprep.subr.bf16.mxu0 %v9909_v57  ;;  %3889 = vmatprep.subr.bf16.mxu1 %v9924_v23 }
 0x3c7   : > { %3878 = vmatprep.mubr.bf16.mxu0 %v11406_v21  ;;  %3919 = vmatprep.mubr.bf16.mxu1 %v11406_v21 }
 0x3c9   : > { %3849 = vmatpush1.bf16.msra.mxu0 %v9922_v33  ;;  %3890 = vmatpush1.bf16.msra.mxu1 %v9932_v42 }
 0x3ca   : > { %3850 = vmatprep.subr.bf16.mxu0 %v9930_v41  ;;  %3891 = vmatprep.subr.bf16.mxu1 %v9937_v45 }
 0x3cd   : > { %3851 = vmatpush1.bf16.msra.mxu0 %v9942_v47  ;;  %3892 = vmatpush1.bf16.msra.mxu1 %v9948_v51 }
 0x3ce   : > { %3852 = vmatprep.subr.bf16.mxu0 %v9946_v50  ;;  %3893 = vmatprep.subr.bf16.mxu1 %v9953_v55 }
 0x3d1   : > { %3853 = vmatpush1.bf16.msra.mxu0 %v9958_v60  ;;  %3894 = vmatpush1.bf16.msra.mxu1 %v9964_v63  ;;  %v3410_v63 = vld [vmem:[#allocation2 + $0x18] sm:$0xff] }
 0x3d2   : > { %3854 = vmatprep.subr.bf16.mxu0 %v9962_v62  ;;  %3895 = vmatprep.subr.bf16.mxu1 %v9969_v2 }
 0x3d5   : > { %3855 = vmatpush1.bf16.msra.mxu0 %v9974_v6  ;;  %3896 = vmatpush1.bf16.msra.mxu1 %v9980_v48 }
 0x3d6   : > { %3856 = vmatprep.subr.bf16.mxu0 %v9978_v7  ;;  %3897 = vmatprep.subr.bf16.mxu1 %v9985_v9 }
 0x3d9   : > { %3857 = vmatpush1.bf16.msra.mxu0 %v9990_v15  ;;  %3898 = vmatpush1.bf16.msra.mxu1 %v9996_v17 }
 0x3da   : > { %3858 = vmatprep.subr.bf16.mxu0 %v9994_v16  ;;  %3899 = vmatprep.subr.bf16.mxu1 %v10001_v31  ;;  %v2856_v31 = vld [vmem:[%s9313_s29] sm:$0xff] }
 0x3dd   : > { %3859 = vmatpush1.bf16.msra.mxu0 %v10006_v32  ;;  %3900 = vmatpush1.bf16.msra.mxu1 %v10012_v25 }
 0x3de   : > { %3860 = vmatprep.subr.bf16.mxu0 %v10010_v24  ;;  %3901 = vmatprep.subr.bf16.mxu1 %v10015_v26 }
 0x3e1   : > { %3861 = vmatpush1.bf16.msra.mxu0 %v10022_v61  ;;  %3902 = vmatpush1.bf16.msra.mxu1 %v10030_v37 }
 0x3e2   : > { %3928 = vmatprep.subr.bf16.mxu0 %v10028_v8  ;;  %3969 = vmatprep.subr.bf16.mxu1 %v10035_v39  ;;  %v3415_v39 = vld [vmem:[#allocation2 + $0x1e0] sm:$0xff] }
 0x477   : > { %v3277_v57 = vpop.f32.mrb[0].mxu0  ;;  %v3318_v23 = vpop.f32.mrb[0].mxu1 }
 0x478   : > { %v3411_v36 = vadd.f32 %v3407_v28, %v3277_v57  ;;  %v3279_v33 = vpop.f32.mrb[1].mxu0  ;;  %v3320_v45 = vpop.f32.mrb[1].mxu1  ;;  %v3413_v51 = vadd.f32 %v3409_v34, %v3318_v23 }
 0x479   : > { %v3412_v41 = vadd.f32 %v3408_v13, %v3279_v33  ;;  %v3281_v42 = vpop.f32.mrb[2].mxu0  ;;  %v3322_v55 = vpop.f32.mrb[2].mxu1  ;;  %v3414_v2 = vadd.f32 %v3410_v63, %v3320_v45 }
 0x47a   : > { %v3423_v47 = vmul.f32 0.5, %v3411_v36  ;;  %v3282_v50 = vpop.f32.mrb[3].mxu0  ;;  %v3323_v62 = vpop.f32.mrb[3].mxu1 }
 0x47b   : > { %v3424_v60 = vmul.f32 0.5, %v3412_v41  ;;  %v3439_v6 = vmul.f32 0.5, %v3414_v2 }
 0x47c   : > { %8715 = vtanh.f32 %v3423_v47  ;;  %v3418_v47 = vld [vmem:[#allocation2 + $0x1f8] sm:$0xff] }
 0x47d   : > { %8717 = vtanh.f32 %v3424_v60 }
 0x47e   : > { %8719 = vtanh.f32 %v3413_v51 }
 0x47f   : > { %8721 = vtanh.f32 %v3439_v6 }
 0x486   : > { %v8716_v7 = vpop.eup %8715 }
 0x487   : > { %v8718_v48 = vpop.eup %8717  ;;  %v3431_v9 = vmul.f32 0.5, %v8716_v7  ;;  %v2857_v7 = vld [vmem:[%s9313_s29 + $0x8] sm:$0xff] }
 0x488   : > { %v8720_v15 = vpop.eup %8719  ;;  %v3432_v16 = vmul.f32 0.5, %v8718_v48 }
 0x489   : > { %v3435_v17 = vadd.f32 0.5, %v3431_v9  ;;  %v8722_v61 = vpop.eup %8721 }
 0x48a   : > { %v3436_v32 = vadd.f32 0.5, %v3432_v16  ;;  %v3443_v8 = vmul.f32 0.5, %v8722_v61 }
 0x48b   : > { %v3451_v24 = vmul.f32 %v8720_v15, %v3435_v17 }
 0x48c   : > { %v3449_v25 = vmul.f32 %v3436_v32, %v2856_v31  ;;  %v3445_v58 = vadd.f32 0.5, %v3443_v8  ;;  %v11411_v8 = vld [vmem:[#allocation23_spill] sm:$0xff] }
 0x48e   : > { %v10202_v26 = vadd.f32 %v3451_v24, %v3449_v25 }
 0x490   : > { %8723 = vtanh.f32 %v10202_v26 }
 0x497   : > { %v3359_v37 = vpop.f32.mrb[4].mxu0  ;;  %v3400_v43 = vpop.f32.mrb[4].mxu1 }
 0x498   : > { %v3360_v20 = vpop.f32.mrb[5].mxu0  ;;  %v3401_v40 = vpop.f32.mrb[5].mxu1  ;;  %v11412_v37 = vld [vmem:[#allocation22_spill] sm:$0xff] }
 0x499   : > { %v3361_v11 = vpop.f32.mrb[6].mxu0  ;;  %v3402_v34 = vpop.f32.mrb[6].mxu1  ;;  %v4085_v20 = vld [vmem:[%s9291_s20 + $0xa0] sm:$0xff] }
 0x49a   : > { %v8724_v28 = vpop.eup %8723  ;;  %v3419_v13 = vadd.f32 %v3415_v39, %v3361_v11  ;;  %v3363_v57 = vpop.f32.mrb[7].mxu0  ;;  %v3421_v42 = vadd.f32 %v3417_v54, %v3402_v34  ;;  %v4081_v39 = vld [vmem:[%s9291_s20 + $0x80] sm:$0xff] }
 0x49b   : > { %v3457_v36 = vmul.f32 %v8724_v28, %v3445_v58  ;;  %v3420_v33 = vadd.f32 %v3416_v27, %v3363_v57  ;;  %v3404_v23 = vpop.f32.mrb[7].mxu1  ;;  %v4082_v27 = vld [vmem:[%s9291_s20 + $0x88] sm:$0xff]  ;;  %v10278_v43 = vcombine.high %v4081_v39, %v4085_v20  ;;  %v10281_v11 = vcombine.low %v4081_v39, %v4085_v20  ;;  %v4089_v28 = vld [vmem:[%s9291_s20 + $0xc0] sm:$0xff]  ;;  %v4072_v39 = vld [vmem:[%s9291_s20 + $0x38] sm:$0xff] }
 0x49c   : > { %v3425_v41 = vmul.f32 0.5, %v3419_v13  ;;  %v3422_v50 = vadd.f32 %v3418_v47, %v3404_v23  ;;  %v4086_v58 = vld [vmem:[%s9291_s20 + $0xa8] sm:$0xff]  ;;  %v4093_v13 = vld [vmem:[%s9291_s20 + $0xe0] sm:$0xff] }
 0x49d   : > { %3459 = vst [vmem:[#allocation3] sm:$0xff] %v3457_v36  ;;  %v3426_v45 = vmul.f32 0.5, %v3420_v33  ;;  %v10283_v40 = vcombine.low %v4082_v27, %v4086_v58  ;;  %v10285_v54 = vcombine.high %v4082_v27, %v4086_v58  ;;  %v4090_v57 = vld [vmem:[%s9291_s20 + $0xc8] sm:$0xff]  ;;  %v10294_v34 = vcombine.high %v4089_v28, %v4093_v13  ;;  %v4010_v58 = vld [vmem:[#allocation2 + $0x40] sm:$0xff] }
 0x49e   : > { %8725 = vtanh.f32 %v3425_v41  ;;  %v3440_v51 = vmul.f32 0.5, %v3422_v50  ;;  %v10297_v33 = vcombine.low %v4089_v28, %v4093_v13  ;;  %v4098_v47 = vld [vmem:[%s9291_s20 + $0x108] sm:$0xff] }
 0x49f   : > { %8727 = vtanh.f32 %v3426_v45  ;;  %v4101_v45 = vld [vmem:[%s9291_s20 + $0x120] sm:$0xff] }
 0x4a0   : > { %8729 = vtanh.f32 %v3421_v42  ;;  %v4097_v42 = vld [vmem:[%s9291_s20 + $0x100] sm:$0xff] }
 0x4a1   : > { %8731 = vtanh.f32 %v3440_v51  ;;  %v10310_v50 = vcombine.high %v4097_v42, %v4101_v45  ;;  %v4102_v51 = vld [vmem:[%s9291_s20 + $0x128] sm:$0xff] }
 0x4a2   : > { %v4011_v28 = vld [vmem:[#allocation2 + $0x48] sm:$0xff] }
 0x4a8   : > { %v8726_v55 = vpop.eup %8725 }
 0x4a9   : > { %v8728_v60 = vpop.eup %8727  ;;  %v3433_v62 = vmul.f32 0.5, %v8726_v55  ;;  %v10313_v55 = vcombine.low %v4097_v42, %v4101_v45 }
 0x4aa   : > { %v8730_v63 = vpop.eup %8729  ;;  %v3434_v2 = vmul.f32 0.5, %v8728_v60  ;;  %v10315_v60 = vcombine.low %v4098_v47, %v4102_v51 }
 0x4ab   : > { %v3437_v6 = vadd.f32 0.5, %v3433_v62  ;;  %v8732_v17 = vpop.eup %8731  ;;  %v10317_v62 = vcombine.high %v4098_v47, %v4102_v51  ;;  %v4012_v47 = vld [vmem:[#allocation2 + $0x50] sm:$0xff] }
 0x4ac   : > { %v3438_v48 = vadd.f32 0.5, %v3434_v2  ;;  %v3444_v31 = vmul.f32 0.5, %v8732_v17  ;;  %v4109_v2 = vld [vmem:[%s9291_s20 + $0x160] sm:$0xff] }
 0x4ad   : > { %v3452_v9 = vmul.f32 %v8730_v63, %v3437_v6  ;;  %v4105_v63 = vld [vmem:[%s9291_s20 + $0x140] sm:$0xff]  ;;  %v4106_v6 = vld [vmem:[%s9291_s20 + $0x148] sm:$0xff] }
 0x4ae   : > { %v3450_v15 = vmul.f32 %v3438_v48, %v2857_v7  ;;  %v3446_v32 = vadd.f32 0.5, %v3444_v31  ;;  %v10326_v7 = vcombine.high %v4105_v63, %v4109_v2  ;;  %v4110_v48 = vld [vmem:[%s9291_s20 + $0x168] sm:$0xff]  ;;  %v4113_v31 = vld [vmem:[%s9291_s20 + $0x180] sm:$0xff] }
 0x4af   : > { %v10333_v17 = vcombine.high %v4106_v6, %v4110_v48 }
 0x4b0   : > { %v10206_v16 = vadd.f32 %v3452_v9, %v3450_v15  ;;  %v10329_v9 = vcombine.low %v4105_v63, %v4109_v2  ;;  %v10331_v15 = vcombine.low %v4106_v6, %v4110_v48 }
 0x4b2   : > { %8733 = vtanh.f32 %v10206_v16 }
 0x4bc   : > { %v8734_v24 = vpop.eup %8733 }
 0x4bd   : > { %v3458_v25 = vmul.f32 %v8734_v24, %v3446_v32  ;;  %v4117_v32 = vld [vmem:[%s9291_s20 + $0x1a0] sm:$0xff]  ;;  %v4114_v24 = vld [vmem:[%s9291_s20 + $0x188] sm:$0xff] }
 0x4bf   : > { %3460 = vst [vmem:[#allocation3 + $0x78] sm:$0xff] %v3458_v25  ;;  %v3461_v61 = vpack.c.bf16 %v3458_v25, %v3457_v36  ;;  %v4094_v36 = vld [vmem:[%s9291_s20 + $0xe8] sm:$0xff]  ;;  %v10342_v25 = vcombine.high %v4113_v31, %v4117_v32 }
 0x4c0   : > { %v10299_v23 = vcombine.low %v4090_v57, %v4094_v36  ;;  %v10301_v41 = vcombine.high %v4090_v57, %v4094_v36 }
 0x4c1   : > { %3879 = vmatmul.mubr.bf16.vlgmr.msra.gmra.mrb[8].mxu0 %v3461_v61  ;;  %3920 = vmatmul.mubr.bf16.vlgmr.msra.gmra.mrb[8].mxu1 %v3461_v61 }
 0x4c2   : > { %3929 = vmatpush1.bf16.msra.mxu0 %v10042_v19  ;;  %3970 = vmatpush1.bf16.msra.mxu1 %v10048_v52  ;;  %v11407_v19 = vld [vmem:[#allocation19_spill] sm:$0xff]  ;;  %v11408_v52 = vld [vmem:[#allocation18_spill] sm:$0xff] }
 0x4c3   : > { %3930 = vmatprep.subr.bf16.mxu0 %v10046_v46  ;;  %3971 = vmatprep.subr.bf16.mxu1 %v10053_v59  ;;  %v11409_v46 = vld [vmem:[#allocation20_spill] sm:$0xff]  ;;  %v11410_v59 = vld [vmem:[#allocation21_spill] sm:$0xff] }
 0x4c4   : > { %3960 = vmatprep.mubr.bf16.mxu0 %v11406_v21  ;;  %4001 = vmatprep.mubr.bf16.mxu1 %v11406_v21 }
 0x4c6   : > { %3931 = vmatpush1.bf16.msra.mxu0 %v10059_v3  ;;  %3972 = vmatpush1.bf16.msra.mxu1 %v10066_v12  ;;  %v11413_v3 = vld [vmem:[#allocation24_spill] sm:$0xff] }
 0x4c7   : > { %3932 = vmatprep.subr.bf16.mxu0 %v10064_v5  ;;  %3973 = vmatprep.subr.bf16.mxu1 %v10071_v14  ;;  %v11414_v5 = vld [vmem:[#allocation25_spill] sm:$0xff]  ;;  %v4065_v12 = vld [vmem:[%s9291_s20] sm:$0xff] }
 0x4c8   : > { %v4069_v14 = vld [vmem:[%s9291_s20 + $0x20] sm:$0xff] }
 0x4ca   : > { %3933 = vmatpush1.bf16.msra.mxu0 %v10078_v10  ;;  %3974 = vmatpush1.bf16.msra.mxu1 %v11407_v19  ;;  %v4066_v10 = vld [vmem:[%s9291_s20 + $0x8] sm:$0xff]  ;;  %v10345_v19 = vcombine.low %v4113_v31, %v4117_v32 }
 0x4cb   : > { %3934 = vmatprep.subr.bf16.mxu0 %v11408_v52  ;;  %3975 = vmatprep.subr.bf16.mxu1 %v11409_v46 }
 0x4ce   : > { %3935 = vmatpush1.bf16.msra.mxu0 %v11410_v59  ;;  %3976 = vmatpush1.bf16.msra.mxu1 %v11411_v8  ;;  %v4121_v59 = vld [vmem:[%s9291_s20 + $0x1c0] sm:$0xff] }
 0x4cf   : > { %3936 = vmatprep.subr.bf16.mxu0 %v11412_v37  ;;  %3977 = vmatprep.subr.bf16.mxu1 %v11413_v3  ;;  %v4125_v8 = vld [vmem:[%s9291_s20 + $0x1e0] sm:$0xff]  ;;  %v4122_v37 = vld [vmem:[%s9291_s20 + $0x1c8] sm:$0xff] }
 0x4d0   : > { %v10358_v3 = vcombine.high %v4121_v59, %v4125_v8 }
 0x4d2   : > { %3937 = vmatpush1.bf16.msra.mxu0 %v10110_v38  ;;  %3978 = vmatpush1.bf16.msra.mxu1 %v10116_v18  ;;  %v10249_v38 = vcombine.low %v4065_v12, %v4069_v14  ;;  %v4073_v18 = vld [vmem:[%s9291_s20 + $0x40] sm:$0xff] }
 0x4d3   : > { %3938 = vmatprep.subr.bf16.mxu0 %v10114_v35  ;;  %3979 = vmatprep.subr.bf16.mxu1 %v11414_v5  ;;  %v4126_v5 = vld [vmem:[%s9291_s20 + $0x1e8] sm:$0xff] }
 0x4d6   : > { %3939 = vmatpush1.bf16.msra.mxu0 %v10126_v4  ;;  %3980 = vmatpush1.bf16.msra.mxu1 %v10132_v30  ;;  %v4070_v4 = vld [vmem:[%s9291_s20 + $0x28] sm:$0xff] }
 0x4d7   : > { %3940 = vmatprep.subr.bf16.mxu0 %v10130_v29  ;;  %3981 = vmatprep.subr.bf16.mxu1 %v10137_v56  ;;  %v10246_v56 = vcombine.high %v4065_v12, %v4069_v14  ;;  %v10253_v35 = vcombine.high %v4066_v10, %v4070_v4  ;;  %v4077_v29 = vld [vmem:[%s9291_s20 + $0x60] sm:$0xff]  ;;  %v4074_v30 = vld [vmem:[%s9291_s20 + $0x48] sm:$0xff]  ;;  %v10361_v12 = vcombine.low %v4121_v59, %v4125_v8 }
 0x4d8   : > { %v10363_v14 = vcombine.low %v4122_v37, %v4126_v5 }
 0x4da   : > { %3941 = vmatpush1.bf16.msra.mxu0 %v10142_v44  ;;  %3982 = vmatpush1.bf16.msra.mxu1 %v10148_v0  ;;  %v10262_v44 = vcombine.high %v4073_v18, %v4077_v29  ;;  %v10265_v0 = vcombine.low %v4073_v18, %v4077_v29  ;;  %v4071_v18 = vld [vmem:[%s9291_s20 + $0x30] sm:$0xff]  ;;  %v4068_v29 = vld [vmem:[%s9291_s20 + $0x18] sm:$0xff] }
 0x4db   : > { %3942 = vmatprep.subr.bf16.mxu0 %v10146_v53  ;;  %3983 = vmatprep.subr.bf16.mxu1 %v10151_v1  ;;  %v4078_v53 = vld [vmem:[%s9291_s20 + $0x68] sm:$0xff]  ;;  %v10379_v20 = vcombine.low %v4068_v29, %v4072_v39  ;;  %v10381_v27 = vcombine.high %v4068_v29, %v4072_v39 }
 0x4dc   : > { %v10267_v1 = vcombine.low %v4074_v30, %v4078_v53 }
 0x4de   : > { %3943 = vmatpush1.bf16.msra.mxu0 %v10154_v49  ;;  %3984 = vmatpush1.bf16.msra.mxu1 %v10158_v22  ;;  %v10251_v49 = vcombine.low %v4066_v10, %v4070_v4  ;;  %v10269_v22 = vcombine.high %v4074_v30, %v4078_v53  ;;  %v10365_v10 = vcombine.high %v4122_v37, %v4126_v5  ;;  %v4067_v4 = vld [vmem:[%s9291_s20 + $0x10] sm:$0xff] }
 0x4df   : > { %4449 = vmatprep.subr.bf16.mxu0 %v10246_v56  ;;  %4490 = vmatprep.subr.bf16.mxu1 %v10253_v35  ;;  %v10374_v30 = vcombine.low %v4067_v4, %v4071_v18  ;;  %v10376_v53 = vcombine.high %v4067_v4, %v4071_v18 }
 0x4e1   : > { %3961 = vmatmul.mubr.bf16.vlgmr.msra.gmra.mrb[12].mxu0 %v3461_v61  ;;  %4002 = vmatmul.mubr.bf16.vlgmr.msra.gmra.mrb[12].mxu1 %v3461_v61  ;;  %v4118_v61 = vld [vmem:[%s9291_s20 + $0x1a8] sm:$0xff] }
 0x4e2   : > { %4481 = vmatprep.mubr.bf16.mxu0 %v11406_v21  ;;  %4522 = vmatprep.mubr.bf16.mxu1 %v11406_v21  ;;  %v10347_v52 = vcombine.low %v4114_v24, %v4118_v61  ;;  %v10349_v46 = vcombine.high %v4114_v24, %v4118_v61  ;;  %v4013_v61 = vld [vmem:[#allocation2 + $0x58] sm:$0xff] }
 0x4e3   : > { %4450 = vmatpush1.bf16.msra.mxu0 %v10249_v38  ;;  %4491 = vmatpush1.bf16.msra.mxu1 %v10251_v49 }
 0x4e4   : > { %4451 = vmatprep.subr.bf16.mxu0 %v10262_v44  ;;  %4492 = vmatprep.subr.bf16.mxu1 %v10269_v22 }
 0x4e7   : > { %4452 = vmatpush1.bf16.msra.mxu0 %v10265_v0  ;;  %4493 = vmatpush1.bf16.msra.mxu1 %v10267_v1 }
 0x4e8   : > { %4453 = vmatprep.subr.bf16.mxu0 %v10278_v43  ;;  %4494 = vmatprep.subr.bf16.mxu1 %v10285_v54 }
 0x4eb   : > { %4454 = vmatpush1.bf16.msra.mxu0 %v10281_v11  ;;  %4495 = vmatpush1.bf16.msra.mxu1 %v10283_v40 }
 0x4ec   : > { %4455 = vmatprep.subr.bf16.mxu0 %v10294_v34  ;;  %4496 = vmatprep.subr.bf16.mxu1 %v10301_v41 }
 0x4ef   : > { %4456 = vmatpush1.bf16.msra.mxu0 %v10297_v33  ;;  %4497 = vmatpush1.bf16.msra.mxu1 %v10299_v23 }
 0x4f0   : > { %4457 = vmatprep.subr.bf16.mxu0 %v10310_v50  ;;  %4498 = vmatprep.subr.bf16.mxu1 %v10317_v62 }
 0x4f3   : > { %4458 = vmatpush1.bf16.msra.mxu0 %v10313_v55  ;;  %4499 = vmatpush1.bf16.msra.mxu1 %v10315_v60 }
 0x4f4   : > { %4459 = vmatprep.subr.bf16.mxu0 %v10326_v7  ;;  %4500 = vmatprep.subr.bf16.mxu1 %v10333_v17 }
 0x4f7   : > { %4460 = vmatpush1.bf16.msra.mxu0 %v10329_v9  ;;  %4501 = vmatpush1.bf16.msra.mxu1 %v10331_v15 }
 0x4f8   : > { %4461 = vmatprep.subr.bf16.mxu0 %v10342_v25  ;;  %4502 = vmatprep.subr.bf16.mxu1 %v10349_v46 }
 0x4fb   : > { %4462 = vmatpush1.bf16.msra.mxu0 %v10345_v19  ;;  %4503 = vmatpush1.bf16.msra.mxu1 %v10347_v52 }
 0x4fc   : > { %4463 = vmatprep.subr.bf16.mxu0 %v10358_v3  ;;  %4504 = vmatprep.subr.bf16.mxu1 %v10365_v10 }
 0x4ff   : > { %4464 = vmatpush1.bf16.msra.mxu0 %v10361_v12  ;;  %4505 = vmatpush1.bf16.msra.mxu1 %v10363_v14 }
 0x500   : > { %4531 = vmatprep.subr.bf16.mxu0 %v10376_v53  ;;  %4572 = vmatprep.subr.bf16.mxu1 %v10381_v27 }
 0x594   : > { %v3880_v13 = vpop.f32.mrb[8].mxu0  ;;  %v3921_v57 = vpop.f32.mrb[8].mxu1 }
 0x595   : > { %v4014_v36 = vadd.f32 %v4010_v58, %v3880_v13  ;;  %v3882_v42 = vpop.f32.mrb[9].mxu0  ;;  %v3923_v45 = vpop.f32.mrb[9].mxu1  ;;  %v4016_v24 = vadd.f32 %v4012_v47, %v3921_v57 }
 0x596   : > { %v4015_v51 = vadd.f32 %v4011_v28, %v3882_v42  ;;  %v3884_v63 = vpop.f32.mrb[10].mxu0  ;;  %v3925_v2 = vpop.f32.mrb[10].mxu1  ;;  %v4017_v59 = vadd.f32 %v4013_v61, %v3923_v45 }
 0x597   : > { %v4026_v6 = vmul.f32 0.5, %v4014_v36  ;;  %v3885_v48 = vpop.f32.mrb[11].mxu0  ;;  %v3926_v31 = vpop.f32.mrb[11].mxu1 }
 0x598   : > { %v4027_v32 = vmul.f32 0.5, %v4015_v51  ;;  %v4042_v8 = vmul.f32 0.5, %v4017_v59  ;;  %v4018_v51 = vld [vmem:[#allocation2 + $0x1a0] sm:$0xff] }
 0x599   : > { %8735 = vtanh.f32 %v4026_v6  ;;  %v4019_v6 = vld [vmem:[#allocation2 + $0x1a8] sm:$0xff] }
 0x59a   : > { %8737 = vtanh.f32 %v4027_v32 }
 0x59b   : > { %8739 = vtanh.f32 %v4016_v24 }
 0x59c   : > { %8741 = vtanh.f32 %v4042_v8 }
 0x5a3   : > { %v8736_v37 = vpop.eup %8735 }
 0x5a4   : > { %v8738_v5 = vpop.eup %8737  ;;  %v4034_v4 = vmul.f32 0.5, %v8736_v37  ;;  %v4020_v37 = vld [vmem:[#allocation2 + $0x1b0] sm:$0xff] }
 0x5a5   : > { %v4035_v18 = vmul.f32 0.5, %v8738_v5  ;;  %v8740_v39 = vpop.eup %8739 }
 0x5a6   : > { %v4038_v29 = vadd.f32 0.5, %v4034_v4  ;;  %v8742_v57 = vpop.eup %8741 }
 0x5a7   : > { %v4039_v58 = vadd.f32 0.5, %v4035_v18  ;;  %v4046_v42 = vmul.f32 0.5, %v8742_v57 }
 0x5a8   : > { %v4054_v28 = vmul.f32 %v8740_v39, %v4038_v29  ;;  %v4021_v39 = vld [vmem:[#allocation2 + $0x1b8] sm:$0xff] }
 0x5a9   : > { %v4052_v13 = vmul.f32 %v4039_v58, %v10202_v26  ;;  %v4048_v48 = vadd.f32 0.5, %v4046_v42 }
 0x5ab   : > { %v10386_v36 = vadd.f32 %v4054_v28, %v4052_v13 }
 0x5ad   : > { %8743 = vtanh.f32 %v10386_v36 }
 0x5b4   : > { %v3962_v47 = vpop.f32.mrb[12].mxu0  ;;  %v4003_v45 = vpop.f32.mrb[12].mxu1 }
 0x5b5   : > { %v3963_v63 = vpop.f32.mrb[13].mxu0  ;;  %v4004_v2 = vpop.f32.mrb[13].mxu1 }
 0x5b6   : > { %v3964_v31 = vpop.f32.mrb[14].mxu0  ;;  %v4005_v32 = vpop.f32.mrb[14].mxu1 }
 0x5b7   : > { %v8744_v24 = vpop.eup %8743  ;;  %v4022_v61 = vadd.f32 %v4018_v51, %v3964_v31  ;;  %v3966_v59 = vpop.f32.mrb[15].mxu0  ;;  %v4024_v29 = vadd.f32 %v4020_v37, %v4005_v32  ;;  %v4076_v37 = vld [vmem:[%s9291_s20 + $0x58] sm:$0xff] }
 0x5b8   : > { %v4007_v8 = vpop.f32.mrb[15].mxu1  ;;  %v4060_v26 = vmul.f32 %v8744_v24, %v4048_v48  ;;  %v4023_v5 = vadd.f32 %v4019_v6, %v3966_v59 }
 0x5b9   : > { %v4028_v4 = vmul.f32 0.5, %v4022_v61  ;;  %v4025_v58 = vadd.f32 %v4021_v39, %v4007_v8  ;;  %v4075_v61 = vld [vmem:[%s9291_s20 + $0x50] sm:$0xff] }
 0x5ba   : > { %4062 = vst [vmem:[#allocation3 + $0x10] sm:$0xff] %v4060_v26  ;;  %v4029_v18 = vmul.f32 0.5, %v4023_v5  ;;  %v4079_v8 = vld [vmem:[%s9291_s20 + $0x70] sm:$0xff]  ;;  %v4080_v5 = vld [vmem:[%s9291_s20 + $0x78] sm:$0xff] }
 0x5bb   : > { %8745 = vtanh.f32 %v4028_v4  ;;  %v4043_v28 = vmul.f32 0.5, %v4025_v58  ;;  %v4083_v39 = vld [vmem:[%s9291_s20 + $0x90] sm:$0xff] }
 0x5bc   : > { %8747 = vtanh.f32 %v4029_v18  ;;  %v4087_v58 = vld [vmem:[%s9291_s20 + $0xb0] sm:$0xff] }
 0x5bd   : > { %8749 = vtanh.f32 %v4024_v29  ;;  %v10401_v29 = vcombine.high %v4076_v37, %v4080_v5 }
 0x5be   : > { %8751 = vtanh.f32 %v4043_v28  ;;  %v4084_v28 = vld [vmem:[%s9291_s20 + $0x98] sm:$0xff] }
 0x5c5   : > { %v8746_v13 = vpop.eup %8745 }
 0x5c6   : > { %v8748_v57 = vpop.eup %8747  ;;  %v4036_v42 = vmul.f32 0.5, %v8746_v13  ;;  %v4088_v13 = vld [vmem:[%s9291_s20 + $0xb8] sm:$0xff] }
 0x5c7   : > { %v4037_v47 = vmul.f32 0.5, %v8748_v57  ;;  %v8750_v51 = vpop.eup %8749  ;;  %v10413_v57 = vcombine.low %v4076_v37, %v4080_v5  ;;  %v4104_v37 = vld [vmem:[%s9291_s20 + $0x138] sm:$0xff] }
 0x5c8   : > { %v4040_v45 = vadd.f32 0.5, %v4036_v42  ;;  %v8752_v31 = vpop.eup %8751  ;;  %v10417_v42 = vcombine.high %v4083_v39, %v4087_v58 }
 0x5c9   : > { %v4041_v63 = vadd.f32 0.5, %v4037_v47  ;;  %v4047_v32 = vmul.f32 0.5, %v8752_v31  ;;  %v10419_v47 = vcombine.high %v4084_v28, %v4088_v13  ;;  %v10431_v31 = vcombine.low %v4084_v28, %v4088_v13  ;;  %v4107_v28 = vld [vmem:[%s9291_s20 + $0x150] sm:$0xff] }
 0x5ca   : > { %v4055_v2 = vmul.f32 %v8750_v51, %v4040_v45  ;;  %11415 = vst [vmem:[#allocation19_spill] sm:$0xff] %v10417_v42  ;;  %v4091_v45 = vld [vmem:[%s9291_s20 + $0xd0] sm:$0xff] }
 0x5cb   : > { %v4053_v6 = vmul.f32 %v4041_v63, %v10206_v16  ;;  %v4049_v24 = vadd.f32 0.5, %v4047_v32  ;;  %v10399_v16 = vcombine.high %v4075_v61, %v4079_v8  ;;  %11416 = vst [vmem:[#allocation18_spill] sm:$0xff] %v10419_v47  ;;  %v4095_v51 = vld [vmem:[%s9291_s20 + $0xf0] sm:$0xff]  ;;  %v4092_v63 = vld [vmem:[%s9291_s20 + $0xd8] sm:$0xff]  ;;  %11418 = vst [vmem:[#allocation21_spill] sm:$0xff] %v10431_v31 }
 0x5cc   : > { %v10435_v32 = vcombine.high %v4091_v45, %v4095_v51  ;;  %v10445_v5 = vcombine.low %v4091_v45, %v4095_v51  ;;  %v4111_v13 = vld [vmem:[%s9291_s20 + $0x170] sm:$0xff] }
 0x5cd   : > { %v10390_v48 = vadd.f32 %v4055_v2, %v4053_v6  ;;  %v4096_v2 = vld [vmem:[%s9291_s20 + $0xf8] sm:$0xff]  ;;  %v10429_v6 = vcombine.low %v4083_v39, %v4087_v58 }
 0x5ce   : > { %11419 = vst [vmem:[#allocation23_spill] sm:$0xff] %v10435_v32  ;;  %11421 = vst [vmem:[#allocation24_spill] sm:$0xff] %v10445_v5 }
 0x5cf   : > { %8753 = vtanh.f32 %v10390_v48  ;;  %11417 = vst [vmem:[#allocation20_spill] sm:$0xff] %v10429_v6 }
 0x5d9   : > { %v8754_v59 = vpop.eup %8753 }
 0x5da   : > { %v4061_v4 = vmul.f32 %v8754_v59, %v4049_v24  ;;  %v10437_v24 = vcombine.high %v4092_v63, %v4096_v2  ;;  %v4103_v59 = vld [vmem:[%s9291_s20 + $0x130] sm:$0xff] }
 0x5dc   : > { %4063 = vst [vmem:[#allocation3 + $0x68] sm:$0xff] %v4061_v4  ;;  %v10397_v18 = vpack.c.bf16 %v4061_v4, %v4060_v26  ;;  %v10411_v26 = vcombine.low %v4075_v61, %v4079_v8  ;;  %11420 = vst [vmem:[#allocation22_spill] sm:$0xff] %v10437_v24  ;;  %v4099_v61 = vld [vmem:[%s9291_s20 + $0x110] sm:$0xff]  ;;  %v4100_v8 = vld [vmem:[%s9291_s20 + $0x118] sm:$0xff]  ;;  %v10447_v4 = vcombine.low %v4092_v63, %v4096_v2 }
 0x5dd   : > { %v10451_v39 = vcombine.high %v4099_v61, %v4103_v59  ;;  %v10453_v58 = vcombine.high %v4100_v8, %v4104_v37  ;;  %v10461_v45 = vcombine.low %v4099_v61, %v4103_v59  ;;  %v10463_v51 = vcombine.low %v4100_v8, %v4104_v37 }
 0x5de   : > { %4482 = vmatmul.mubr.bf16.vlgmr.msra.gmra.mrb[16].mxu0 %v10397_v18  ;;  %4523 = vmatmul.mubr.bf16.vlgmr.msra.gmra.mrb[16].mxu1 %v10397_v18  ;;  %11422 = vst [vmem:[#allocation25_spill] sm:$0xff] %v10447_v4  ;;  %v10467_v63 = vcombine.high %v4107_v28, %v4111_v13  ;;  %v10477_v61 = vcombine.low %v4107_v28, %v4111_v13 }
 0x5df   : > { %4532 = vmatpush1.bf16.msra.mxu0 %v10374_v30  ;;  %4573 = vmatpush1.bf16.msra.mxu1 %v10379_v20  ;;  %11423 = vst [vmem:[#allocation26_spill] sm:$0xff] %v10451_v39  ;;  %11424 = vst [vmem:[#allocation27_spill] sm:$0xff] %v10453_v58 }
 0x5e0   : > { %4533 = vmatprep.subr.bf16.mxu0 %v10399_v16  ;;  %4574 = vmatprep.subr.bf16.mxu1 %v10401_v29  ;;  %11426 = vst [vmem:[#allocation29_spill] sm:$0xff] %v10477_v61 }
 0x5e1   : > { %4563 = vmatprep.mubr.bf16.mxu0 %v11406_v21  ;;  %4604 = vmatprep.mubr.bf16.mxu1 %v11406_v21 }
 0x5e3   : > { %4534 = vmatpush1.bf16.msra.mxu0 %v10411_v26  ;;  %4575 = vmatpush1.bf16.msra.mxu1 %v10413_v57 }
 0x5e4   : > { %4535 = vmatprep.subr.bf16.mxu0 %v10417_v42  ;;  %4576 = vmatprep.subr.bf16.mxu1 %v10419_v47  ;;  %v4124_v47 = vld [vmem:[%s9291_s20 + $0x1d8] sm:$0xff] }
 0x5e5   : > { %v4128_v42 = vld [vmem:[%s9291_s20 + $0x1f8] sm:$0xff] }
 0x5e6   : > { %v10501_v13 = vcombine.high %v4124_v47, %v4128_v42 }
 0x5e7   : > { %4536 = vmatpush1.bf16.msra.mxu0 %v10429_v6  ;;  %4577 = vmatpush1.bf16.msra.mxu1 %v10431_v31  ;;  %v4108_v6 = vld [vmem:[%s9291_s20 + $0x158] sm:$0xff] }
 0x5e8   : > { %4537 = vmatprep.subr.bf16.mxu0 %v10435_v32  ;;  %4578 = vmatprep.subr.bf16.mxu1 %v10437_v24  ;;  %v4112_v31 = vld [vmem:[%s9291_s20 + $0x178] sm:$0xff]  ;;  %v4115_v24 = vld [vmem:[%s9291_s20 + $0x190] sm:$0xff] }
 0x5e9   : > { %v10469_v2 = vcombine.high %v4108_v6, %v4112_v31  ;;  %v4116_v32 = vld [vmem:[%s9291_s20 + $0x198] sm:$0xff]  ;;  %v10479_v59 = vcombine.low %v4108_v6, %v4112_v31 }
 0x5eb   : > { %4538 = vmatpush1.bf16.msra.mxu0 %v10445_v5  ;;  %4579 = vmatpush1.bf16.msra.mxu1 %v10447_v4  ;;  %11425 = vst [vmem:[#allocation28_spill] sm:$0xff] %v10469_v2  ;;  %v4119_v5 = vld [vmem:[%s9291_s20 + $0x1b0] sm:$0xff]  ;;  %v4120_v4 = vld [vmem:[%s9291_s20 + $0x1b8] sm:$0xff] }
 0x5ec   : > { %4539 = vmatprep.subr.bf16.mxu0 %v10451_v39  ;;  %4580 = vmatprep.subr.bf16.mxu1 %v10453_v58  ;;  %v10483_v8 = vcombine.high %v4115_v24, %v4119_v5  ;;  %v10485_v37 = vcombine.high %v4116_v32, %v4120_v4  ;;  %v4123_v58 = vld [vmem:[%s9291_s20 + $0x1d0] sm:$0xff]  ;;  %v10493_v28 = vcombine.low %v4115_v24, %v4119_v5 }
 0x5ed   : > { %v4127_v39 = vld [vmem:[%s9291_s20 + $0x1f0] sm:$0xff]  ;;  %v10495_v6 = vcombine.low %v4116_v32, %v4120_v4 }
 0x5ee   : > { %v10499_v31 = vcombine.high %v4123_v58, %v4127_v39 }
 0x5ef   : > { %4540 = vmatpush1.bf16.msra.mxu0 %v10461_v45  ;;  %4581 = vmatpush1.bf16.msra.mxu1 %v10463_v51 }
 0x5f0   : > { %4541 = vmatprep.subr.bf16.mxu0 %v10467_v63  ;;  %4582 = vmatprep.subr.bf16.mxu1 %v10469_v2  ;;  %v10505_v2 = vcombine.low %v4123_v58, %v4127_v39 }
 0x5f3   : > { %4542 = vmatpush1.bf16.msra.mxu0 %v10477_v61  ;;  %4583 = vmatpush1.bf16.msra.mxu1 %v10479_v59  ;;  %v10507_v61 = vcombine.low %v4124_v47, %v4128_v42  ;;  %v4622_v47 = vld [vmem:[#allocation2 + $0x168] sm:$0xff] }
 0x5f4   : > { %4543 = vmatprep.subr.bf16.mxu0 %v10483_v8  ;;  %4584 = vmatprep.subr.bf16.mxu1 %v10485_v37 }
 0x5f7   : > { %4544 = vmatpush1.bf16.msra.mxu0 %v10493_v28  ;;  %4585 = vmatpush1.bf16.msra.mxu1 %v10495_v6 }
 0x5f8   : > { %4545 = vmatprep.subr.bf16.mxu0 %v10499_v31  ;;  %4586 = vmatprep.subr.bf16.mxu1 %v10501_v13 }
 0x5fb   : > { %4546 = vmatpush1.bf16.msra.mxu0 %v10505_v2  ;;  %4587 = vmatpush1.bf16.msra.mxu1 %v10507_v61 }
 0x5fc   : > { %5052 = vmatprep.subr.bf16.mxu0 %v10246_v56  ;;  %5093 = vmatprep.subr.bf16.mxu1 %v10253_v35  ;;  %v4613_v56 = vld [vmem:[#allocation2 + $0x80] sm:$0xff] }
 0x5fe   : > { %4564 = vmatmul.mubr.bf16.vlgmr.msra.gmra.mrb[20].mxu0 %v10397_v18  ;;  %4605 = vmatmul.mubr.bf16.vlgmr.msra.gmra.mrb[20].mxu1 %v10397_v18 }
 0x5ff   : > { %5053 = vmatpush1.bf16.msra.mxu0 %v10249_v38  ;;  %5094 = vmatpush1.bf16.msra.mxu1 %v10251_v49  ;;  %v4614_v38 = vld [vmem:[#allocation2 + $0x88] sm:$0xff] }
 0x600   : > { %5054 = vmatprep.subr.bf16.mxu0 %v10262_v44  ;;  %5095 = vmatprep.subr.bf16.mxu1 %v10269_v22  ;;  %v4615_v22 = vld [vmem:[#allocation2 + $0x90] sm:$0xff] }
 0x601   : > { %5084 = vmatprep.mubr.bf16.mxu0 %v11406_v21  ;;  %5125 = vmatprep.mubr.bf16.mxu1 %v11406_v21 }
 0x603   : > { %5055 = vmatpush1.bf16.msra.mxu0 %v10265_v0  ;;  %5096 = vmatpush1.bf16.msra.mxu1 %v10267_v1 }
 0x604   : > { %5056 = vmatprep.subr.bf16.mxu0 %v10278_v43  ;;  %5097 = vmatprep.subr.bf16.mxu1 %v10285_v54 }
 0x607   : > { %5057 = vmatpush1.bf16.msra.mxu0 %v10281_v11  ;;  %5098 = vmatpush1.bf16.msra.mxu1 %v10283_v40 }
 0x608   : > { %5058 = vmatprep.subr.bf16.mxu0 %v10294_v34  ;;  %5099 = vmatprep.subr.bf16.mxu1 %v10301_v41 }
 0x60b   : > { %5059 = vmatpush1.bf16.msra.mxu0 %v10297_v33  ;;  %5100 = vmatpush1.bf16.msra.mxu1 %v10299_v23 }
 0x60c   : > { %5060 = vmatprep.subr.bf16.mxu0 %v10310_v50  ;;  %5101 = vmatprep.subr.bf16.mxu1 %v10317_v62  ;;  %v4616_v50 = vld [vmem:[#allocation2 + $0x98] sm:$0xff] }
 0x60f   : > { %5061 = vmatpush1.bf16.msra.mxu0 %v10313_v55  ;;  %5102 = vmatpush1.bf16.msra.mxu1 %v10315_v60 }
 0x610   : > { %5062 = vmatprep.subr.bf16.mxu0 %v10326_v7  ;;  %5103 = vmatprep.subr.bf16.mxu1 %v10333_v17 }
 0x613   : > { %5063 = vmatpush1.bf16.msra.mxu0 %v10329_v9  ;;  %5104 = vmatpush1.bf16.msra.mxu1 %v10331_v15 }
 0x614   : > { %5064 = vmatprep.subr.bf16.mxu0 %v10342_v25  ;;  %5105 = vmatprep.subr.bf16.mxu1 %v10349_v46 }
 0x617   : > { %5065 = vmatpush1.bf16.msra.mxu0 %v10345_v19  ;;  %5106 = vmatpush1.bf16.msra.mxu1 %v10347_v52 }
 0x618   : > { %5066 = vmatprep.subr.bf16.mxu0 %v10358_v3  ;;  %5107 = vmatprep.subr.bf16.mxu1 %v10365_v10 }
 0x61b   : > { %5067 = vmatpush1.bf16.msra.mxu0 %v10361_v12  ;;  %5108 = vmatpush1.bf16.msra.mxu1 %v10363_v14 }
 0x61c   : > { %5134 = vmatprep.subr.bf16.mxu0 %v10376_v53  ;;  %5175 = vmatprep.subr.bf16.mxu1 %v10381_v27  ;;  %v4621_v27 = vld [vmem:[#allocation2 + $0x160] sm:$0xff] }
 0x6b1   : > { %v4483_v49 = vpop.f32.mrb[16].mxu0  ;;  %v4524_v35 = vpop.f32.mrb[16].mxu1 }
 0x6b2   : > { %v4617_v44 = vadd.f32 %v4613_v56, %v4483_v49  ;;  %v4485_v0 = vpop.f32.mrb[17].mxu0  ;;  %v4526_v1 = vpop.f32.mrb[17].mxu1  ;;  %v4619_v41 = vadd.f32 %v4615_v22, %v4524_v35 }
 0x6b3   : > { %v4618_v43 = vadd.f32 %v4614_v38, %v4485_v0  ;;  %v4487_v11 = vpop.f32.mrb[18].mxu0  ;;  %v4528_v40 = vpop.f32.mrb[18].mxu1  ;;  %v4620_v55 = vadd.f32 %v4616_v50, %v4526_v1  ;;  %v4623_v38 = vld [vmem:[#allocation2 + $0x170] sm:$0xff]  ;;  %v4624_v1 = vld [vmem:[#allocation2 + $0x178] sm:$0xff] }
 0x6b4   : > { %v4629_v54 = vmul.f32 0.5, %v4617_v44  ;;  %v4488_v34 = vpop.f32.mrb[19].mxu0  ;;  %v4529_v33 = vpop.f32.mrb[19].mxu1 }
 0x6b5   : > { %v4630_v23 = vmul.f32 0.5, %v4618_v43  ;;  %v4645_v60 = vmul.f32 0.5, %v4620_v55 }
 0x6b6   : > { %8755 = vtanh.f32 %v4629_v54 }
 0x6b7   : > { %8757 = vtanh.f32 %v4630_v23 }
 0x6b8   : > { %8759 = vtanh.f32 %v4619_v41 }
 0x6b9   : > { %8761 = vtanh.f32 %v4645_v60 }
 0x6c0   : > { %v8756_v62 = vpop.eup %8755 }
 0x6c1   : > { %v8758_v7 = vpop.eup %8757  ;;  %v4637_v9 = vmul.f32 0.5, %v8756_v62 }
 0x6c2   : > { %v4638_v15 = vmul.f32 0.5, %v8758_v7  ;;  %v8760_v25 = vpop.eup %8759 }
 0x6c3   : > { %v4641_v17 = vadd.f32 0.5, %v4637_v9  ;;  %v8762_v12 = vpop.eup %8761 }
 0x6c4   : > { %v4642_v19 = vadd.f32 0.5, %v4638_v15  ;;  %v4649_v14 = vmul.f32 0.5, %v8762_v12  ;;  %v11435_v12 = vld [vmem:[#allocation26_spill] sm:$0xff] }
 0x6c5   : > { %v4657_v52 = vmul.f32 %v8760_v25, %v4641_v17 }
 0x6c6   : > { %v4655_v46 = vmul.f32 %v4642_v19, %v10386_v36  ;;  %v4651_v32 = vadd.f32 0.5, %v4649_v14  ;;  %v11428_v19 = vld [vmem:[#allocation18_spill] sm:$0xff]  ;;  %v11438_v14 = vld [vmem:[#allocation29_spill] sm:$0xff] }
 0x6c8   : > { %v10552_v3 = vadd.f32 %v4657_v52, %v4655_v46  ;;  %v11429_v52 = vld [vmem:[#allocation20_spill] sm:$0xff]  ;;  %v11434_v46 = vld [vmem:[#allocation25_spill] sm:$0xff] }
 0x6ca   : > { %8763 = vtanh.f32 %v10552_v3 }
 0x6d1   : > { %v4565_v10 = vpop.f32.mrb[20].mxu0  ;;  %v4606_v53 = vpop.f32.mrb[20].mxu1 }
 0x6d2   : > { %v4566_v18 = vpop.f32.mrb[21].mxu0  ;;  %v4607_v42 = vpop.f32.mrb[21].mxu1  ;;  %v5284_v10 = vld [vmem:[%s9291_s20 + $0x68] sm:$0xff] }
 0x6d3   : > { %v4567_v24 = vpop.f32.mrb[22].mxu0  ;;  %v4608_v5 = vpop.f32.mrb[22].mxu1  ;;  %v5287_v42 = vld [vmem:[%s9291_s20 + $0x80] sm:$0xff] }
 0x6d4   : > { %v8764_v4 = vpop.eup %8763  ;;  %v4625_v39 = vadd.f32 %v4621_v27, %v4567_v24  ;;  %v4569_v58 = vpop.f32.mrb[23].mxu0  ;;  %v4627_v0 = vadd.f32 %v4623_v38, %v4608_v5  ;;  %v5292_v5 = vld [vmem:[%s9291_s20 + $0xa8] sm:$0xff] }
 0x6d5   : > { %v4610_v56 = vpop.f32.mrb[23].mxu1  ;;  %v4663_v36 = vmul.f32 %v8764_v4, %v4651_v32  ;;  %v4626_v49 = vadd.f32 %v4622_v47, %v4569_v58  ;;  %v5291_v47 = vld [vmem:[%s9291_s20 + $0xa0] sm:$0xff]  ;;  %v5288_v32 = vld [vmem:[%s9291_s20 + $0x88] sm:$0xff] }
 0x6d6   : > { %v4631_v35 = vmul.f32 0.5, %v4625_v39  ;;  %v4628_v22 = vadd.f32 %v4624_v1, %v4610_v56  ;;  %v10628_v24 = vcombine.high %v5287_v42, %v5291_v47  ;;  %v10631_v4 = vcombine.low %v5287_v42, %v5291_v47  ;;  %v5295_v56 = vld [vmem:[%s9291_s20 + $0xc0] sm:$0xff]  ;;  %v5296_v38 = vld [vmem:[%s9291_s20 + $0xc8] sm:$0xff]  ;;  %v5278_v42 = vld [vmem:[%s9291_s20 + $0x38] sm:$0xff] }
 0x6d7   : > { %4665 = vst [vmem:[#allocation3 + $0x20] sm:$0xff] %v4663_v36  ;;  %v4632_v44 = vmul.f32 0.5, %v4626_v49  ;;  %v10633_v39 = vcombine.low %v5288_v32, %v5292_v5  ;;  %v10635_v58 = vcombine.high %v5288_v32, %v5292_v5  ;;  %v5216_v5 = vld [vmem:[#allocation2 + $0xc0] sm:$0xff] }
 0x6d8   : > { %8765 = vtanh.f32 %v4631_v35  ;;  %v4646_v43 = vmul.f32 0.5, %v4628_v22  ;;  %v5300_v35 = vld [vmem:[%s9291_s20 + $0xe8] sm:$0xff]  ;;  %v5303_v22 = vld [vmem:[%s9291_s20 + $0x100] sm:$0xff] }
 0x6d9   : > { %8767 = vtanh.f32 %v4632_v44  ;;  %v10651_v1 = vcombine.high %v5296_v38, %v5300_v35 }
 0x6da   : > { %8769 = vtanh.f32 %v4627_v0  ;;  %v10649_v0 = vcombine.low %v5296_v38, %v5300_v35 }
 0x6db   : > { %8771 = vtanh.f32 %v4646_v43  ;;  %v5307_v43 = vld [vmem:[%s9291_s20 + $0x120] sm:$0xff] }
 0x6e2   : > { %v8766_v11 = vpop.eup %8765 }
 0x6e3   : > { %v8768_v40 = vpop.eup %8767  ;;  %v4639_v54 = vmul.f32 0.5, %v8766_v11  ;;  %v5304_v11 = vld [vmem:[%s9291_s20 + $0x108] sm:$0xff] }
 0x6e4   : > { %v4640_v34 = vmul.f32 0.5, %v8768_v40  ;;  %v8770_v23 = vpop.eup %8769  ;;  %v10660_v40 = vcombine.high %v5303_v22, %v5307_v43 }
 0x6e5   : > { %v4643_v33 = vadd.f32 0.5, %v4639_v54  ;;  %v8772_v62 = vpop.eup %8771  ;;  %v5308_v54 = vld [vmem:[%s9291_s20 + $0x128] sm:$0xff] }
 0x6e6   : > { %v4644_v41 = vadd.f32 0.5, %v4640_v34  ;;  %v4650_v7 = vmul.f32 0.5, %v8772_v62  ;;  %v10663_v34 = vcombine.low %v5303_v22, %v5307_v43 }
 0x6e7   : > { %v4658_v50 = vmul.f32 %v8770_v23, %v4643_v33  ;;  %v10665_v33 = vcombine.low %v5304_v11, %v5308_v54  ;;  %v10667_v23 = vcombine.high %v5304_v11, %v5308_v54  ;;  %v5218_v11 = vld [vmem:[#allocation2 + $0xd0] sm:$0xff] }
 0x6e8   : > { %v4656_v55 = vmul.f32 %v4644_v41, %v10390_v48  ;;  %v4652_v9 = vadd.f32 0.5, %v4650_v7  ;;  %v11427_v48 = vld [vmem:[#allocation19_spill] sm:$0xff]  ;;  %v5316_v7 = vld [vmem:[%s9291_s20 + $0x168] sm:$0xff] }
 0x6e9   : > { %v5311_v41 = vld [vmem:[%s9291_s20 + $0x140] sm:$0xff] }
 0x6ea   : > { %v10556_v60 = vadd.f32 %v4658_v50, %v4656_v55  ;;  %v5315_v50 = vld [vmem:[%s9291_s20 + $0x160] sm:$0xff]  ;;  %v5312_v55 = vld [vmem:[%s9291_s20 + $0x148] sm:$0xff] }
 0x6eb   : > { %v10676_v62 = vcombine.high %v5311_v41, %v5315_v50 }
 0x6ec   : > { %8773 = vtanh.f32 %v10556_v60 }
 0x6f6   : > { %v8774_v15 = vpop.eup %8773 }
 0x6f7   : > { %v4664_v17 = vmul.f32 %v8774_v15, %v4652_v9  ;;  %v10679_v9 = vcombine.low %v5311_v41, %v5315_v50  ;;  %v10681_v15 = vcombine.low %v5312_v55, %v5316_v7 }
 0x6f9   : > { %4666 = vst [vmem:[#allocation3 + $0x58] sm:$0xff] %v4664_v17  ;;  %v4667_v25 = vpack.c.bf16 %v4664_v17, %v4663_v36  ;;  %v5299_v36 = vld [vmem:[%s9291_s20 + $0xe0] sm:$0xff]  ;;  %v10683_v17 = vcombine.high %v5312_v55, %v5316_v7 }
 0x6fa   : > { %v10644_v49 = vcombine.high %v5295_v56, %v5299_v36  ;;  %v10647_v44 = vcombine.low %v5295_v56, %v5299_v36  ;;  %v5217_v56 = vld [vmem:[#allocation2 + $0xc8] sm:$0xff] }
 0x6fb   : > { %5085 = vmatmul.mubr.bf16.vlgmr.msra.gmra.mrb[24].mxu0 %v4667_v25  ;;  %5126 = vmatmul.mubr.bf16.vlgmr.msra.gmra.mrb[24].mxu1 %v4667_v25 }
 0x6fc   : > { %5135 = vmatpush1.bf16.msra.mxu0 %v10374_v30  ;;  %5176 = vmatpush1.bf16.msra.mxu1 %v10379_v20  ;;  %v11430_v30 = vld [vmem:[#allocation21_spill] sm:$0xff]  ;;  %v11431_v20 = vld [vmem:[#allocation23_spill] sm:$0xff] }
 0x6fd   : > { %5136 = vmatprep.subr.bf16.mxu0 %v10399_v16  ;;  %5177 = vmatprep.subr.bf16.mxu1 %v10401_v29  ;;  %v11432_v16 = vld [vmem:[#allocation22_spill] sm:$0xff]  ;;  %v11433_v29 = vld [vmem:[#allocation24_spill] sm:$0xff] }
 0x6fe   : > { %5166 = vmatprep.mubr.bf16.mxu0 %v11406_v21  ;;  %5207 = vmatprep.mubr.bf16.mxu1 %v11406_v21 }
 0x700   : > { %5137 = vmatpush1.bf16.msra.mxu0 %v10411_v26  ;;  %5178 = vmatpush1.bf16.msra.mxu1 %v10413_v57  ;;  %v11436_v26 = vld [vmem:[#allocation27_spill] sm:$0xff]  ;;  %v11437_v57 = vld [vmem:[#allocation28_spill] sm:$0xff] }
 0x701   : > { %5138 = vmatprep.subr.bf16.mxu0 %v11427_v48  ;;  %5179 = vmatprep.subr.bf16.mxu1 %v11428_v19  ;;  %v5323_v48 = vld [vmem:[%s9291_s20 + $0x1a0] sm:$0xff]  ;;  %v5320_v19 = vld [vmem:[%s9291_s20 + $0x188] sm:$0xff] }
 0x704   : > { %5139 = vmatpush1.bf16.msra.mxu0 %v11429_v52  ;;  %5180 = vmatpush1.bf16.msra.mxu1 %v11430_v30  ;;  %v5324_v30 = vld [vmem:[%s9291_s20 + $0x1a8] sm:$0xff] }
 0x705   : > { %5140 = vmatprep.subr.bf16.mxu0 %v11431_v20  ;;  %5181 = vmatprep.subr.bf16.mxu1 %v11432_v16  ;;  %v10697_v16 = vcombine.low %v5320_v19, %v5324_v30 }
 0x708   : > { %5141 = vmatpush1.bf16.msra.mxu0 %v11433_v29  ;;  %5182 = vmatpush1.bf16.msra.mxu1 %v11434_v46  ;;  %v10699_v29 = vcombine.high %v5320_v19, %v5324_v30  ;;  %v5327_v46 = vld [vmem:[%s9291_s20 + $0x1c0] sm:$0xff]  ;;  %v5219_v30 = vld [vmem:[#allocation2 + $0xd8] sm:$0xff] }
 0x709   : > { %5142 = vmatprep.subr.bf16.mxu0 %v11435_v12  ;;  %5183 = vmatprep.subr.bf16.mxu1 %v11436_v26  ;;  %v5331_v12 = vld [vmem:[%s9291_s20 + $0x1e0] sm:$0xff]  ;;  %v5328_v26 = vld [vmem:[%s9291_s20 + $0x1c8] sm:$0xff] }
 0x70c   : > { %5143 = vmatpush1.bf16.msra.mxu0 %v10461_v45  ;;  %5184 = vmatpush1.bf16.msra.mxu1 %v10463_v51  ;;  %v5271_v45 = vld [vmem:[%s9291_s20] sm:$0xff] }
 0x70d   : > { %5144 = vmatprep.subr.bf16.mxu0 %v10467_v63  ;;  %5185 = vmatprep.subr.bf16.mxu1 %v11437_v57  ;;  %v5275_v51 = vld [vmem:[%s9291_s20 + $0x20] sm:$0xff]  ;;  %v5272_v63 = vld [vmem:[%s9291_s20 + $0x8] sm:$0xff]  ;;  %v10708_v57 = vcombine.high %v5327_v46, %v5331_v12 }
 0x710   : > { %5145 = vmatpush1.bf16.msra.mxu0 %v11438_v14  ;;  %5186 = vmatpush1.bf16.msra.mxu1 %v10479_v59  ;;  %v10596_v59 = vcombine.high %v5271_v45, %v5275_v51  ;;  %v5332_v14 = vld [vmem:[%s9291_s20 + $0x1e8] sm:$0xff] }
 0x711   : > { %5146 = vmatprep.subr.bf16.mxu0 %v10483_v8  ;;  %5187 = vmatprep.subr.bf16.mxu1 %v10485_v37  ;;  %v5276_v8 = vld [vmem:[%s9291_s20 + $0x28] sm:$0xff]  ;;  %v10599_v37 = vcombine.low %v5271_v45, %v5275_v51  ;;  %v10711_v45 = vcombine.low %v5327_v46, %v5331_v12  ;;  %v10713_v51 = vcombine.low %v5328_v26, %v5332_v14 }
 0x714   : > { %5147 = vmatpush1.bf16.msra.mxu0 %v10493_v28  ;;  %5188 = vmatpush1.bf16.msra.mxu1 %v10495_v6  ;;  %v5279_v28 = vld [vmem:[%s9291_s20 + $0x40] sm:$0xff] }
 0x715   : > { %5148 = vmatprep.subr.bf16.mxu0 %v10499_v31  ;;  %5189 = vmatprep.subr.bf16.mxu1 %v10501_v13  ;;  %v5283_v6 = vld [vmem:[%s9291_s20 + $0x60] sm:$0xff]  ;;  %v5280_v31 = vld [vmem:[%s9291_s20 + $0x48] sm:$0xff] }
 0x716   : > { %v10612_v13 = vcombine.high %v5279_v28, %v5283_v6  ;;  %v10615_v53 = vcombine.low %v5279_v28, %v5283_v6  ;;  %v10617_v27 = vcombine.low %v5280_v31, %v5284_v10  ;;  %v10619_v18 = vcombine.high %v5280_v31, %v5284_v10  ;;  %v5277_v28 = vld [vmem:[%s9291_s20 + $0x30] sm:$0xff]  ;;  %v5274_v6 = vld [vmem:[%s9291_s20 + $0x18] sm:$0xff] }
 0x717   : > { %v10729_v47 = vcombine.low %v5274_v6, %v5278_v42  ;;  %v10731_v32 = vcombine.high %v5274_v6, %v5278_v42 }
 0x718   : > { %5149 = vmatpush1.bf16.msra.mxu0 %v10505_v2  ;;  %5190 = vmatpush1.bf16.msra.mxu1 %v10507_v61  ;;  %v10601_v2 = vcombine.low %v5272_v63, %v5276_v8  ;;  %v10603_v61 = vcombine.high %v5272_v63, %v5276_v8  ;;  %v10715_v63 = vcombine.high %v5328_v26, %v5332_v14  ;;  %v5273_v8 = vld [vmem:[%s9291_s20 + $0x10] sm:$0xff] }
 0x719   : > { %5655 = vmatprep.subr.bf16.mxu0 %v10596_v59  ;;  %v10724_v31 = vcombine.low %v5273_v8, %v5277_v28  ;;  %v10726_v10 = vcombine.high %v5273_v8, %v5277_v28 }
 0x71a   : > { %5696 = vmatprep.subr.bf16.mxu1 %v10603_v61 }
 0x71b   : > { %5167 = vmatmul.mubr.bf16.vlgmr.msra.gmra.mrb[28].mxu0 %v4667_v25  ;;  %5208 = vmatmul.mubr.bf16.vlgmr.msra.gmra.mrb[28].mxu1 %v4667_v25  ;;  %v5319_v25 = vld [vmem:[%s9291_s20 + $0x180] sm:$0xff] }
 0x71c   : > { %5687 = vmatprep.mubr.bf16.mxu0 %v11406_v21  ;;  %5728 = vmatprep.mubr.bf16.mxu1 %v11406_v21  ;;  %v10692_v52 = vcombine.high %v5319_v25, %v5323_v48  ;;  %v10695_v20 = vcombine.low %v5319_v25, %v5323_v48 }
 0x71d   : > { %5656 = vmatpush1.bf16.msra.mxu0 %v10599_v37  ;;  %5697 = vmatpush1.bf16.msra.mxu1 %v10601_v2 }
 0x71e   : > { %5657 = vmatprep.subr.bf16.mxu0 %v10612_v13  ;;  %5698 = vmatprep.subr.bf16.mxu1 %v10619_v18 }
 0x721   : > { %5658 = vmatpush1.bf16.msra.mxu0 %v10615_v53  ;;  %5699 = vmatpush1.bf16.msra.mxu1 %v10617_v27 }
 0x722   : > { %5659 = vmatprep.subr.bf16.mxu0 %v10628_v24  ;;  %5700 = vmatprep.subr.bf16.mxu1 %v10635_v58 }
 0x725   : > { %5660 = vmatpush1.bf16.msra.mxu0 %v10631_v4  ;;  %5701 = vmatpush1.bf16.msra.mxu1 %v10633_v39 }
 0x726   : > { %5661 = vmatprep.subr.bf16.mxu0 %v10644_v49  ;;  %5702 = vmatprep.subr.bf16.mxu1 %v10651_v1 }
 0x729   : > { %5662 = vmatpush1.bf16.msra.mxu0 %v10647_v44  ;;  %5703 = vmatpush1.bf16.msra.mxu1 %v10649_v0 }
 0x72a   : > { %5663 = vmatprep.subr.bf16.mxu0 %v10660_v40  ;;  %5704 = vmatprep.subr.bf16.mxu1 %v10667_v23 }
 0x72d   : > { %5664 = vmatpush1.bf16.msra.mxu0 %v10663_v34  ;;  %5705 = vmatpush1.bf16.msra.mxu1 %v10665_v33 }
 0x72e   : > { %5665 = vmatprep.subr.bf16.mxu0 %v10676_v62  ;;  %5706 = vmatprep.subr.bf16.mxu1 %v10683_v17 }
 0x731   : > { %5666 = vmatpush1.bf16.msra.mxu0 %v10679_v9  ;;  %5707 = vmatpush1.bf16.msra.mxu1 %v10681_v15 }
 0x732   : > { %5667 = vmatprep.subr.bf16.mxu0 %v10692_v52  ;;  %5708 = vmatprep.subr.bf16.mxu1 %v10699_v29 }
 0x735   : > { %5668 = vmatpush1.bf16.msra.mxu0 %v10695_v20  ;;  %5709 = vmatpush1.bf16.msra.mxu1 %v10697_v16 }
 0x736   : > { %5669 = vmatprep.subr.bf16.mxu0 %v10708_v57  ;;  %5710 = vmatprep.subr.bf16.mxu1 %v10715_v63 }
 0x739   : > { %5670 = vmatpush1.bf16.msra.mxu0 %v10711_v45  ;;  %5711 = vmatpush1.bf16.msra.mxu1 %v10713_v51 }
 0x73a   : > { %5737 = vmatprep.subr.bf16.mxu0 %v10726_v10  ;;  %5778 = vmatprep.subr.bf16.mxu1 %v10731_v32 }
 0x7ce   : > { %v5086_v36 = vpop.f32.mrb[24].mxu0  ;;  %v5127_v38 = vpop.f32.mrb[24].mxu1 }
 0x7cf   : > { %v5220_v35 = vadd.f32 %v5216_v5, %v5086_v36  ;;  %v5088_v22 = vpop.f32.mrb[25].mxu0  ;;  %v5129_v43 = vpop.f32.mrb[25].mxu1  ;;  %v5222_v19 = vadd.f32 %v5218_v11, %v5127_v38 }
 0x7d0   : > { %v5221_v54 = vadd.f32 %v5217_v56, %v5088_v22  ;;  %v5090_v41 = vpop.f32.mrb[26].mxu0  ;;  %v5131_v50 = vpop.f32.mrb[26].mxu1  ;;  %v5223_v46 = vadd.f32 %v5219_v30, %v5129_v43 }
 0x7d1   : > { %v5232_v55 = vmul.f32 0.5, %v5220_v35  ;;  %v5091_v7 = vpop.f32.mrb[27].mxu0  ;;  %v5132_v25 = vpop.f32.mrb[27].mxu1 }
 0x7d2   : > { %v5233_v48 = vmul.f32 0.5, %v5221_v54  ;;  %v5248_v12 = vmul.f32 0.5, %v5223_v46  ;;  %v5224_v54 = vld [vmem:[#allocation2 + $0x120] sm:$0xff] }
 0x7d3   : > { %8775 = vtanh.f32 %v5232_v55  ;;  %v5225_v55 = vld [vmem:[#allocation2 + $0x128] sm:$0xff] }
 0x7d4   : > { %8777 = vtanh.f32 %v5233_v48 }
 0x7d5   : > { %8779 = vtanh.f32 %v5222_v19 }
 0x7d6   : > { %8781 = vtanh.f32 %v5248_v12 }
 0x7dd   : > { %v8776_v26 = vpop.eup %8775 }
 0x7de   : > { %v8778_v14 = vpop.eup %8777  ;;  %v5240_v8 = vmul.f32 0.5, %v8776_v26  ;;  %v5226_v26 = vld [vmem:[#allocation2 + $0x130] sm:$0xff] }
 0x7df   : > { %v5241_v28 = vmul.f32 0.5, %v8778_v14  ;;  %v8780_v42 = vpop.eup %8779 }
 0x7e0   : > { %v5244_v6 = vadd.f32 0.5, %v5240_v8  ;;  %v8782_v38 = vpop.eup %8781 }
 0x7e1   : > { %v5245_v5 = vadd.f32 0.5, %v5241_v28  ;;  %v5252_v22 = vmul.f32 0.5, %v8782_v38 }
 0x7e2   : > { %v5260_v56 = vmul.f32 %v8780_v42, %v5244_v6  ;;  %v5227_v42 = vld [vmem:[#allocation2 + $0x138] sm:$0xff] }
 0x7e3   : > { %v5258_v36 = vmul.f32 %v5245_v5, %v10552_v3  ;;  %v5254_v7 = vadd.f32 0.5, %v5252_v22 }
 0x7e5   : > { %v10736_v35 = vadd.f32 %v5260_v56, %v5258_v36 }
 0x7e7   : > { %8783 = vtanh.f32 %v10736_v35 }
 0x7ee   : > { %v5168_v11 = vpop.f32.mrb[28].mxu0  ;;  %v5209_v43 = vpop.f32.mrb[28].mxu1 }
 0x7ef   : > { %v5169_v41 = vpop.f32.mrb[29].mxu0  ;;  %v5210_v50 = vpop.f32.mrb[29].mxu1 }
 0x7f0   : > { %v5170_v25 = vpop.f32.mrb[30].mxu0  ;;  %v5211_v48 = vpop.f32.mrb[30].mxu1 }
 0x7f1   : > { %v8784_v19 = vpop.eup %8783  ;;  %v5228_v30 = vadd.f32 %v5224_v54, %v5170_v25  ;;  %v5172_v46 = vpop.f32.mrb[31].mxu0  ;;  %v5230_v6 = vadd.f32 %v5226_v26, %v5211_v48  ;;  %v5282_v26 = vld [vmem:[%s9291_s20 + $0x58] sm:$0xff] }
 0x7f2   : > { %v5213_v12 = vpop.f32.mrb[31].mxu1  ;;  %v5266_v3 = vmul.f32 %v8784_v19, %v5254_v7  ;;  %v5229_v14 = vadd.f32 %v5225_v55, %v5172_v46 }
 0x7f3   : > { %v5234_v8 = vmul.f32 0.5, %v5228_v30  ;;  %v5231_v5 = vadd.f32 %v5227_v42, %v5213_v12  ;;  %v5281_v30 = vld [vmem:[%s9291_s20 + $0x50] sm:$0xff] }
 0x7f4   : > { %5268 = vst [vmem:[#allocation3 + $0x30] sm:$0xff] %v5266_v3  ;;  %v5235_v28 = vmul.f32 0.5, %v5229_v14  ;;  %v5285_v12 = vld [vmem:[%s9291_s20 + $0x70] sm:$0xff]  ;;  %v5286_v14 = vld [vmem:[%s9291_s20 + $0x78] sm:$0xff] }
 0x7f5   : > { %8785 = vtanh.f32 %v5234_v8  ;;  %v5249_v56 = vmul.f32 0.5, %v5231_v5  ;;  %v5289_v42 = vld [vmem:[%s9291_s20 + $0x90] sm:$0xff] }
 0x7f6   : > { %8787 = vtanh.f32 %v5235_v28  ;;  %v5293_v5 = vld [vmem:[%s9291_s20 + $0xb0] sm:$0xff] }
 0x7f7   : > { %8789 = vtanh.f32 %v5230_v6  ;;  %v10751_v6 = vcombine.high %v5282_v26, %v5286_v14 }
 0x7f8   : > { %8791 = vtanh.f32 %v5249_v56  ;;  %v5290_v56 = vld [vmem:[%s9291_s20 + $0x98] sm:$0xff] }
 0x7ff   : > { %v8786_v36 = vpop.eup %8785 }
 0x800   : > { %v8788_v38 = vpop.eup %8787  ;;  %v5242_v22 = vmul.f32 0.5, %v8786_v36  ;;  %v5294_v36 = vld [vmem:[%s9291_s20 + $0xb8] sm:$0xff] }
 0x801   : > { %v5243_v11 = vmul.f32 0.5, %v8788_v38  ;;  %v8790_v54 = vpop.eup %8789  ;;  %v10763_v38 = vcombine.low %v5282_v26, %v5286_v14  ;;  %v5310_v26 = vld [vmem:[%s9291_s20 + $0x138] sm:$0xff] }
 0x802   : > { %v5246_v43 = vadd.f32 0.5, %v5242_v22  ;;  %v8792_v25 = vpop.eup %8791  ;;  %v10767_v22 = vcombine.high %v5289_v42, %v5293_v5 }
 0x803   : > { %v5247_v41 = vadd.f32 0.5, %v5243_v11  ;;  %v5253_v48 = vmul.f32 0.5, %v8792_v25  ;;  %v10769_v11 = vcombine.high %v5290_v56, %v5294_v36  ;;  %v10781_v25 = vcombine.low %v5290_v56, %v5294_v36  ;;  %v5313_v56 = vld [vmem:[%s9291_s20 + $0x150] sm:$0xff] }
 0x804   : > { %v5261_v50 = vmul.f32 %v8790_v54, %v5246_v43  ;;  %11439 = vst [vmem:[#allocation19_spill] sm:$0xff] %v10767_v22  ;;  %v5297_v43 = vld [vmem:[%s9291_s20 + $0xd0] sm:$0xff] }
 0x805   : > { %v5259_v55 = vmul.f32 %v5247_v41, %v10556_v60  ;;  %v5255_v19 = vadd.f32 0.5, %v5253_v48  ;;  %v10749_v60 = vcombine.high %v5281_v30, %v5285_v12  ;;  %11440 = vst [vmem:[#allocation18_spill] sm:$0xff] %v10769_v11  ;;  %v5301_v54 = vld [vmem:[%s9291_s20 + $0xf0] sm:$0xff]  ;;  %v5298_v41 = vld [vmem:[%s9291_s20 + $0xd8] sm:$0xff]  ;;  %11442 = vst [vmem:[#allocation21_spill] sm:$0xff] %v10781_v25 }
 0x806   : > { %v10785_v48 = vcombine.high %v5297_v43, %v5301_v54  ;;  %v10795_v14 = vcombine.low %v5297_v43, %v5301_v54  ;;  %v5317_v36 = vld [vmem:[%s9291_s20 + $0x170] sm:$0xff] }
 0x807   : > { %v10740_v7 = vadd.f32 %v5261_v50, %v5259_v55  ;;  %v5302_v50 = vld [vmem:[%s9291_s20 + $0xf8] sm:$0xff]  ;;  %v10779_v55 = vcombine.low %v5289_v42, %v5293_v5 }
 0x808   : > { %11443 = vst [vmem:[#allocation23_spill] sm:$0xff] %v10785_v48  ;;  %11445 = vst [vmem:[#allocation24_spill] sm:$0xff] %v10795_v14 }
 0x809   : > { %8793 = vtanh.f32 %v10740_v7  ;;  %11441 = vst [vmem:[#allocation20_spill] sm:$0xff] %v10779_v55 }
 0x813   : > { %v8794_v46 = vpop.eup %8793 }
 0x814   : > { %v5267_v8 = vmul.f32 %v8794_v46, %v5255_v19  ;;  %v10787_v19 = vcombine.high %v5298_v41, %v5302_v50  ;;  %v5309_v46 = vld [vmem:[%s9291_s20 + $0x130] sm:$0xff] }
 0x816   : > { %5269 = vst [vmem:[#allocation3 + $0x48] sm:$0xff] %v5267_v8  ;;  %v10747_v28 = vpack.c.bf16 %v5267_v8, %v5266_v3  ;;  %v10761_v3 = vcombine.low %v5281_v30, %v5285_v12  ;;  %11444 = vst [vmem:[#allocation22_spill] sm:$0xff] %v10787_v19  ;;  %v5305_v30 = vld [vmem:[%s9291_s20 + $0x110] sm:$0xff]  ;;  %v5306_v12 = vld [vmem:[%s9291_s20 + $0x118] sm:$0xff]  ;;  %v10797_v8 = vcombine.low %v5298_v41, %v5302_v50 }
 0x817   : > { %v10801_v42 = vcombine.high %v5305_v30, %v5309_v46  ;;  %v10803_v5 = vcombine.high %v5306_v12, %v5310_v26  ;;  %v10811_v43 = vcombine.low %v5305_v30, %v5309_v46  ;;  %v10813_v54 = vcombine.low %v5306_v12, %v5310_v26 }
 0x818   : > { %5688 = vmatmul.mubr.bf16.vlgmr.msra.gmra.mrb[32].mxu0 %v10747_v28  ;;  %5729 = vmatmul.mubr.bf16.vlgmr.msra.gmra.mrb[32].mxu1 %v10747_v28  ;;  %11446 = vst [vmem:[#allocation25_spill] sm:$0xff] %v10797_v8  ;;  %v10817_v41 = vcombine.high %v5313_v56, %v5317_v36  ;;  %v10827_v30 = vcombine.low %v5313_v56, %v5317_v36 }
 0x819   : > { %5738 = vmatpush1.bf16.msra.mxu0 %v10724_v31  ;;  %5779 = vmatpush1.bf16.msra.mxu1 %v10729_v47  ;;  %11447 = vst [vmem:[#allocation26_spill] sm:$0xff] %v10801_v42  ;;  %11448 = vst [vmem:[#allocation27_spill] sm:$0xff] %v10803_v5 }
 0x81a   : > { %5739 = vmatprep.subr.bf16.mxu0 %v10749_v60  ;;  %5780 = vmatprep.subr.bf16.mxu1 %v10751_v6  ;;  %11450 = vst [vmem:[#allocation29_spill] sm:$0xff] %v10827_v30 }
 0x81b   : > { %5769 = vmatprep.mubr.bf16.mxu0 %v11406_v21  ;;  %5810 = vmatprep.mubr.bf16.mxu1 %v11406_v21 }
 0x81d   : > { %5740 = vmatpush1.bf16.msra.mxu0 %v10761_v3  ;;  %5781 = vmatpush1.bf16.msra.mxu1 %v10763_v38 }
 0x81e   : > { %5741 = vmatprep.subr.bf16.mxu0 %v10767_v22  ;;  %5782 = vmatprep.subr.bf16.mxu1 %v10769_v11  ;;  %v5330_v11 = vld [vmem:[%s9291_s20 + $0x1d8] sm:$0xff] }
 0x81f   : > { %v5334_v22 = vld [vmem:[%s9291_s20 + $0x1f8] sm:$0xff] }
 0x820   : > { %v10851_v36 = vcombine.high %v5330_v11, %v5334_v22 }
 0x821   : > { %5742 = vmatpush1.bf16.msra.mxu0 %v10779_v55  ;;  %5783 = vmatpush1.bf16.msra.mxu1 %v10781_v25  ;;  %v5314_v55 = vld [vmem:[%s9291_s20 + $0x158] sm:$0xff] }
 0x822   : > { %5743 = vmatprep.subr.bf16.mxu0 %v10785_v48  ;;  %5784 = vmatprep.subr.bf16.mxu1 %v10787_v19  ;;  %v5318_v25 = vld [vmem:[%s9291_s20 + $0x178] sm:$0xff]  ;;  %v5321_v19 = vld [vmem:[%s9291_s20 + $0x190] sm:$0xff] }
 0x823   : > { %v10819_v50 = vcombine.high %v5314_v55, %v5318_v25  ;;  %v5322_v48 = vld [vmem:[%s9291_s20 + $0x198] sm:$0xff]  ;;  %v10829_v46 = vcombine.low %v5314_v55, %v5318_v25 }
 0x825   : > { %5744 = vmatpush1.bf16.msra.mxu0 %v10795_v14  ;;  %5785 = vmatpush1.bf16.msra.mxu1 %v10797_v8  ;;  %11449 = vst [vmem:[#allocation28_spill] sm:$0xff] %v10819_v50  ;;  %v5325_v14 = vld [vmem:[%s9291_s20 + $0x1b0] sm:$0xff]  ;;  %v5326_v8 = vld [vmem:[%s9291_s20 + $0x1b8] sm:$0xff] }
 0x826   : > { %5745 = vmatprep.subr.bf16.mxu0 %v10801_v42  ;;  %5786 = vmatprep.subr.bf16.mxu1 %v10803_v5  ;;  %v10833_v12 = vcombine.high %v5321_v19, %v5325_v14  ;;  %v10835_v26 = vcombine.high %v5322_v48, %v5326_v8  ;;  %v5329_v5 = vld [vmem:[%s9291_s20 + $0x1d0] sm:$0xff]  ;;  %v10843_v56 = vcombine.low %v5321_v19, %v5325_v14 }
 0x827   : > { %v5333_v42 = vld [vmem:[%s9291_s20 + $0x1f0] sm:$0xff]  ;;  %v10845_v55 = vcombine.low %v5322_v48, %v5326_v8 }
 0x828   : > { %v10849_v25 = vcombine.high %v5329_v5, %v5333_v42 }
 0x829   : > { %5746 = vmatpush1.bf16.msra.mxu0 %v10811_v43  ;;  %5787 = vmatpush1.bf16.msra.mxu1 %v10813_v54 }
 0x82a   : > { %5747 = vmatprep.subr.bf16.mxu0 %v10817_v41  ;;  %5788 = vmatprep.subr.bf16.mxu1 %v10819_v50  ;;  %v10855_v50 = vcombine.low %v5329_v5, %v5333_v42 }
 0x82d   : > { %5748 = vmatpush1.bf16.msra.mxu0 %v10827_v30  ;;  %5789 = vmatpush1.bf16.msra.mxu1 %v10829_v46  ;;  %v10857_v30 = vcombine.low %v5330_v11, %v5334_v22  ;;  %v5828_v11 = vld [vmem:[#allocation2 + $0xe8] sm:$0xff] }
 0x82e   : > { %5749 = vmatprep.subr.bf16.mxu0 %v10833_v12  ;;  %5790 = vmatprep.subr.bf16.mxu1 %v10835_v26 }
 0x831   : > { %5750 = vmatpush1.bf16.msra.mxu0 %v10843_v56  ;;  %5791 = vmatpush1.bf16.msra.mxu1 %v10845_v55 }
 0x832   : > { %5751 = vmatprep.subr.bf16.mxu0 %v10849_v25  ;;  %5792 = vmatprep.subr.bf16.mxu1 %v10851_v36 }
 0x835   : > { %5752 = vmatpush1.bf16.msra.mxu0 %v10855_v50  ;;  %5793 = vmatpush1.bf16.msra.mxu1 %v10857_v30 }
 0x836   : > { %6258 = vmatprep.subr.bf16.mxu0 %v10596_v59  ;;  %6299 = vmatprep.subr.bf16.mxu1 %v10603_v61  ;;  %v5819_v59 = vld [vmem:[#allocation2 + $0x100] sm:$0xff] }
 0x838   : > { %5770 = vmatmul.mubr.bf16.vlgmr.msra.gmra.mrb[36].mxu0 %v10747_v28  ;;  %5811 = vmatmul.mubr.bf16.vlgmr.msra.gmra.mrb[36].mxu1 %v10747_v28 }
 0x839   : > { %6259 = vmatpush1.bf16.msra.mxu0 %v10599_v37  ;;  %6300 = vmatpush1.bf16.msra.mxu1 %v10601_v2  ;;  %v5820_v37 = vld [vmem:[#allocation2 + $0x108] sm:$0xff] }
 0x83a   : > { %6260 = vmatprep.subr.bf16.mxu0 %v10612_v13  ;;  %6301 = vmatprep.subr.bf16.mxu1 %v10619_v18  ;;  %v5821_v18 = vld [vmem:[#allocation2 + $0x110] sm:$0xff] }
 0x83b   : > { %6290 = vmatprep.mubr.bf16.mxu0 %v11406_v21  ;;  %6331 = vmatprep.mubr.bf16.mxu1 %v11406_v21 }
 0x83d   : > { %6261 = vmatpush1.bf16.msra.mxu0 %v10615_v53  ;;  %6302 = vmatpush1.bf16.msra.mxu1 %v10617_v27 }
 0x83e   : > { %6262 = vmatprep.subr.bf16.mxu0 %v10628_v24  ;;  %6303 = vmatprep.subr.bf16.mxu1 %v10635_v58 }
 0x841   : > { %6263 = vmatpush1.bf16.msra.mxu0 %v10631_v4  ;;  %6304 = vmatpush1.bf16.msra.mxu1 %v10633_v39 }
 0x842   : > { %6264 = vmatprep.subr.bf16.mxu0 %v10644_v49  ;;  %6305 = vmatprep.subr.bf16.mxu1 %v10651_v1 }
 0x845   : > { %6265 = vmatpush1.bf16.msra.mxu0 %v10647_v44  ;;  %6306 = vmatpush1.bf16.msra.mxu1 %v10649_v0 }
 0x846   : > { %6266 = vmatprep.subr.bf16.mxu0 %v10660_v40  ;;  %6307 = vmatprep.subr.bf16.mxu1 %v10667_v23  ;;  %v5822_v40 = vld [vmem:[#allocation2 + $0x118] sm:$0xff] }
 0x849   : > { %6267 = vmatpush1.bf16.msra.mxu0 %v10663_v34  ;;  %6308 = vmatpush1.bf16.msra.mxu1 %v10665_v33 }
 0x84a   : > { %6268 = vmatprep.subr.bf16.mxu0 %v10676_v62  ;;  %6309 = vmatprep.subr.bf16.mxu1 %v10683_v17 }
 0x84d   : > { %6269 = vmatpush1.bf16.msra.mxu0 %v10679_v9  ;;  %6310 = vmatpush1.bf16.msra.mxu1 %v10681_v15 }
 0x84e   : > { %6270 = vmatprep.subr.bf16.mxu0 %v10692_v52  ;;  %6311 = vmatprep.subr.bf16.mxu1 %v10699_v29 }
 0x851   : > { %6271 = vmatpush1.bf16.msra.mxu0 %v10695_v20  ;;  %6312 = vmatpush1.bf16.msra.mxu1 %v10697_v16 }
 0x852   : > { %6272 = vmatprep.subr.bf16.mxu0 %v10708_v57  ;;  %6313 = vmatprep.subr.bf16.mxu1 %v10715_v63 }
 0x855   : > { %6273 = vmatpush1.bf16.msra.mxu0 %v10711_v45  ;;  %6314 = vmatpush1.bf16.msra.mxu1 %v10713_v51 }
 0x856   : > { %6340 = vmatprep.subr.bf16.mxu0 %v10726_v10  ;;  %6381 = vmatprep.subr.bf16.mxu1 %v10731_v32  ;;  %v5827_v32 = vld [vmem:[#allocation2 + $0xe0] sm:$0xff] }
 0x8eb   : > { %v5689_v2 = vpop.f32.mrb[32].mxu0  ;;  %v5730_v61 = vpop.f32.mrb[32].mxu1 }
 0x8ec   : > { %v5823_v13 = vadd.f32 %v5819_v59, %v5689_v2  ;;  %v5691_v53 = vpop.f32.mrb[33].mxu0  ;;  %v5732_v27 = vpop.f32.mrb[33].mxu1  ;;  %v5825_v1 = vadd.f32 %v5821_v18, %v5730_v61 }
 0x8ed   : > { %v5824_v24 = vadd.f32 %v5820_v37, %v5691_v53  ;;  %v5693_v4 = vpop.f32.mrb[34].mxu0  ;;  %v5734_v39 = vpop.f32.mrb[34].mxu1  ;;  %v5826_v34 = vadd.f32 %v5822_v40, %v5732_v27  ;;  %v5829_v37 = vld [vmem:[#allocation2 + $0xf0] sm:$0xff]  ;;  %v5830_v27 = vld [vmem:[#allocation2 + $0xf8] sm:$0xff] }
 0x8ee   : > { %v5835_v58 = vmul.f32 0.5, %v5823_v13  ;;  %v5694_v49 = vpop.f32.mrb[35].mxu0  ;;  %v5735_v44 = vpop.f32.mrb[35].mxu1 }
 0x8ef   : > { %v5836_v0 = vmul.f32 0.5, %v5824_v24  ;;  %v5851_v33 = vmul.f32 0.5, %v5826_v34 }
 0x8f0   : > { %8795 = vtanh.f32 %v5835_v58 }
 0x8f1   : > { %8797 = vtanh.f32 %v5836_v0 }
 0x8f2   : > { %8799 = vtanh.f32 %v5825_v1 }
 0x8f3   : > { %8801 = vtanh.f32 %v5851_v33 }
 0x8fa   : > { %v8796_v23 = vpop.eup %8795 }
 0x8fb   : > { %v8798_v62 = vpop.eup %8797  ;;  %v5843_v9 = vmul.f32 0.5, %v8796_v23 }
 0x8fc   : > { %v5844_v15 = vmul.f32 0.5, %v8798_v62  ;;  %v8800_v52 = vpop.eup %8799 }
 0x8fd   : > { %v5847_v17 = vadd.f32 0.5, %v5843_v9  ;;  %v8802_v45 = vpop.eup %8801 }
 0x8fe   : > { %v5848_v20 = vadd.f32 0.5, %v5844_v15  ;;  %v5855_v51 = vmul.f32 0.5, %v8802_v45  ;;  %v11459_v45 = vld [vmem:[#allocation26_spill] sm:$0xff] }
 0x8ff   : > { %v5863_v16 = vmul.f32 %v8800_v52, %v5847_v17 }
 0x900   : > { %v5861_v29 = vmul.f32 %v5848_v20, %v10736_v35  ;;  %v5857_v48 = vadd.f32 0.5, %v5855_v51  ;;  %v11452_v20 = vld [vmem:[#allocation18_spill] sm:$0xff]  ;;  %v11462_v51 = vld [vmem:[#allocation29_spill] sm:$0xff] }
 0x902   : > { %v10902_v57 = vadd.f32 %v5863_v16, %v5861_v29  ;;  %v11453_v16 = vld [vmem:[#allocation20_spill] sm:$0xff]  ;;  %v11458_v29 = vld [vmem:[#allocation25_spill] sm:$0xff] }
 0x904   : > { %8803 = vtanh.f32 %v10902_v57 }
 0x90b   : > { %v5771_v63 = vpop.f32.mrb[36].mxu0  ;;  %v5812_v10 = vpop.f32.mrb[36].mxu1 }
 0x90c   : > { %v5772_v28 = vpop.f32.mrb[37].mxu0  ;;  %v5813_v22 = vpop.f32.mrb[37].mxu1  ;;  %v6490_v63 = vld [vmem:[%s9291_s20 + $0x68] sm:$0xff] }
 0x90d   : > { %v5773_v19 = vpop.f32.mrb[38].mxu0  ;;  %v5814_v14 = vpop.f32.mrb[38].mxu1  ;;  %v6493_v22 = vld [vmem:[%s9291_s20 + $0x80] sm:$0xff] }
 0x90e   : > { %v8804_v8 = vpop.eup %8803  ;;  %v5831_v42 = vadd.f32 %v5827_v32, %v5773_v19  ;;  %v5775_v5 = vpop.f32.mrb[39].mxu0  ;;  %v5833_v53 = vadd.f32 %v5829_v37, %v5814_v14  ;;  %v6498_v14 = vld [vmem:[%s9291_s20 + $0xa8] sm:$0xff] }
 0x90f   : > { %v5816_v59 = vpop.f32.mrb[39].mxu1  ;;  %v5869_v35 = vmul.f32 %v8804_v8, %v5857_v48  ;;  %v5832_v2 = vadd.f32 %v5828_v11, %v5775_v5  ;;  %v6497_v11 = vld [vmem:[%s9291_s20 + $0xa0] sm:$0xff]  ;;  %v6494_v48 = vld [vmem:[%s9291_s20 + $0x88] sm:$0xff] }
 0x910   : > { %v5837_v61 = vmul.f32 0.5, %v5831_v42  ;;  %v5834_v18 = vadd.f32 %v5830_v27, %v5816_v59  ;;  %v10978_v19 = vcombine.high %v6493_v22, %v6497_v11  ;;  %v10981_v8 = vcombine.low %v6493_v22, %v6497_v11  ;;  %v6501_v59 = vld [vmem:[%s9291_s20 + $0xc0] sm:$0xff]  ;;  %v6502_v37 = vld [vmem:[%s9291_s20 + $0xc8] sm:$0xff]  ;;  %v6484_v22 = vld [vmem:[%s9291_s20 + $0x38] sm:$0xff] }
 0x911   : > { %5871 = vst [vmem:[#allocation3 + $0x40] sm:$0xff] %v5869_v35  ;;  %v5838_v13 = vmul.f32 0.5, %v5832_v2  ;;  %v10983_v42 = vcombine.low %v6494_v48, %v6498_v14  ;;  %v10985_v5 = vcombine.high %v6494_v48, %v6498_v14  ;;  %v6422_v14 = vld [vmem:[#allocation2 + $0x140] sm:$0xff] }
 0x912   : > { %8805 = vtanh.f32 %v5837_v61  ;;  %v5852_v24 = vmul.f32 0.5, %v5834_v18  ;;  %v6506_v61 = vld [vmem:[%s9291_s20 + $0xe8] sm:$0xff]  ;;  %v6509_v18 = vld [vmem:[%s9291_s20 + $0x100] sm:$0xff] }
 0x913   : > { %8807 = vtanh.f32 %v5838_v13  ;;  %v11001_v27 = vcombine.high %v6502_v37, %v6506_v61 }
 0x914   : > { %8809 = vtanh.f32 %v5833_v53  ;;  %v10999_v53 = vcombine.low %v6502_v37, %v6506_v61 }
 0x915   : > { %8811 = vtanh.f32 %v5852_v24  ;;  %v6513_v24 = vld [vmem:[%s9291_s20 + $0x120] sm:$0xff] }
 0x91c   : > { %v8806_v4 = vpop.eup %8805 }
 0x91d   : > { %v8808_v39 = vpop.eup %8807  ;;  %v5845_v58 = vmul.f32 0.5, %v8806_v4  ;;  %v6510_v4 = vld [vmem:[%s9291_s20 + $0x108] sm:$0xff] }
 0x91e   : > { %v5846_v49 = vmul.f32 0.5, %v8808_v39  ;;  %v8810_v0 = vpop.eup %8809  ;;  %v11010_v39 = vcombine.high %v6509_v18, %v6513_v24 }
 0x91f   : > { %v5849_v44 = vadd.f32 0.5, %v5845_v58  ;;  %v8812_v23 = vpop.eup %8811  ;;  %v6514_v58 = vld [vmem:[%s9291_s20 + $0x128] sm:$0xff] }
 0x920   : > { %v5850_v1 = vadd.f32 0.5, %v5846_v49  ;;  %v5856_v62 = vmul.f32 0.5, %v8812_v23  ;;  %v11013_v49 = vcombine.low %v6509_v18, %v6513_v24 }
 0x921   : > { %v5864_v40 = vmul.f32 %v8810_v0, %v5849_v44  ;;  %v11015_v44 = vcombine.low %v6510_v4, %v6514_v58  ;;  %v11017_v0 = vcombine.high %v6510_v4, %v6514_v58  ;;  %v6424_v4 = vld [vmem:[#allocation2 + $0x150] sm:$0xff] }
 0x922   : > { %v5862_v34 = vmul.f32 %v5850_v1, %v10740_v7  ;;  %v5858_v9 = vadd.f32 0.5, %v5856_v62  ;;  %v11451_v7 = vld [vmem:[#allocation19_spill] sm:$0xff]  ;;  %v6522_v62 = vld [vmem:[%s9291_s20 + $0x168] sm:$0xff] }
 0x923   : > { %v6517_v1 = vld [vmem:[%s9291_s20 + $0x140] sm:$0xff] }
 0x924   : > { %v10906_v33 = vadd.f32 %v5864_v40, %v5862_v34  ;;  %v6521_v40 = vld [vmem:[%s9291_s20 + $0x160] sm:$0xff]  ;;  %v6518_v34 = vld [vmem:[%s9291_s20 + $0x148] sm:$0xff] }
 0x925   : > { %v11026_v23 = vcombine.high %v6517_v1, %v6521_v40 }
 0x926   : > { %8813 = vtanh.f32 %v10906_v33 }
 0x930   : > { %v8814_v15 = vpop.eup %8813 }
 0x931   : > { %v5870_v17 = vmul.f32 %v8814_v15, %v5858_v9  ;;  %v11029_v9 = vcombine.low %v6517_v1, %v6521_v40  ;;  %v11031_v15 = vcombine.low %v6518_v34, %v6522_v62 }
 0x933   : > { %5872 = vst [vmem:[#allocation3 + $0x38] sm:$0xff] %v5870_v17  ;;  %v5873_v52 = vpack.c.bf16 %v5870_v17, %v5869_v35  ;;  %v6505_v35 = vld [vmem:[%s9291_s20 + $0xe0] sm:$0xff]  ;;  %v11033_v17 = vcombine.high %v6518_v34, %v6522_v62 }
 0x934   : > { %v10994_v2 = vcombine.high %v6501_v59, %v6505_v35  ;;  %v10997_v13 = vcombine.low %v6501_v59, %v6505_v35  ;;  %v6423_v59 = vld [vmem:[#allocation2 + $0x148] sm:$0xff] }
 0x935   : > { %6291 = vmatmul.mubr.bf16.vlgmr.msra.gmra.mrb[40].mxu0 %v5873_v52  ;;  %6332 = vmatmul.mubr.bf16.vlgmr.msra.gmra.mrb[40].mxu1 %v5873_v52 }
 0x936   : > { %6341 = vmatpush1.bf16.msra.mxu0 %v10724_v31  ;;  %6382 = vmatpush1.bf16.msra.mxu1 %v10729_v47  ;;  %v11454_v31 = vld [vmem:[#allocation21_spill] sm:$0xff]  ;;  %v11455_v47 = vld [vmem:[#allocation23_spill] sm:$0xff] }
 0x937   : > { %6342 = vmatprep.subr.bf16.mxu0 %v10749_v60  ;;  %6383 = vmatprep.subr.bf16.mxu1 %v10751_v6  ;;  %v11456_v60 = vld [vmem:[#allocation22_spill] sm:$0xff]  ;;  %v11457_v6 = vld [vmem:[#allocation24_spill] sm:$0xff] }
 0x938   : > { %6372 = vmatprep.mubr.bf16.mxu0 %v11406_v21  ;;  %6413 = vmatprep.mubr.bf16.mxu1 %v11406_v21 }
 0x93a   : > { %6343 = vmatpush1.bf16.msra.mxu0 %v10761_v3  ;;  %6384 = vmatpush1.bf16.msra.mxu1 %v10763_v38  ;;  %v11460_v3 = vld [vmem:[#allocation27_spill] sm:$0xff]  ;;  %v11461_v38 = vld [vmem:[#allocation28_spill] sm:$0xff] }
 0x93b   : > { %6344 = vmatprep.subr.bf16.mxu0 %v11451_v7  ;;  %6385 = vmatprep.subr.bf16.mxu1 %v11452_v20  ;;  %v6529_v7 = vld [vmem:[%s9291_s20 + $0x1a0] sm:$0xff]  ;;  %v6526_v20 = vld [vmem:[%s9291_s20 + $0x188] sm:$0xff] }
 0x93e   : > { %6345 = vmatpush1.bf16.msra.mxu0 %v11453_v16  ;;  %6386 = vmatpush1.bf16.msra.mxu1 %v11454_v31  ;;  %v6530_v31 = vld [vmem:[%s9291_s20 + $0x1a8] sm:$0xff] }
 0x93f   : > { %6346 = vmatprep.subr.bf16.mxu0 %v11455_v47  ;;  %6387 = vmatprep.subr.bf16.mxu1 %v11456_v60  ;;  %v11047_v60 = vcombine.low %v6526_v20, %v6530_v31 }
 0x942   : > { %6347 = vmatpush1.bf16.msra.mxu0 %v11457_v6  ;;  %6388 = vmatpush1.bf16.msra.mxu1 %v11458_v29  ;;  %v11049_v6 = vcombine.high %v6526_v20, %v6530_v31  ;;  %v6533_v29 = vld [vmem:[%s9291_s20 + $0x1c0] sm:$0xff]  ;;  %v6425_v31 = vld [vmem:[#allocation2 + $0x158] sm:$0xff] }
 0x943   : > { %6348 = vmatprep.subr.bf16.mxu0 %v11459_v45  ;;  %6389 = vmatprep.subr.bf16.mxu1 %v11460_v3  ;;  %v6537_v45 = vld [vmem:[%s9291_s20 + $0x1e0] sm:$0xff]  ;;  %v6534_v3 = vld [vmem:[%s9291_s20 + $0x1c8] sm:$0xff] }
 0x946   : > { %6349 = vmatpush1.bf16.msra.mxu0 %v10811_v43  ;;  %6390 = vmatpush1.bf16.msra.mxu1 %v10813_v54  ;;  %v6477_v43 = vld [vmem:[%s9291_s20] sm:$0xff] }
 0x947   : > { %6350 = vmatprep.subr.bf16.mxu0 %v10817_v41  ;;  %6391 = vmatprep.subr.bf16.mxu1 %v11461_v38  ;;  %v6481_v54 = vld [vmem:[%s9291_s20 + $0x20] sm:$0xff]  ;;  %v6478_v41 = vld [vmem:[%s9291_s20 + $0x8] sm:$0xff]  ;;  %v11058_v38 = vcombine.high %v6533_v29, %v6537_v45 }
 0x94a   : > { %6351 = vmatpush1.bf16.msra.mxu0 %v11462_v51  ;;  %6392 = vmatpush1.bf16.msra.mxu1 %v10829_v46  ;;  %v10946_v46 = vcombine.high %v6477_v43, %v6481_v54  ;;  %v6538_v51 = vld [vmem:[%s9291_s20 + $0x1e8] sm:$0xff] }
 0x94b   : > { %6352 = vmatprep.subr.bf16.mxu0 %v10833_v12  ;;  %6393 = vmatprep.subr.bf16.mxu1 %v10835_v26  ;;  %v6482_v12 = vld [vmem:[%s9291_s20 + $0x28] sm:$0xff]  ;;  %v10949_v26 = vcombine.low %v6477_v43, %v6481_v54  ;;  %v11061_v43 = vcombine.low %v6533_v29, %v6537_v45  ;;  %v11063_v54 = vcombine.low %v6534_v3, %v6538_v51 }
 0x94e   : > { %6353 = vmatpush1.bf16.msra.mxu0 %v10843_v56  ;;  %6394 = vmatpush1.bf16.msra.mxu1 %v10845_v55  ;;  %v6485_v56 = vld [vmem:[%s9291_s20 + $0x40] sm:$0xff] }
 0x94f   : > { %6354 = vmatprep.subr.bf16.mxu0 %v10849_v25  ;;  %6395 = vmatprep.subr.bf16.mxu1 %v10851_v36  ;;  %v6489_v55 = vld [vmem:[%s9291_s20 + $0x60] sm:$0xff]  ;;  %v6486_v25 = vld [vmem:[%s9291_s20 + $0x48] sm:$0xff] }
 0x950   : > { %v10962_v36 = vcombine.high %v6485_v56, %v6489_v55  ;;  %v10965_v10 = vcombine.low %v6485_v56, %v6489_v55  ;;  %v10967_v32 = vcombine.low %v6486_v25, %v6490_v63  ;;  %v10969_v28 = vcombine.high %v6486_v25, %v6490_v63  ;;  %v6483_v56 = vld [vmem:[%s9291_s20 + $0x30] sm:$0xff]  ;;  %v6480_v55 = vld [vmem:[%s9291_s20 + $0x18] sm:$0xff] }
 0x951   : > { %v11079_v11 = vcombine.low %v6480_v55, %v6484_v22  ;;  %v11081_v48 = vcombine.high %v6480_v55, %v6484_v22 }
 0x952   : > { %6355 = vmatpush1.bf16.msra.mxu0 %v10855_v50  ;;  %6396 = vmatpush1.bf16.msra.mxu1 %v10857_v30  ;;  %v10951_v50 = vcombine.low %v6478_v41, %v6482_v12  ;;  %v10953_v30 = vcombine.high %v6478_v41, %v6482_v12  ;;  %v11065_v41 = vcombine.high %v6534_v3, %v6538_v51  ;;  %v6479_v12 = vld [vmem:[%s9291_s20 + $0x10] sm:$0xff] }
 0x953   : > { %6861 = vmatprep.subr.bf16.mxu0 %v10946_v46  ;;  %v11074_v25 = vcombine.low %v6479_v12, %v6483_v56  ;;  %v11076_v63 = vcombine.high %v6479_v12, %v6483_v56 }
 0x954   : > { %6902 = vmatprep.subr.bf16.mxu1 %v10953_v30 }
 0x955   : > { %6373 = vmatmul.mubr.bf16.vlgmr.msra.gmra.mrb[44].mxu0 %v5873_v52  ;;  %6414 = vmatmul.mubr.bf16.vlgmr.msra.gmra.mrb[44].mxu1 %v5873_v52  ;;  %v6525_v52 = vld [vmem:[%s9291_s20 + $0x180] sm:$0xff] }
 0x956   : > { %6893 = vmatprep.mubr.bf16.mxu0 %v11406_v21  ;;  %6934 = vmatprep.mubr.bf16.mxu1 %v11406_v21  ;;  %v11042_v16 = vcombine.high %v6525_v52, %v6529_v7  ;;  %v11045_v47 = vcombine.low %v6525_v52, %v6529_v7 }
 0x957   : > { %6862 = vmatpush1.bf16.msra.mxu0 %v10949_v26  ;;  %6903 = vmatpush1.bf16.msra.mxu1 %v10951_v50 }
 0x958   : > { %6863 = vmatprep.subr.bf16.mxu0 %v10962_v36  ;;  %6904 = vmatprep.subr.bf16.mxu1 %v10969_v28 }
 0x95b   : > { %6864 = vmatpush1.bf16.msra.mxu0 %v10965_v10  ;;  %6905 = vmatpush1.bf16.msra.mxu1 %v10967_v32 }
 0x95c   : > { %6865 = vmatprep.subr.bf16.mxu0 %v10978_v19  ;;  %6906 = vmatprep.subr.bf16.mxu1 %v10985_v5 }
 0x95f   : > { %6866 = vmatpush1.bf16.msra.mxu0 %v10981_v8  ;;  %6907 = vmatpush1.bf16.msra.mxu1 %v10983_v42 }
 0x960   : > { %6867 = vmatprep.subr.bf16.mxu0 %v10994_v2  ;;  %6908 = vmatprep.subr.bf16.mxu1 %v11001_v27 }
 0x963   : > { %6868 = vmatpush1.bf16.msra.mxu0 %v10997_v13  ;;  %6909 = vmatpush1.bf16.msra.mxu1 %v10999_v53 }
 0x964   : > { %6869 = vmatprep.subr.bf16.mxu0 %v11010_v39  ;;  %6910 = vmatprep.subr.bf16.mxu1 %v11017_v0 }
 0x967   : > { %6870 = vmatpush1.bf16.msra.mxu0 %v11013_v49  ;;  %6911 = vmatpush1.bf16.msra.mxu1 %v11015_v44 }
 0x968   : > { %6871 = vmatprep.subr.bf16.mxu0 %v11026_v23  ;;  %6912 = vmatprep.subr.bf16.mxu1 %v11033_v17 }
 0x96b   : > { %6872 = vmatpush1.bf16.msra.mxu0 %v11029_v9  ;;  %6913 = vmatpush1.bf16.msra.mxu1 %v11031_v15 }
 0x96c   : > { %6873 = vmatprep.subr.bf16.mxu0 %v11042_v16  ;;  %6914 = vmatprep.subr.bf16.mxu1 %v11049_v6 }
 0x96f   : > { %6874 = vmatpush1.bf16.msra.mxu0 %v11045_v47  ;;  %6915 = vmatpush1.bf16.msra.mxu1 %v11047_v60 }
 0x970   : > { %6875 = vmatprep.subr.bf16.mxu0 %v11058_v38  ;;  %6916 = vmatprep.subr.bf16.mxu1 %v11065_v41 }
 0x973   : > { %6876 = vmatpush1.bf16.msra.mxu0 %v11061_v43  ;;  %6917 = vmatpush1.bf16.msra.mxu1 %v11063_v54 }
 0x974   : > { %6943 = vmatprep.subr.bf16.mxu0 %v11076_v63  ;;  %6984 = vmatprep.subr.bf16.mxu1 %v11081_v48 }
 0xa08   : > { %v6292_v35 = vpop.f32.mrb[40].mxu0  ;;  %v6333_v37 = vpop.f32.mrb[40].mxu1 }
 0xa09   : > { %v6426_v61 = vadd.f32 %v6422_v14, %v6292_v35  ;;  %v6294_v18 = vpop.f32.mrb[41].mxu0  ;;  %v6335_v24 = vpop.f32.mrb[41].mxu1  ;;  %v6428_v20 = vadd.f32 %v6424_v4, %v6333_v37 }
 0xa0a   : > { %v6427_v58 = vadd.f32 %v6423_v59, %v6294_v18  ;;  %v6296_v1 = vpop.f32.mrb[42].mxu0  ;;  %v6337_v40 = vpop.f32.mrb[42].mxu1  ;;  %v6429_v29 = vadd.f32 %v6425_v31, %v6335_v24 }
 0xa0b   : > { %v6438_v34 = vmul.f32 0.5, %v6426_v61  ;;  %v6297_v62 = vpop.f32.mrb[43].mxu0  ;;  %v6338_v52 = vpop.f32.mrb[43].mxu1 }
 0xa0c   : > { %v6439_v7 = vmul.f32 0.5, %v6427_v58  ;;  %v6454_v45 = vmul.f32 0.5, %v6429_v29  ;;  %v6430_v58 = vld [vmem:[#allocation2 + $0xa0] sm:$0xff] }
 0xa0d   : > { %8815 = vtanh.f32 %v6438_v34  ;;  %v6431_v34 = vld [vmem:[#allocation2 + $0xa8] sm:$0xff] }
 0xa0e   : > { %8817 = vtanh.f32 %v6439_v7 }
 0xa0f   : > { %8819 = vtanh.f32 %v6428_v20 }
 0xa10   : > { %8821 = vtanh.f32 %v6454_v45 }
 0xa17   : > { %v8816_v3 = vpop.eup %8815 }
 0xa18   : > { %v8818_v51 = vpop.eup %8817  ;;  %v6446_v12 = vmul.f32 0.5, %v8816_v3  ;;  %v6432_v3 = vld [vmem:[#allocation2 + $0xb0] sm:$0xff] }
 0xa19   : > { %v6447_v56 = vmul.f32 0.5, %v8818_v51  ;;  %v8820_v22 = vpop.eup %8819 }
 0xa1a   : > { %v6450_v55 = vadd.f32 0.5, %v6446_v12  ;;  %v8822_v37 = vpop.eup %8821 }
 0xa1b   : > { %v6451_v14 = vadd.f32 0.5, %v6447_v56  ;;  %v6458_v18 = vmul.f32 0.5, %v8822_v37 }
 0xa1c   : > { %v6466_v59 = vmul.f32 %v8820_v22, %v6450_v55  ;;  %v6433_v22 = vld [vmem:[#allocation2 + $0xb8] sm:$0xff] }
 0xa1d   : > { %v6464_v35 = vmul.f32 %v6451_v14, %v10902_v57  ;;  %v6460_v62 = vadd.f32 0.5, %v6458_v18 }
 0xa1f   : > { %v11086_v61 = vadd.f32 %v6466_v59, %v6464_v35 }
 0xa21   : > { %8823 = vtanh.f32 %v11086_v61 }
 0xa28   : > { %v6374_v4 = vpop.f32.mrb[44].mxu0  ;;  %v6415_v24 = vpop.f32.mrb[44].mxu1 }
 0xa29   : > { %v6375_v1 = vpop.f32.mrb[45].mxu0  ;;  %v6416_v40 = vpop.f32.mrb[45].mxu1 }
 0xa2a   : > { %v6376_v52 = vpop.f32.mrb[46].mxu0  ;;  %v6417_v7 = vpop.f32.mrb[46].mxu1 }
 0xa2b   : > { %v8824_v20 = vpop.eup %8823  ;;  %v6434_v31 = vadd.f32 %v6430_v58, %v6376_v52  ;;  %v6378_v29 = vpop.f32.mrb[47].mxu0  ;;  %v6436_v55 = vadd.f32 %v6432_v3, %v6417_v7  ;;  %v6488_v3 = vld [vmem:[%s9291_s20 + $0x58] sm:$0xff] }
 0xa2c   : > { %v6419_v45 = vpop.f32.mrb[47].mxu1  ;;  %v6472_v57 = vmul.f32 %v8824_v20, %v6460_v62  ;;  %v6435_v51 = vadd.f32 %v6431_v34, %v6378_v29 }
 0xa2d   : > { %v6440_v12 = vmul.f32 0.5, %v6434_v31  ;;  %v6437_v14 = vadd.f32 %v6433_v22, %v6419_v45  ;;  %v6487_v31 = vld [vmem:[%s9291_s20 + $0x50] sm:$0xff] }
 0xa2e   : > { %6474 = vst [vmem:[#allocation3 + $0x50] sm:$0xff] %v6472_v57  ;;  %v6441_v56 = vmul.f32 0.5, %v6435_v51  ;;  %v6491_v45 = vld [vmem:[%s9291_s20 + $0x70] sm:$0xff]  ;;  %v6492_v51 = vld [vmem:[%s9291_s20 + $0x78] sm:$0xff] }
 0xa2f   : > { %8825 = vtanh.f32 %v6440_v12  ;;  %v6455_v59 = vmul.f32 0.5, %v6437_v14  ;;  %v6495_v22 = vld [vmem:[%s9291_s20 + $0x90] sm:$0xff] }
 0xa30   : > { %8827 = vtanh.f32 %v6441_v56  ;;  %v6499_v14 = vld [vmem:[%s9291_s20 + $0xb0] sm:$0xff] }
 0xa31   : > { %8829 = vtanh.f32 %v6436_v55  ;;  %v11101_v55 = vcombine.high %v6488_v3, %v6492_v51 }
 0xa32   : > { %8831 = vtanh.f32 %v6455_v59  ;;  %v6496_v59 = vld [vmem:[%s9291_s20 + $0x98] sm:$0xff] }
 0xa39   : > { %v8826_v35 = vpop.eup %8825 }
 0xa3a   : > { %v8828_v37 = vpop.eup %8827  ;;  %v6448_v18 = vmul.f32 0.5, %v8826_v35  ;;  %v6500_v35 = vld [vmem:[%s9291_s20 + $0xb8] sm:$0xff] }
 0xa3b   : > { %v6449_v4 = vmul.f32 0.5, %v8828_v37  ;;  %v8830_v58 = vpop.eup %8829  ;;  %v11113_v37 = vcombine.low %v6488_v3, %v6492_v51  ;;  %v6516_v3 = vld [vmem:[%s9291_s20 + $0x138] sm:$0xff] }
 0xa3c   : > { %v6452_v24 = vadd.f32 0.5, %v6448_v18  ;;  %v8832_v52 = vpop.eup %8831  ;;  %v11117_v18 = vcombine.high %v6495_v22, %v6499_v14 }
 0xa3d   : > { %v6453_v1 = vadd.f32 0.5, %v6449_v4  ;;  %v6459_v7 = vmul.f32 0.5, %v8832_v52  ;;  %v11119_v4 = vcombine.high %v6496_v59, %v6500_v35  ;;  %v11131_v52 = vcombine.low %v6496_v59, %v6500_v35  ;;  %v6519_v59 = vld [vmem:[%s9291_s20 + $0x150] sm:$0xff] }
 0xa3e   : > { %v6467_v40 = vmul.f32 %v8830_v58, %v6452_v24  ;;  %11463 = vst [vmem:[#allocation19_spill] sm:$0xff] %v11117_v18  ;;  %v6503_v24 = vld [vmem:[%s9291_s20 + $0xd0] sm:$0xff] }
 0xa3f   : > { %v6465_v34 = vmul.f32 %v6453_v1, %v10906_v33  ;;  %v6461_v20 = vadd.f32 0.5, %v6459_v7  ;;  %v11099_v33 = vcombine.high %v6487_v31, %v6491_v45  ;;  %11464 = vst [vmem:[#allocation18_spill] sm:$0xff] %v11119_v4  ;;  %v6507_v58 = vld [vmem:[%s9291_s20 + $0xf0] sm:$0xff]  ;;  %v6504_v1 = vld [vmem:[%s9291_s20 + $0xd8] sm:$0xff]  ;;  %11466 = vst [vmem:[#allocation21_spill] sm:$0xff] %v11131_v52 }
 0xa40   : > { %v11135_v7 = vcombine.high %v6503_v24, %v6507_v58  ;;  %v11145_v51 = vcombine.low %v6503_v24, %v6507_v58  ;;  %v6523_v35 = vld [vmem:[%s9291_s20 + $0x170] sm:$0xff] }
 0xa41   : > { %v11090_v62 = vadd.f32 %v6467_v40, %v6465_v34  ;;  %v6508_v40 = vld [vmem:[%s9291_s20 + $0xf8] sm:$0xff]  ;;  %v11129_v34 = vcombine.low %v6495_v22, %v6499_v14 }
 0xa42   : > { %11467 = vst [vmem:[#allocation23_spill] sm:$0xff] %v11135_v7  ;;  %11469 = vst [vmem:[#allocation24_spill] sm:$0xff] %v11145_v51 }
 0xa43   : > { %8833 = vtanh.f32 %v11090_v62  ;;  %11465 = vst [vmem:[#allocation20_spill] sm:$0xff] %v11129_v34 }
 0xa4d   : > { %v8834_v29 = vpop.eup %8833 }
 0xa4e   : > { %v6473_v12 = vmul.f32 %v8834_v29, %v6461_v20  ;;  %v11137_v20 = vcombine.high %v6504_v1, %v6508_v40  ;;  %v6515_v29 = vld [vmem:[%s9291_s20 + $0x130] sm:$0xff] }
 0xa50   : > { %6475 = vst [vmem:[#allocation3 + $0x28] sm:$0xff] %v6473_v12  ;;  %v11097_v56 = vpack.c.bf16 %v6473_v12, %v6472_v57  ;;  %v11111_v57 = vcombine.low %v6487_v31, %v6491_v45  ;;  %11468 = vst [vmem:[#allocation22_spill] sm:$0xff] %v11137_v20  ;;  %v6511_v31 = vld [vmem:[%s9291_s20 + $0x110] sm:$0xff]  ;;  %v6512_v45 = vld [vmem:[%s9291_s20 + $0x118] sm:$0xff]  ;;  %v11147_v12 = vcombine.low %v6504_v1, %v6508_v40 }
 0xa51   : > { %v11151_v22 = vcombine.high %v6511_v31, %v6515_v29  ;;  %v11153_v14 = vcombine.high %v6512_v45, %v6516_v3  ;;  %v11161_v24 = vcombine.low %v6511_v31, %v6515_v29  ;;  %v11163_v58 = vcombine.low %v6512_v45, %v6516_v3 }
 0xa52   : > { %6894 = vmatmul.mubr.bf16.vlgmr.msra.gmra.mrb[48].mxu0 %v11097_v56  ;;  %6935 = vmatmul.mubr.bf16.vlgmr.msra.gmra.mrb[48].mxu1 %v11097_v56  ;;  %11470 = vst [vmem:[#allocation25_spill] sm:$0xff] %v11147_v12  ;;  %v11167_v1 = vcombine.high %v6519_v59, %v6523_v35  ;;  %v11177_v31 = vcombine.low %v6519_v59, %v6523_v35 }
 0xa53   : > { %6944 = vmatpush1.bf16.msra.mxu0 %v11074_v25  ;;  %6985 = vmatpush1.bf16.msra.mxu1 %v11079_v11  ;;  %11471 = vst [vmem:[#allocation26_spill] sm:$0xff] %v11151_v22  ;;  %11472 = vst [vmem:[#allocation27_spill] sm:$0xff] %v11153_v14 }
 0xa54   : > { %6945 = vmatprep.subr.bf16.mxu0 %v11099_v33  ;;  %6986 = vmatprep.subr.bf16.mxu1 %v11101_v55  ;;  %11474 = vst [vmem:[#allocation29_spill] sm:$0xff] %v11177_v31 }
 0xa55   : > { %6975 = vmatprep.mubr.bf16.mxu0 %v11406_v21  ;;  %7016 = vmatprep.mubr.bf16.mxu1 %v11406_v21 }
 0xa57   : > { %6946 = vmatpush1.bf16.msra.mxu0 %v11111_v57  ;;  %6987 = vmatpush1.bf16.msra.mxu1 %v11113_v37 }
 0xa58   : > { %6947 = vmatprep.subr.bf16.mxu0 %v11117_v18  ;;  %6988 = vmatprep.subr.bf16.mxu1 %v11119_v4  ;;  %v6536_v4 = vld [vmem:[%s9291_s20 + $0x1d8] sm:$0xff] }
 0xa59   : > { %v6540_v18 = vld [vmem:[%s9291_s20 + $0x1f8] sm:$0xff] }
 0xa5a   : > { %v11201_v35 = vcombine.high %v6536_v4, %v6540_v18 }
 0xa5b   : > { %6948 = vmatpush1.bf16.msra.mxu0 %v11129_v34  ;;  %6989 = vmatpush1.bf16.msra.mxu1 %v11131_v52  ;;  %v6520_v34 = vld [vmem:[%s9291_s20 + $0x158] sm:$0xff] }
 0xa5c   : > { %6949 = vmatprep.subr.bf16.mxu0 %v11135_v7  ;;  %6990 = vmatprep.subr.bf16.mxu1 %v11137_v20  ;;  %v6524_v52 = vld [vmem:[%s9291_s20 + $0x178] sm:$0xff]  ;;  %v6527_v20 = vld [vmem:[%s9291_s20 + $0x190] sm:$0xff] }
 0xa5d   : > { %v11169_v40 = vcombine.high %v6520_v34, %v6524_v52  ;;  %v6528_v7 = vld [vmem:[%s9291_s20 + $0x198] sm:$0xff]  ;;  %v11179_v29 = vcombine.low %v6520_v34, %v6524_v52 }
 0xa5f   : > { %6950 = vmatpush1.bf16.msra.mxu0 %v11145_v51  ;;  %6991 = vmatpush1.bf16.msra.mxu1 %v11147_v12  ;;  %11473 = vst [vmem:[#allocation28_spill] sm:$0xff] %v11169_v40  ;;  %v6531_v51 = vld [vmem:[%s9291_s20 + $0x1b0] sm:$0xff]  ;;  %v6532_v12 = vld [vmem:[%s9291_s20 + $0x1b8] sm:$0xff] }
 0xa60   : > { %6951 = vmatprep.subr.bf16.mxu0 %v11151_v22  ;;  %6992 = vmatprep.subr.bf16.mxu1 %v11153_v14  ;;  %v11183_v45 = vcombine.high %v6527_v20, %v6531_v51  ;;  %v11185_v3 = vcombine.high %v6528_v7, %v6532_v12  ;;  %v6535_v14 = vld [vmem:[%s9291_s20 + $0x1d0] sm:$0xff]  ;;  %v11193_v59 = vcombine.low %v6527_v20, %v6531_v51 }
 0xa61   : > { %v6539_v22 = vld [vmem:[%s9291_s20 + $0x1f0] sm:$0xff]  ;;  %v11195_v34 = vcombine.low %v6528_v7, %v6532_v12 }
 0xa62   : > { %v11199_v52 = vcombine.high %v6535_v14, %v6539_v22 }
 0xa63   : > { %6952 = vmatpush1.bf16.msra.mxu0 %v11161_v24  ;;  %6993 = vmatpush1.bf16.msra.mxu1 %v11163_v58 }
 0xa64   : > { %6953 = vmatprep.subr.bf16.mxu0 %v11167_v1  ;;  %6994 = vmatprep.subr.bf16.mxu1 %v11169_v40  ;;  %v11205_v40 = vcombine.low %v6535_v14, %v6539_v22 }
 0xa67   : > { %6954 = vmatpush1.bf16.msra.mxu0 %v11177_v31  ;;  %6995 = vmatpush1.bf16.msra.mxu1 %v11179_v29  ;;  %v11207_v31 = vcombine.low %v6536_v4, %v6540_v18  ;;  %v7034_v4 = vld [vmem:[#allocation2 + $0x68] sm:$0xff] }
 0xa68   : > { %6955 = vmatprep.subr.bf16.mxu0 %v11183_v45  ;;  %6996 = vmatprep.subr.bf16.mxu1 %v11185_v3 }
 0xa6b   : > { %6956 = vmatpush1.bf16.msra.mxu0 %v11193_v59  ;;  %6997 = vmatpush1.bf16.msra.mxu1 %v11195_v34 }
 0xa6c   : > { %6957 = vmatprep.subr.bf16.mxu0 %v11199_v52  ;;  %6998 = vmatprep.subr.bf16.mxu1 %v11201_v35 }
 0xa6f   : > { %6958 = vmatpush1.bf16.msra.mxu0 %v11205_v40  ;;  %6999 = vmatpush1.bf16.msra.mxu1 %v11207_v31 }
 0xa70   : > { %7464 = vmatprep.subr.bf16.mxu0 %v10946_v46  ;;  %7505 = vmatprep.subr.bf16.mxu1 %v10953_v30  ;;  %v7025_v46 = vld [vmem:[#allocation2 + $0x180] sm:$0xff] }
 0xa72   : > { %6976 = vmatmul.mubr.bf16.vlgmr.msra.gmra.mrb[52].mxu0 %v11097_v56  ;;  %7017 = vmatmul.mubr.bf16.vlgmr.msra.gmra.mrb[52].mxu1 %v11097_v56 }
 0xa73   : > { %7465 = vmatpush1.bf16.msra.mxu0 %v10949_v26  ;;  %7506 = vmatpush1.bf16.msra.mxu1 %v10951_v50  ;;  %v7026_v26 = vld [vmem:[#allocation2 + $0x188] sm:$0xff] }
 0xa74   : > { %7466 = vmatprep.subr.bf16.mxu0 %v10962_v36  ;;  %7507 = vmatprep.subr.bf16.mxu1 %v10969_v28  ;;  %v7027_v28 = vld [vmem:[#allocation2 + $0x190] sm:$0xff] }
 0xa75   : > { %7496 = vmatprep.mubr.bf16.mxu0 %v11406_v21  ;;  %7537 = vmatprep.mubr.bf16.mxu1 %v11406_v21 }
 0xa77   : > { %7467 = vmatpush1.bf16.msra.mxu0 %v10965_v10  ;;  %7508 = vmatpush1.bf16.msra.mxu1 %v10967_v32 }
 0xa78   : > { %7468 = vmatprep.subr.bf16.mxu0 %v10978_v19  ;;  %7509 = vmatprep.subr.bf16.mxu1 %v10985_v5 }
 0xa7b   : > { %7469 = vmatpush1.bf16.msra.mxu0 %v10981_v8  ;;  %7510 = vmatpush1.bf16.msra.mxu1 %v10983_v42 }
 0xa7c   : > { %7470 = vmatprep.subr.bf16.mxu0 %v10994_v2  ;;  %7511 = vmatprep.subr.bf16.mxu1 %v11001_v27 }
 0xa7f   : > { %7471 = vmatpush1.bf16.msra.mxu0 %v10997_v13  ;;  %7512 = vmatpush1.bf16.msra.mxu1 %v10999_v53 }
 0xa80   : > { %7472 = vmatprep.subr.bf16.mxu0 %v11010_v39  ;;  %7513 = vmatprep.subr.bf16.mxu1 %v11017_v0  ;;  %v7028_v39 = vld [vmem:[#allocation2 + $0x198] sm:$0xff] }
 0xa83   : > { %7473 = vmatpush1.bf16.msra.mxu0 %v11013_v49  ;;  %7514 = vmatpush1.bf16.msra.mxu1 %v11015_v44 }
 0xa84   : > { %7474 = vmatprep.subr.bf16.mxu0 %v11026_v23  ;;  %7515 = vmatprep.subr.bf16.mxu1 %v11033_v17 }
 0xa87   : > { %7475 = vmatpush1.bf16.msra.mxu0 %v11029_v9  ;;  %7516 = vmatpush1.bf16.msra.mxu1 %v11031_v15 }
 0xa88   : > { %7476 = vmatprep.subr.bf16.mxu0 %v11042_v16  ;;  %7517 = vmatprep.subr.bf16.mxu1 %v11049_v6 }
 0xa8b   : > { %7477 = vmatpush1.bf16.msra.mxu0 %v11045_v47  ;;  %7518 = vmatpush1.bf16.msra.mxu1 %v11047_v60 }
 0xa8c   : > { %7478 = vmatprep.subr.bf16.mxu0 %v11058_v38  ;;  %7519 = vmatprep.subr.bf16.mxu1 %v11065_v41 }
 0xa8f   : > { %7479 = vmatpush1.bf16.msra.mxu0 %v11061_v43  ;;  %7520 = vmatpush1.bf16.msra.mxu1 %v11063_v54 }
 0xa90   : > { %7546 = vmatprep.subr.bf16.mxu0 %v11076_v63  ;;  %7587 = vmatprep.subr.bf16.mxu1 %v11081_v48  ;;  %v7033_v48 = vld [vmem:[#allocation2 + $0x60] sm:$0xff] }
 0xb25   : > { %v6895_v50 = vpop.f32.mrb[48].mxu0  ;;  %v6936_v30 = vpop.f32.mrb[48].mxu1 }
 0xb26   : > { %v7029_v36 = vadd.f32 %v7025_v46, %v6895_v50  ;;  %v6897_v10 = vpop.f32.mrb[49].mxu0  ;;  %v6938_v32 = vpop.f32.mrb[49].mxu1  ;;  %v7031_v27 = vadd.f32 %v7027_v28, %v6936_v30 }
 0xb27   : > { %v7030_v19 = vadd.f32 %v7026_v26, %v6897_v10  ;;  %v6899_v8 = vpop.f32.mrb[50].mxu0  ;;  %v6940_v42 = vpop.f32.mrb[50].mxu1  ;;  %v7032_v49 = vadd.f32 %v7028_v39, %v6938_v32  ;;  %v7035_v26 = vld [vmem:[#allocation2 + $0x70] sm:$0xff]  ;;  %v7036_v32 = vld [vmem:[#allocation2 + $0x78] sm:$0xff] }
 0xb28   : > { %v7041_v5 = vmul.f32 0.5, %v7029_v36  ;;  %v6900_v2 = vpop.f32.mrb[51].mxu0  ;;  %v6941_v13 = vpop.f32.mrb[51].mxu1 }
 0xb29   : > { %v7042_v53 = vmul.f32 0.5, %v7030_v19  ;;  %v7057_v44 = vmul.f32 0.5, %v7032_v49 }
 0xb2a   : > { %8835 = vtanh.f32 %v7041_v5 }
 0xb2b   : > { %8837 = vtanh.f32 %v7042_v53 }
 0xb2c   : > { %8839 = vtanh.f32 %v7031_v27 }
 0xb2d   : > { %8841 = vtanh.f32 %v7057_v44 }
 0xb34   : > { %v8836_v0 = vpop.eup %8835 }
 0xb35   : > { %v8838_v23 = vpop.eup %8837  ;;  %v7049_v9 = vmul.f32 0.5, %v8836_v0 }
 0xb36   : > { %v7050_v15 = vmul.f32 0.5, %v8838_v23  ;;  %v8840_v16 = vpop.eup %8839 }
 0xb37   : > { %v7053_v17 = vadd.f32 0.5, %v7049_v9  ;;  %v8842_v43 = vpop.eup %8841 }
 0xb38   : > { %v7054_v47 = vadd.f32 0.5, %v7050_v15  ;;  %v7061_v54 = vmul.f32 0.5, %v8842_v43  ;;  %v11486_v43 = vld [vmem:[#allocation29_spill] sm:$0xff] }
 0xb39   : > { %v7069_v60 = vmul.f32 %v8840_v16, %v7053_v17 }
 0xb3a   : > { %v7067_v6 = vmul.f32 %v7054_v47, %v11086_v61  ;;  %v7063_v7 = vadd.f32 0.5, %v7061_v54  ;;  %v11476_v47 = vld [vmem:[#allocation18_spill] sm:$0xff] }
 0xb3c   : > { %v11252_v38 = vadd.f32 %v7069_v60, %v7067_v6  ;;  %v11477_v60 = vld [vmem:[#allocation20_spill] sm:$0xff]  ;;  %v11482_v6 = vld [vmem:[#allocation25_spill] sm:$0xff] }
 0xb3e   : > { %8843 = vtanh.f32 %v11252_v38 }
 0xb45   : > { %v6977_v41 = vpop.f32.mrb[52].mxu0  ;;  %v7018_v63 = vpop.f32.mrb[52].mxu1 }
 0xb46   : > { %v6978_v56 = vpop.f32.mrb[53].mxu0  ;;  %v7019_v18 = vpop.f32.mrb[53].mxu1 }
 0xb47   : > { %v6979_v20 = vpop.f32.mrb[54].mxu0  ;;  %v7020_v51 = vpop.f32.mrb[54].mxu1 }
 0xb48   : > { %v8844_v12 = vpop.eup %8843  ;;  %v7037_v22 = vadd.f32 %v7033_v48, %v6979_v20  ;;  %v6981_v14 = vpop.f32.mrb[55].mxu0  ;;  %v7039_v10 = vadd.f32 %v7035_v26, %v7020_v51 }
 0xb49   : > { %v7022_v46 = vpop.f32.mrb[55].mxu1  ;;  %v7075_v61 = vmul.f32 %v8844_v12, %v7063_v7  ;;  %v7038_v50 = vadd.f32 %v7034_v4, %v6981_v14 }
 0xb4a   : > { %v7043_v30 = vmul.f32 0.5, %v7037_v22  ;;  %v7040_v28 = vadd.f32 %v7036_v32, %v7022_v46 }
 0xb4b   : > { %7077 = vst [vmem:[#allocation3 + $0x60] sm:$0xff] %v7075_v61  ;;  %v7044_v36 = vmul.f32 0.5, %v7038_v50 }
 0xb4c   : > { %8845 = vtanh.f32 %v7043_v30  ;;  %v7058_v19 = vmul.f32 0.5, %v7040_v28  ;;  %v7636_v28 = vld [vmem:[#allocation2 + $0x20] sm:$0xff] }
 0xb4d   : > { %8847 = vtanh.f32 %v7044_v36 }
 0xb4e   : > { %8849 = vtanh.f32 %v7039_v10 }
 0xb4f   : > { %8851 = vtanh.f32 %v7058_v19 }
 0xb56   : > { %v8846_v8 = vpop.eup %8845 }
 0xb57   : > { %v8848_v42 = vpop.eup %8847  ;;  %v7051_v5 = vmul.f32 0.5, %v8846_v8 }
 0xb58   : > { %v7052_v2 = vmul.f32 0.5, %v8848_v42  ;;  %v8850_v53 = vpop.eup %8849  ;;  %v7637_v42 = vld [vmem:[#allocation2 + $0x28] sm:$0xff] }
 0xb59   : > { %v7055_v13 = vadd.f32 0.5, %v7051_v5  ;;  %v8852_v0 = vpop.eup %8851 }
 0xb5a   : > { %v7056_v27 = vadd.f32 0.5, %v7052_v2  ;;  %v7062_v23 = vmul.f32 0.5, %v8852_v0 }
 0xb5b   : > { %v7070_v39 = vmul.f32 %v8850_v53, %v7055_v13 }
 0xb5c   : > { %v7068_v49 = vmul.f32 %v7056_v27, %v11090_v62  ;;  %v7064_v9 = vadd.f32 0.5, %v7062_v23  ;;  %v11475_v62 = vld [vmem:[#allocation19_spill] sm:$0xff]  ;;  %v7638_v23 = vld [vmem:[#allocation2 + $0x30] sm:$0xff] }
 0xb5e   : > { %v11256_v44 = vadd.f32 %v7070_v39, %v7068_v49 }
 0xb60   : > { %8853 = vtanh.f32 %v11256_v44 }
 0xb6a   : > { %v8854_v15 = vpop.eup %8853 }
 0xb6b   : > { %v7076_v17 = vmul.f32 %v8854_v15, %v7064_v9 }
 0xb6d   : > { %7078 = vst [vmem:[#allocation3 + $0x18] sm:$0xff] %v7076_v17  ;;  %v7079_v16 = vpack.c.bf16 %v7076_v17, %v7075_v61 }
 0xb6f   : > { %7497 = vmatmul.mubr.bf16.vlgmr.msra.gmra.mrb[56].mxu0 %v7079_v16  ;;  %7538 = vmatmul.mubr.bf16.vlgmr.msra.gmra.mrb[56].mxu1 %v7079_v16 }
 0xb70   : > { %7547 = vmatpush1.bf16.msra.mxu0 %v11074_v25  ;;  %7588 = vmatpush1.bf16.msra.mxu1 %v11079_v11  ;;  %v11478_v25 = vld [vmem:[#allocation21_spill] sm:$0xff]  ;;  %v11479_v11 = vld [vmem:[#allocation23_spill] sm:$0xff] }
 0xb71   : > { %7548 = vmatprep.subr.bf16.mxu0 %v11099_v33  ;;  %7589 = vmatprep.subr.bf16.mxu1 %v11101_v55  ;;  %v11480_v33 = vld [vmem:[#allocation22_spill] sm:$0xff]  ;;  %v11481_v55 = vld [vmem:[#allocation24_spill] sm:$0xff] }
 0xb72   : > { %7578 = vmatprep.mubr.bf16.mxu0 %v11406_v21  ;;  %7619 = vmatprep.mubr.bf16.mxu1 %v11406_v21  ;;  %v11483_v21 = vld [vmem:[#allocation26_spill] sm:$0xff] }
 0xb74   : > { %7549 = vmatpush1.bf16.msra.mxu0 %v11111_v57  ;;  %7590 = vmatpush1.bf16.msra.mxu1 %v11113_v37  ;;  %v11484_v57 = vld [vmem:[#allocation27_spill] sm:$0xff]  ;;  %v11485_v37 = vld [vmem:[#allocation28_spill] sm:$0xff] }
 0xb75   : > { %7550 = vmatprep.subr.bf16.mxu0 %v11475_v62  ;;  %7591 = vmatprep.subr.bf16.mxu1 %v11476_v47 }
 0xb78   : > { %7551 = vmatpush1.bf16.msra.mxu0 %v11477_v60  ;;  %7592 = vmatpush1.bf16.msra.mxu1 %v11478_v25 }
 0xb79   : > { %7552 = vmatprep.subr.bf16.mxu0 %v11479_v11  ;;  %7593 = vmatprep.subr.bf16.mxu1 %v11480_v33 }
 0xb7c   : > { %7553 = vmatpush1.bf16.msra.mxu0 %v11481_v55  ;;  %7594 = vmatpush1.bf16.msra.mxu1 %v11482_v6 }
 0xb7d   : > { %7554 = vmatprep.subr.bf16.mxu0 %v11483_v21  ;;  %7595 = vmatprep.subr.bf16.mxu1 %v11484_v57 }
 0xb80   : > { %7555 = vmatpush1.bf16.msra.mxu0 %v11161_v24  ;;  %7596 = vmatpush1.bf16.msra.mxu1 %v11163_v58  ;;  %v7628_v24 = vld [vmem:[#allocation2 + $0x1c0] sm:$0xff]  ;;  %v7629_v58 = vld [vmem:[#allocation2 + $0x1c8] sm:$0xff] }
 0xb81   : > { %7556 = vmatprep.subr.bf16.mxu0 %v11167_v1  ;;  %7597 = vmatprep.subr.bf16.mxu1 %v11485_v37 }
 0xb84   : > { %7557 = vmatpush1.bf16.msra.mxu0 %v11486_v43  ;;  %7598 = vmatpush1.bf16.msra.mxu1 %v11179_v29 }
 0xb85   : > { %7558 = vmatprep.subr.bf16.mxu0 %v11183_v45  ;;  %7599 = vmatprep.subr.bf16.mxu1 %v11185_v3 }
 0xb88   : > { %7559 = vmatpush1.bf16.msra.mxu0 %v11193_v59  ;;  %7600 = vmatpush1.bf16.msra.mxu1 %v11195_v34  ;;  %v7630_v59 = vld [vmem:[#allocation2 + $0x1d0] sm:$0xff] }
 0xb89   : > { %7560 = vmatprep.subr.bf16.mxu0 %v11199_v52  ;;  %7601 = vmatprep.subr.bf16.mxu1 %v11201_v35 }
 0xb8c   : > { %7561 = vmatpush1.bf16.msra.mxu0 %v11205_v40  ;;  %7602 = vmatpush1.bf16.msra.mxu1 %v11207_v31  ;;  %v7631_v31 = vld [vmem:[#allocation2 + $0x1d8] sm:$0xff] }
 0xb8f   : > { %7579 = vmatmul.mubr.bf16.vlgmr.msra.gmra.mrb[60].mxu0 %v7079_v16  ;;  %7620 = vmatmul.mubr.bf16.vlgmr.msra.gmra.mrb[60].mxu1 %v7079_v16  ;;  %v7639_v16 = vld [vmem:[#allocation2 + $0x38] sm:$0xff] }
 0xc42   : > { %v7498_v1 = vpop.f32.mrb[56].mxu0  ;;  %v7539_v29 = vpop.f32.mrb[56].mxu1 }
 0xc43   : > { %v7632_v45 = vadd.f32 %v7628_v24, %v7498_v1  ;;  %v7500_v3 = vpop.f32.mrb[57].mxu0  ;;  %v7541_v54 = vpop.f32.mrb[57].mxu1  ;;  %v7634_v40 = vadd.f32 %v7630_v59, %v7539_v29  ;;  %v7688_v59 = vld [vmem:[#allocation10] sm:$0x3] (!%p8631_p1) }
 0xc44   : > { %v7633_v41 = vadd.f32 %v7629_v58, %v7500_v3  ;;  %v7502_v34 = vpop.f32.mrb[58].mxu0  ;;  %v7543_v63 = vpop.f32.mrb[58].mxu1  ;;  %v7635_v18 = vadd.f32 %v7631_v31, %v7541_v54  ;;  %v7690_v3 = vlaneseq (!%p8631_p1)  ;;  %v8632_v31 = vld [vmem:[#allocation4] ss:$0 sm:$0xff] (!%p8631_p1) }
 0xc45   : > { %v7644_v52 = vmul.f32 0.5, %v7632_v45  ;;  %v7503_v48 = vpop.f32.mrb[59].mxu0  ;;  %v7544_v35 = vpop.f32.mrb[59].mxu1 }
 0xc46   : > { %v7645_v56 = vmul.f32 0.5, %v7633_v41  ;;  %v7660_v4 = vmul.f32 0.5, %v7635_v18  ;;  %v7691_v54 = vshrl.u32 (!%p8631_p1), %v7690_v3, 7 }
 0xc47   : > { %8855 = vtanh.f32 %v7644_v52  ;;  %v7687_v52 = vld [vmem:[#allocation3 + $0x78] sm:$0xff] (!%p8631_p1) }
 0xc48   : > { %8857 = vtanh.f32 %v7645_v56  ;;  %v7692_v41 = vsub.s32 (!%p8631_p1), 0, %v7691_v54  ;;  %v7696_v34 = vsub.s32 (!%p8631_p1), 1, %v7691_v54 }
 0xc49   : > { %8859 = vtanh.f32 %v7634_v40 }
 0xc4a   : > { %8861 = vtanh.f32 %v7660_v4  ;;  %v7693_v48 = vrot.slane (!%p8631_p1), %v7688_v59, %v7692_v41 }
 0xc51   : > { %v8856_v7 = vpop.eup %8855 }
 0xc52   : > { %v8858_v20 = vpop.eup %8857  ;;  %v7652_v51 = vmul.f32 0.5, %v8856_v7 }
 0xc53   : > { %v7653_v12 = vmul.f32 0.5, %v8858_v20  ;;  %v8860_v14 = vpop.eup %8859 }
 0xc54   : > { %v7656_v22 = vadd.f32 0.5, %v7652_v51  ;;  %v8862_v30 = vpop.eup %8861 }
 0xc55   : > { %v7657_v46 = vadd.f32 0.5, %v7653_v12  ;;  %v7664_v36 = vmul.f32 0.5, %v8862_v30 }
 0xc56   : > { %v7672_v61 = vmul.f32 %v8860_v14, %v7656_v22 }
 0xc57   : > { %v7670_v26 = vmul.f32 %v7657_v46, %v11252_v38  ;;  %v7666_v5 = vadd.f32 0.5, %v7664_v36 }
 0xc59   : > { %v7674_v50 = vadd.f32 %v7672_v61, %v7670_v26 }
 0xc5b   : > { %8863 = vtanh.f32 %v7674_v50 }
 0xc62   : > { %v7580_v10 = vpop.f32.mrb[60].mxu0  ;;  %v7621_v32 = vpop.f32.mrb[60].mxu1 }
 0xc63   : > { %v7581_v19 = vpop.f32.mrb[61].mxu0  ;;  %v7622_v8 = vpop.f32.mrb[61].mxu1 }
 0xc64   : > { %v7582_v2 = vpop.f32.mrb[62].mxu0  ;;  %v7623_v13 = vpop.f32.mrb[62].mxu1 }
 0xc65   : > { %v8864_v53 = vpop.eup %8863  ;;  %v7640_v27 = vadd.f32 %v7636_v28, %v7582_v2  ;;  %v7584_v39 = vpop.f32.mrb[63].mxu0  ;;  %v7642_v17 = vadd.f32 %v7638_v23, %v7623_v13 }
 0xc66   : > { %v7625_v49 = vpop.f32.mrb[63].mxu1  ;;  %v7678_v0 = vmul.f32 %v8864_v53, %v7666_v5  ;;  %v7641_v38 = vadd.f32 %v7637_v42, %v7584_v39 }
 0xc67   : > { %v7646_v9 = vmul.f32 0.5, %v7640_v27  ;;  %v7643_v62 = vadd.f32 %v7639_v16, %v7625_v49 }
 0xc68   : > { %7680 = vst [vmem:[#allocation3 + $0x70] sm:$0xff] %v7678_v0  ;;  %v7647_v15 = vmul.f32 0.5, %v7641_v38 }
 0xc69   : > { %8865 = vtanh.f32 %v7646_v9  ;;  %v7661_v47 = vmul.f32 0.5, %v7643_v62 }
 0xc6a   : > { %8867 = vtanh.f32 %v7647_v15 }
 0xc6b   : > { %8869 = vtanh.f32 %v7642_v17 }
 0xc6c   : > { %8871 = vtanh.f32 %v7661_v47 }
 0xc6f   : > { %v7686_v63 = vld [vmem:[#allocation3 + $0x70] sm:$0xff] (!%p8631_p1) }
 0xc70   : > { %v7700_v35 = vmul.f32 (!%p8631_p1), %v7693_v48, %v7686_v63 }
 0xc73   : > { %v8866_v60 = vpop.eup %8865 }
 0xc74   : > { %v8868_v25 = vpop.eup %8867  ;;  %v7654_v11 = vmul.f32 0.5, %v8866_v60 }
 0xc75   : > { %v7655_v33 = vmul.f32 0.5, %v8868_v25  ;;  %v8870_v6 = vpop.eup %8869 }
 0xc76   : > { %v7658_v55 = vadd.f32 0.5, %v7654_v11  ;;  %v8872_v24 = vpop.eup %8871 }
 0xc77   : > { %v7659_v21 = vadd.f32 0.5, %v7655_v33  ;;  %v7665_v58 = vmul.f32 0.5, %v8872_v24 }
 0xc78   : > { %v7673_v57 = vmul.f32 %v8870_v6, %v7658_v55 }
 0xc79   : > { %v7671_v37 = vmul.f32 %v7659_v21, %v11256_v44  ;;  %v7667_v1 = vadd.f32 0.5, %v7665_v58  ;;  %v7697_v44 = vrot.slane (!%p8631_p1), %v7688_v59, %v7696_v34 }
 0xc7b   : > { %v7675_v43 = vadd.f32 %v7673_v57, %v7671_v37  ;;  %v7701_v56 = vmul.f32 (!%p8631_p1), %v7697_v44, %v7687_v52 }
 0xc7d   : > { %8873 = vtanh.f32 %v7675_v43  ;;  %v7702_v40 = vadd.f32 (!%p8631_p1), %v7701_v56, %v7700_v35 }
 0xc7f   : > { %7703 = vadd.xlane.f32.xlu0 (!%p8631_p1), %v7702_v40 }
 0xc84   : > { %7685 = sbr.rel (%p8631_p1) target bundleno = 3344 (0xd10), region = 80 }
 0xc87   : > { %v8874_v29 = vpop.eup %8873 }
 0xc88   : > { %v7679_v45 = vmul.f32 %v8874_v29, %v7667_v1 }
 0xc8a   : > { %7681 = vst [vmem:[#allocation3 + $0x8] sm:$0xff] %v7679_v45 }
 0xd0c   : > { %v7704_v18 = vpop.xlane.xlu0 %7703 }
 0xd0d   : > { %v7712_v4 = vadd.f32 %v8632_v31, %v7704_v18 }
 0xd0f   : > { %7714 = vst.msk [vmem:[%s11318_s8] sm:$0xff] %vm7713_vm0, %v7712_v4 }
 0xd10 PF: > { %s11487_s10 = sld [smem:[#allocation16_spill]]  ;;  %s11488_s20 = sld [smem:[#allocation15_spill]] }
 0xd11   : > { %s11489_s9 = sld [smem:[#allocation17_spill]]  ;;  %s11490_s29 = smov %s9027_s30 }
 0xd16   : > { %p24_p10 = scmp.ge.s32.totalorder %s11487_s10, 5   ;;  %s11491_s30 = smov %s11488_s20 }
 0xd18   :  { %26 = sbr.rel (!%p24_p10) target bundleno = 9 (0x9), region = 134 }
 0xd1f   :  { %7726 = vsyncpa [#allocation6], 1 }
 0xd20   :  { %7728 = vsyncpa [#allocation6 + $0x1], 1 }
 0xd21   :  { %7729 = vsyncpa [#allocation8], 1 }
 0xd22   :  { %7731 = vsyncpa [#allocation8 + $0x1], 1 }
 0xd23   :  { %7732 = vsyncpa [#allocation11], 1 }

</bundles_post_ra>
